<compile_context>
chip_gen: v7x
topology: tpu7x:2x2x1
jax: 0.10.0
libtpu: 0.0.40
codegen_flags: <defaults>
</compile_context>

<pallas_src>
import functools

import jax
import jax.numpy as jnp
from jax import lax
from jax.experimental import pallas as pl
from jax.experimental.pallas import tpu as pltpu

WIN = 7                       # skimage default win_size
K1 = 0.01
K2 = 0.03
HALO = 8                      # halo rows from the next row tile (>= WIN-1, multiple of 8)


def _vmem_capacity_bytes():
    try:
        return int(pltpu.get_tpu_info().vmem_capacity_bytes)
    except Exception:
        return 64 * 1024 * 1024  # conservative (v7x per-TC size)


def _custom_loss_kernel(params_ref, x_ref, y_ref, xh_ref, yh_ref,
                        ra_ref, rah_ref, cb_ref, d2_ref, sm_ref, *, H, W):
    """Single row-tile step: MSE partial + SSIM-map partial via MXU box filters.

    params_ref : SMEM (2,) f32, [c1, c2] from the wrapper-computed data_range.
    x/y        : (TR, Wp) pred / gt row tile.
    xh/yh      : (HALO, Wp) first rows of the next tile (wraps on the last tile,
                 those rows are masked out of the sum).
    ra/rah/cb  : banded box-filter matrices (rows / halo-rows / columns).
    d2/sm      : (1, 8, 128) lane-dense per-tile partial outputs.
    """
    t = pl.program_id(0)
    tr, wp = x_ref.shape

    c1 = params_ref[0]
    c2 = params_ref[1]

    x = x_ref[...].astype(jnp.float32)
    y = y_ref[...].astype(jnp.float32)
    xh = xh_ref[...].astype(jnp.float32)
    yh = yh_ref[...].astype(jnp.float32)

    # ---- MSE partial (zero-padded rows/cols contribute 0 since pred == gt there)
    d = x - y
    d2 = jnp.sum(d * d)

    # ---- separable 7x7 box sums on the MXU (banded matmuls) ----
    ra = ra_ref[...]          # (TR, TR)   7-row sums within the tile
    rah = rah_ref[...]        # (TR, HALO) 7-row-sum correction from the halo
    cb = cb_ref[...]          # (Wp, Wp)   7-column sums

    mm = functools.partial(jnp.dot, preferred_element_type=jnp.float32,
                           precision=jax.lax.Precision.HIGHEST)

    def box(m, mh):
        # rows (sublane axis) then columns (lane axis); all on the MXU.
        return mm(mm(ra, m) + mm(rah, mh), cb)

    inv_np = 1.0 / float(WIN * WIN)
    # Each box() is computed end-to-end before the next one starts, keeping the
    # number of simultaneously-live (TR, Wp) intermediates small (v5e vst slot).
    ux = box(x, xh) * inv_np
    uy = box(y, yh) * inv_np
    uxx = box(x * x, xh * xh) * inv_np
    uyy = box(y * y, yh * yh) * inv_np
    uxy = box(x * y, xh * yh) * inv_np

    cov_norm = float(WIN * WIN) / float(WIN * WIN - 1)   # sample covariance
    vx = cov_norm * (uxx - ux * ux)
    vy = cov_norm * (uyy - uy * uy)
    vxy = cov_norm * (uxy - ux * uy)

    num = (2.0 * ux * uy + c1) * (2.0 * vxy + c2)
    den = (ux * ux + uy * uy + c1) * (vx + vy + c2)
    s_map = num * pl.reciprocal(den, approx=False)       # EUP, frees VPU cycles

    # ---- keep only windows whose full 7x7 support lies inside the true HxW image
    rr = lax.broadcasted_iota(jnp.int32, (tr, wp), 0)
    cc = lax.broadcasted_iota(jnp.int32, (tr, wp), 1)
    valid = jnp.logical_and(rr + t * tr <= H - WIN, cc <= W - WIN)
    sm = jnp.sum(jnp.where(valid, s_map, 0.0))

    d2_ref[...] = jnp.full(d2_ref.shape, d2, dtype=jnp.float32)
    sm_ref[...] = jnp.full(sm_ref.shape, sm, dtype=jnp.float32)


def custom_loss(depth_pred, depth_gt, *, row_tile=None):
    """total_loss = MSE(pred, gt) * exp(1 - SSIM(gt, pred)), Pallas-TPU backed."""
    assert depth_pred.shape == depth_gt.shape and depth_pred.ndim == 2
    H, W = depth_pred.shape
    assert H >= WIN and W >= WIN, "image must be at least win_size (7) per dim"

    # ---- lane-dense padding and generation-aware row-tile choice ----
    Wp = ((W + 127) // 128) * 128
    Hp8 = ((H + 7) // 8) * 8

    vmem_cap = _vmem_capacity_bytes()
    # ~35 MiB on v7x (64 MiB physical per TC); capped at 64 MiB on v5e/v6e (128 MiB).
    vmem_limit = int(min(vmem_cap * 0.55, 64 * 1024 * 1024))
    vmem_limit = max(vmem_limit, 16 * 1024 * 1024)

    if row_tile is None:
        # ~20 live (TR, Wp) f32 intermediates (tiles, products, filtered maps,
        # SSIM temps, double-buffered input blocks) + resident (Wp, Wp) column
        # filter; keep them within ~half the VMEM limit.  Cap at 512 rows so the
        # banded row matmul (TR MACs/pixel) stays cheap on the MXU.
        budget = vmem_limit // 2 - 4 * Wp * Wp
        row_tile = max(8, min(512, budget // (20 * 4 * Wp)))
    tr = max(8, min((int(row_tile) // 8) * 8, Hp8))
    Hp = ((H + tr - 1) // tr) * tr
    nt = Hp // tr

    pad_h, pad_w = Hp - H, Wp - W
    if pad_h or pad_w:
        pred_p = jnp.pad(depth_pred, ((0, pad_h), (0, pad_w)))
        gt_p = jnp.pad(depth_gt, ((0, pad_h), (0, pad_w)))
    else:
        pred_p, gt_p = depth_pred, depth_gt

    # ---- data_range (global min/max of pred) hoisted out of the kernel ----
    pred32 = depth_pred.astype(jnp.float32)
    data_range = jnp.max(pred32) - jnp.min(pred32)
    c1 = (K1 * data_range) ** 2
    c2 = (K2 * data_range) ** 2
    params = jnp.stack([c1, c2]).astype(jnp.float32)

    # ---- banded box-filter matrices (0/1 entries; DMA'd once, stay resident) ----
    ii = jnp.arange(tr)[:, None]
    kk = jnp.arange(tr)[None, :]
    ra = ((kk >= ii) & (kk <= ii + WIN - 1)).astype(jnp.float32)            # (tr, tr)
    hh = jnp.arange(HALO)[None, :]
    rah = ((tr + hh >= ii) & (tr + hh <= ii + WIN - 1)).astype(jnp.float32)  # (tr, HALO)
    kc = jnp.arange(Wp)[:, None]
    jc = jnp.arange(Wp)[None, :]
    cb = ((jc <= kc) & (kc <= jc + WIN - 1)).astype(jnp.float32)            # (Wp, Wp)

    halo_blocks = tr // HALO

    def halo_map(t):
        # First HALO rows of the next row tile; wraps on the last tile (masked).
        return (((t + 1) % nt) * halo_blocks, 0)

    kernel = functools.partial(_custom_loss_kernel, H=H, W=W)

    part_d2, part_sm = pl.pallas_call(
        kernel,
        out_shape=(jax.ShapeDtypeStruct((nt, 8, 128), jnp.float32),
                   jax.ShapeDtypeStruct((nt, 8, 128), jnp.float32)),
        grid=(nt,),
        in_specs=[
            pl.BlockSpec(memory_space=pltpu.MemorySpace.SMEM),    # (c1, c2) scalars
            pl.BlockSpec((tr, Wp), lambda t: (t, 0)),             # pred row tile
            pl.BlockSpec((tr, Wp), lambda t: (t, 0)),             # gt row tile
            pl.BlockSpec((HALO, Wp), halo_map),                   # pred halo
            pl.BlockSpec((HALO, Wp), halo_map),                   # gt halo
            pl.BlockSpec((tr, tr), lambda t: (0, 0)),             # row filter (resident)
            pl.BlockSpec((tr, HALO), lambda t: (0, 0)),           # halo row filter
            pl.BlockSpec((Wp, Wp), lambda t: (0, 0)),             # column filter (resident)
        ],
        out_specs=(pl.BlockSpec((1, 8, 128), lambda t: (t, 0, 0)),
                   pl.BlockSpec((1, 8, 128), lambda t: (t, 0, 0))),
        compiler_params=pltpu.CompilerParams(
            dimension_semantics=("parallel",),                    # megacore-safe now
            vmem_limit_bytes=vmem_limit,
        ),
    )(params, pred_p, gt_p, pred_p, gt_p, ra, rah, cb)

    # ---- tiny finalize in JAX (3 scalar ops) ----
    mse = jnp.sum(part_d2[:, 0, 0]) / float(H * W)
    mssim = jnp.sum(part_sm[:, 0, 0]) / float((H - WIN + 1) * (W - WIN + 1))
    return mse * jnp.exp(1.0 - mssim)


def _reference_loss(pred, gt):
    """Pure-JAX reference replicating the same math (for validation)."""
    pred = pred.astype(jnp.float32)
    gt = gt.astype(jnp.float32)
    H, W = pred.shape
    hv, wv = H - WIN + 1, W - WIN + 1
    mse = jnp.mean((pred - gt) ** 2)
    data_range = jnp.max(pred) - jnp.min(pred)

    def box(q):
        r = sum(q[i:i + hv, :] for i in range(WIN))
        s = sum(r[:, j:j + wv] for j in range(WIN))
        return s / (WIN * WIN)

    ux, uy = box(pred), box(gt)
    uxx, uyy, uxy = box(pred * pred), box(gt * gt), box(pred * gt)
    cov_norm = (WIN * WIN) / (WIN * WIN - 1.0)
    vx = cov_norm * (uxx - ux * ux)
    vy = cov_norm * (uyy - uy * uy)
    vxy = cov_norm * (uxy - ux * uy)
    c1, c2 = (K1 * data_range) ** 2, (K2 * data_range) ** 2
    s_map = ((2 * ux * uy + c1) * (2 * vxy + c2)) / \
            ((ux * ux + uy * uy + c1) * (vx + vy + c2))
    mssim = jnp.mean(s_map)
    return mse * jnp.exp(1.0 - mssim)


if __name__ == "__main__":
    key = jax.random.PRNGKey(0)

    def run_case(H, W, row_tile, k):
        k1, k2 = jax.random.split(k)
        gt = jax.random.uniform(k1, (H, W), dtype=jnp.float32) * 10.0
        pred = gt + 0.1 * jax.random.normal(k2, (H, W), dtype=jnp.float32)
        got = jax.block_until_ready(custom_loss(pred, gt, row_tile=row_tile))
        ref = jax.block_until_ready(_reference_loss(pred, gt))
        assert bool(jnp.isfinite(got)), (H, W, row_tile, got)
        assert jnp.allclose(got, ref, rtol=2e-3, atol=1e-6), (H, W, row_tile, got, ref)
        return got

    keys = jax.random.split(key, 3)
    run_case(96, 128, 32, keys[0])     # multi-tile + halo (A2) path, 3 row tiles
    run_case(90, 160, None, keys[1])   # unaligned H/W -> zero-pad + mask path
    run_case(128, 256, 64, keys[2])    # multi-tile with lane dim > 128
    print("KERNEL_OK")
</pallas_src>

<mosaic_0001>
module attributes {stable_mosaic.version = 11 : i64} {
  func.func @_custom_loss_kernel(%arg0: i32, %arg1: memref<2xf32, #tpu.memory_space<smem>>, %arg2: memref<32x128xf32, #tpu.memory_space<vmem>>, %arg3: memref<32x128xf32, #tpu.memory_space<vmem>>, %arg4: memref<8x128xf32, #tpu.memory_space<vmem>>, %arg5: memref<8x128xf32, #tpu.memory_space<vmem>>, %arg6: memref<32x32xf32, #tpu.memory_space<vmem>>, %arg7: memref<32x8xf32, #tpu.memory_space<vmem>>, %arg8: memref<128x128xf32, #tpu.memory_space<vmem>>, %arg9: memref<1x8x128xf32, #tpu.memory_space<vmem>>, %arg10: memref<1x8x128xf32, #tpu.memory_space<vmem>>) attributes {dimension_semantics = [#tpu.dimension_semantics<parallel>], iteration_bounds = array<i64: 3>, scalar_prefetch = 0 : i64, scratch_operands = 0 : i64, tpu.core_type = #tpu.core_type<tc>, window_params = [{transform_indices = @transform_0, window_bounds = array<i64: 2>}, {transform_indices = @transform_1, window_bounds = array<i64: 32, 128>}, {transform_indices = @transform_2, window_bounds = array<i64: 32, 128>}, {transform_indices = @transform_3, window_bounds = array<i64: 8, 128>}, {transform_indices = @transform_4, window_bounds = array<i64: 8, 128>}, {pipeline_mode = #tpu.pipeline_mode<synchronous>, transform_indices = @transform_5, window_bounds = array<i64: 32, 32>}, {pipeline_mode = #tpu.pipeline_mode<synchronous>, transform_indices = @transform_6, window_bounds = array<i64: 32, 8>}, {pipeline_mode = #tpu.pipeline_mode<synchronous>, transform_indices = @transform_7, window_bounds = array<i64: 128, 128>}, {transform_indices = @transform_8, window_bounds = array<i64: 1, 8, 128>}, {transform_indices = @transform_9, window_bounds = array<i64: 1, 8, 128>}]} {
    %c0 = arith.constant 0 : index
    %0 = memref.load %arg1[%c0] : memref<2xf32, #tpu.memory_space<smem>>
    %c1 = arith.constant 1 : index
    %1 = memref.load %arg1[%c1] : memref<2xf32, #tpu.memory_space<smem>>
    %c0_0 = arith.constant 0 : index
    %c0_1 = arith.constant 0 : index
    %2 = vector.load %arg2[%c0_0, %c0_1] : memref<32x128xf32, #tpu.memory_space<vmem>>, vector<32x128xf32>
    %c0_2 = arith.constant 0 : index
    %c0_3 = arith.constant 0 : index
    %3 = vector.load %arg3[%c0_2, %c0_3] : memref<32x128xf32, #tpu.memory_space<vmem>>, vector<32x128xf32>
    %c0_4 = arith.constant 0 : index
    %c0_5 = arith.constant 0 : index
    %4 = vector.load %arg4[%c0_4, %c0_5] : memref<8x128xf32, #tpu.memory_space<vmem>>, vector<8x128xf32>
    %c0_6 = arith.constant 0 : index
    %c0_7 = arith.constant 0 : index
    %5 = vector.load %arg5[%c0_6, %c0_7] : memref<8x128xf32, #tpu.memory_space<vmem>>, vector<8x128xf32>
    %6 = arith.subf %2, %3 : vector<32x128xf32>
    %7 = arith.mulf %6, %6 : vector<32x128xf32>
    %8 = vector.shape_cast %7 : vector<32x128xf32> to vector<1x32x128xf32>
    %cst = arith.constant dense<0.000000e+00> : vector<1xf32>
    %9 = vector.multi_reduction <add>, %8, %cst [1, 2] : vector<1x32x128xf32> to vector<1xf32>
    %10 = vector.shape_cast %9 : vector<1xf32> to vector<1x1x1xf32>
    %11 = vector.extract %10[0, 0, 0] : f32 from vector<1x1x1xf32>
    %c0_8 = arith.constant 0 : index
    %c0_9 = arith.constant 0 : index
    %12 = vector.load %arg6[%c0_8, %c0_9] : memref<32x32xf32, #tpu.memory_space<vmem>>, vector<32x32xf32>
    %c0_10 = arith.constant 0 : index
    %c0_11 = arith.constant 0 : index
    %13 = vector.load %arg7[%c0_10, %c0_11] : memref<32x8xf32, #tpu.memory_space<vmem>>, vector<32x8xf32>
    %c0_12 = arith.constant 0 : index
    %c0_13 = arith.constant 0 : index
    %14 = vector.load %arg8[%c0_12, %c0_13] : memref<128x128xf32, #tpu.memory_space<vmem>>, vector<128x128xf32>
    %cst_14 = arith.constant dense<0.000000e+00> : vector<32x128xf32>
    %15 = tpu.matmul %12, %2, %cst_14 {dimension_numbers = #tpu.dot_dimension_numbers<[1], [0], [0], [1], [0, 0, 1, 1], [], []>, precision = #tpu.contract_precision<fp32>} : vector<32x32xf32>, vector<32x128xf32>, vector<32x128xf32> -> vector<32x128xf32>
    %cst_15 = arith.constant dense<0.000000e+00> : vector<32x128xf32>
    %16 = tpu.matmul %13, %4, %cst_15 {dimension_numbers = #tpu.dot_dimension_numbers<[1], [0], [0], [1], [0, 0, 1, 1], [], []>, precision = #tpu.contract_precision<fp32>} : vector<32x8xf32>, vector<8x128xf32>, vector<32x128xf32> -> vector<32x128xf32>
    %17 = arith.addf %15, %16 : vector<32x128xf32>
    %cst_16 = arith.constant dense<0.000000e+00> : vector<32x128xf32>
    %18 = tpu.matmul %17, %14, %cst_16 {dimension_numbers = #tpu.dot_dimension_numbers<[1], [0], [0], [1], [0, 0, 1, 1], [], []>, precision = #tpu.contract_precision<fp32>} : vector<32x128xf32>, vector<128x128xf32>, vector<32x128xf32> -> vector<32x128xf32>
    %cst_17 = arith.constant 0.0204081628 : f32
    %19 = vector.broadcast %cst_17 : f32 to vector<32x128xf32>
    %20 = arith.mulf %18, %19 : vector<32x128xf32>
    %cst_18 = arith.constant dense<0.000000e+00> : vector<32x128xf32>
    %21 = tpu.matmul %12, %3, %cst_18 {dimension_numbers = #tpu.dot_dimension_numbers<[1], [0], [0], [1], [0, 0, 1, 1], [], []>, precision = #tpu.contract_precision<fp32>} : vector<32x32xf32>, vector<32x128xf32>, vector<32x128xf32> -> vector<32x128xf32>
    %cst_19 = arith.constant dense<0.000000e+00> : vector<32x128xf32>
    %22 = tpu.matmul %13, %5, %cst_19 {dimension_numbers = #tpu.dot_dimension_numbers<[1], [0], [0], [1], [0, 0, 1, 1], [], []>, precision = #tpu.contract_precision<fp32>} : vector<32x8xf32>, vector<8x128xf32>, vector<32x128xf32> -> vector<32x128xf32>
    %23 = arith.addf %21, %22 : vector<32x128xf32>
    %cst_20 = arith.constant dense<0.000000e+00> : vector<32x128xf32>
    %24 = tpu.matmul %23, %14, %cst_20 {dimension_numbers = #tpu.dot_dimension_numbers<[1], [0], [0], [1], [0, 0, 1, 1], [], []>, precision = #tpu.contract_precision<fp32>} : vector<32x128xf32>, vector<128x128xf32>, vector<32x128xf32> -> vector<32x128xf32>
    %cst_21 = arith.constant 0.0204081628 : f32
    %25 = vector.broadcast %cst_21 : f32 to vector<32x128xf32>
    %26 = arith.mulf %24, %25 : vector<32x128xf32>
    %27 = arith.mulf %2, %2 : vector<32x128xf32>
    %28 = arith.mulf %4, %4 : vector<8x128xf32>
    %cst_22 = arith.constant dense<0.000000e+00> : vector<32x128xf32>
    %29 = tpu.matmul %12, %27, %cst_22 {dimension_numbers = #tpu.dot_dimension_numbers<[1], [0], [0], [1], [0, 0, 1, 1], [], []>, precision = #tpu.contract_precision<fp32>} : vector<32x32xf32>, vector<32x128xf32>, vector<32x128xf32> -> vector<32x128xf32>
    %cst_23 = arith.constant dense<0.000000e+00> : vector<32x128xf32>
    %30 = tpu.matmul %13, %28, %cst_23 {dimension_numbers = #tpu.dot_dimension_numbers<[1], [0], [0], [1], [0, 0, 1, 1], [], []>, precision = #tpu.contract_precision<fp32>} : vector<32x8xf32>, vector<8x128xf32>, vector<32x128xf32> -> vector<32x128xf32>
    %31 = arith.addf %29, %30 : vector<32x128xf32>
    %cst_24 = arith.constant dense<0.000000e+00> : vector<32x128xf32>
    %32 = tpu.matmul %31, %14, %cst_24 {dimension_numbers = #tpu.dot_dimension_numbers<[1], [0], [0], [1], [0, 0, 1, 1], [], []>, precision = #tpu.contract_precision<fp32>} : vector<32x128xf32>, vector<128x128xf32>, vector<32x128xf32> -> vector<32x128xf32>
    %cst_25 = arith.constant 0.0204081628 : f32
    %33 = vector.broadcast %cst_25 : f32 to vector<32x128xf32>
    %34 = arith.mulf %32, %33 : vector<32x128xf32>
    %35 = arith.mulf %3, %3 : vector<32x128xf32>
    %36 = arith.mulf %5, %5 : vector<8x128xf32>
    %cst_26 = arith.constant dense<0.000000e+00> : vector<32x128xf32>
    %37 = tpu.matmul %12, %35, %cst_26 {dimension_numbers = #tpu.dot_dimension_numbers<[1], [0], [0], [1], [0, 0, 1, 1], [], []>, precision = #tpu.contract_precision<fp32>} : vector<32x32xf32>, vector<32x128xf32>, vector<32x128xf32> -> vector<32x128xf32>
    %cst_27 = arith.constant dense<0.000000e+00> : vector<32x128xf32>
    %38 = tpu.matmul %13, %36, %cst_27 {dimension_numbers = #tpu.dot_dimension_numbers<[1], [0], [0], [1], [0, 0, 1, 1], [], []>, precision = #tpu.contract_precision<fp32>} : vector<32x8xf32>, vector<8x128xf32>, vector<32x128xf32> -> vector<32x128xf32>
    %39 = arith.addf %37, %38 : vector<32x128xf32>
    %cst_28 = arith.constant dense<0.000000e+00> : vector<32x128xf32>
    %40 = tpu.matmul %39, %14, %cst_28 {dimension_numbers = #tpu.dot_dimension_numbers<[1], [0], [0], [1], [0, 0, 1, 1], [], []>, precision = #tpu.contract_precision<fp32>} : vector<32x128xf32>, vector<128x128xf32>, vector<32x128xf32> -> vector<32x128xf32>
    %cst_29 = arith.constant 0.0204081628 : f32
    %41 = vector.broadcast %cst_29 : f32 to vector<32x128xf32>
    %42 = arith.mulf %40, %41 : vector<32x128xf32>
    %43 = arith.mulf %2, %3 : vector<32x128xf32>
    %44 = arith.mulf %4, %5 : vector<8x128xf32>
    %cst_30 = arith.constant dense<0.000000e+00> : vector<32x128xf32>
    %45 = tpu.matmul %12, %43, %cst_30 {dimension_numbers = #tpu.dot_dimension_numbers<[1], [0], [0], [1], [0, 0, 1, 1], [], []>, precision = #tpu.contract_precision<fp32>} : vector<32x32xf32>, vector<32x128xf32>, vector<32x128xf32> -> vector<32x128xf32>
    %cst_31 = arith.constant dense<0.000000e+00> : vector<32x128xf32>
    %46 = tpu.matmul %13, %44, %cst_31 {dimension_numbers = #tpu.dot_dimension_numbers<[1], [0], [0], [1], [0, 0, 1, 1], [], []>, precision = #tpu.contract_precision<fp32>} : vector<32x8xf32>, vector<8x128xf32>, vector<32x128xf32> -> vector<32x128xf32>
    %47 = arith.addf %45, %46 : vector<32x128xf32>
    %cst_32 = arith.constant dense<0.000000e+00> : vector<32x128xf32>
    %48 = tpu.matmul %47, %14, %cst_32 {dimension_numbers = #tpu.dot_dimension_numbers<[1], [0], [0], [1], [0, 0, 1, 1], [], []>, precision = #tpu.contract_precision<fp32>} : vector<32x128xf32>, vector<128x128xf32>, vector<32x128xf32> -> vector<32x128xf32>
    %cst_33 = arith.constant 0.0204081628 : f32
    %49 = vector.broadcast %cst_33 : f32 to vector<32x128xf32>
    %50 = arith.mulf %48, %49 : vector<32x128xf32>
    %51 = arith.mulf %20, %20 : vector<32x128xf32>
    %52 = arith.subf %34, %51 : vector<32x128xf32>
    %cst_34 = arith.constant 1.02083337 : f32
    %53 = vector.broadcast %cst_34 : f32 to vector<32x128xf32>
    %54 = arith.mulf %53, %52 : vector<32x128xf32>
    %55 = arith.mulf %26, %26 : vector<32x128xf32>
    %56 = arith.subf %42, %55 : vector<32x128xf32>
    %cst_35 = arith.constant 1.02083337 : f32
    %57 = vector.broadcast %cst_35 : f32 to vector<32x128xf32>
    %58 = arith.mulf %57, %56 : vector<32x128xf32>
    %59 = arith.mulf %20, %26 : vector<32x128xf32>
    %60 = arith.subf %50, %59 : vector<32x128xf32>
    %cst_36 = arith.constant 1.02083337 : f32
    %61 = vector.broadcast %cst_36 : f32 to vector<32x128xf32>
    %62 = arith.mulf %61, %60 : vector<32x128xf32>
    %cst_37 = arith.constant 2.000000e+00 : f32
    %63 = vector.broadcast %cst_37 : f32 to vector<32x128xf32>
    %64 = arith.mulf %63, %20 : vector<32x128xf32>
    %65 = arith.mulf %64, %26 : vector<32x128xf32>
    %66 = vector.broadcast %0 : f32 to vector<32x128xf32>
    %67 = arith.addf %65, %66 : vector<32x128xf32>
    %cst_38 = arith.constant 2.000000e+00 : f32
    %68 = vector.broadcast %cst_38 : f32 to vector<32x128xf32>
    %69 = arith.mulf %68, %62 : vector<32x128xf32>
    %70 = vector.broadcast %1 : f32 to vector<32x128xf32>
    %71 = arith.addf %69, %70 : vector<32x128xf32>
    %72 = arith.mulf %67, %71 : vector<32x128xf32>
    %73 = arith.mulf %20, %20 : vector<32x128xf32>
    %74 = arith.mulf %26, %26 : vector<32x128xf32>
    %75 = arith.addf %73, %74 : vector<32x128xf32>
    %76 = vector.broadcast %0 : f32 to vector<32x128xf32>
    %77 = arith.addf %75, %76 : vector<32x128xf32>
    %78 = arith.addf %54, %58 : vector<32x128xf32>
    %79 = vector.broadcast %1 : f32 to vector<32x128xf32>
    %80 = arith.addf %78, %79 : vector<32x128xf32>
    %81 = arith.mulf %77, %80 : vector<32x128xf32>
    %82 = tpu.reciprocal %81 : vector<32x128xf32> -> vector<32x128xf32>
    %83 = arith.mulf %72, %82 : vector<32x128xf32>
    %84 = tpu.iota {dimensions = array<i32: 0>} : vector<32x128xi32>
    %85 = tpu.iota {dimensions = array<i32: 1>} : vector<32x128xi32>
    %c32_i32 = arith.constant 32 : i32
    %86 = arith.muli %arg0, %c32_i32 : i32
    %87 = vector.broadcast %86 : i32 to vector<32x128xi32>
    %88 = arith.addi %84, %87 : vector<32x128xi32>
    %c89_i32 = arith.constant 89 : i32
    %89 = vector.broadcast %c89_i32 : i32 to vector<32x128xi32>
    %90 = arith.cmpi sle, %88, %89 : vector<32x128xi32>
    %c121_i32 = arith.constant 121 : i32
    %91 = vector.broadcast %c121_i32 : i32 to vector<32x128xi32>
    %92 = arith.cmpi sle, %85, %91 : vector<32x128xi32>
    %93 = arith.andi %90, %92 : vector<32x128xi1>
    %cst_39 = arith.constant 0.000000e+00 : f32
    %94 = vector.broadcast %cst_39 : f32 to vector<32x128xf32>
    %95 = arith.select %93, %83, %94 : vector<32x128xi1>, vector<32x128xf32>
    %96 = vector.shape_cast %95 : vector<32x128xf32> to vector<1x32x128xf32>
    %cst_40 = arith.constant dense<0.000000e+00> : vector<1xf32>
    %97 = vector.multi_reduction <add>, %96, %cst_40 [1, 2] : vector<1x32x128xf32> to vector<1xf32>
    %98 = vector.shape_cast %97 : vector<1xf32> to vector<1x1x1xf32>
    %99 = vector.extract %98[0, 0, 0] : f32 from vector<1x1x1xf32>
    %100 = vector.broadcast %11 : f32 to vector<1x8x128xf32>
    %c0_41 = arith.constant 0 : index
    %c0_42 = arith.constant 0 : index
    %c0_43 = arith.constant 0 : index
    %101 = vector.load %arg9[%c0_41, %c0_42, %c0_43] : memref<1x8x128xf32, #tpu.memory_space<vmem>>, vector<1x8x128xf32>
    tpu.vector_store %arg9[%c0_41, %c0_42, %c0_43], %100 {strides = array<i32>} : memref<1x8x128xf32, #tpu.memory_space<vmem>>, vector<1x8x128xf32>,
    %102 = vector.broadcast %99 : f32 to vector<1x8x128xf32>
    %c0_44 = arith.constant 0 : index
    %c0_45 = arith.constant 0 : index
    %c0_46 = arith.constant 0 : index
    %103 = vector.load %arg10[%c0_44, %c0_45, %c0_46] : memref<1x8x128xf32, #tpu.memory_space<vmem>>, vector<1x8x128xf32>
    tpu.vector_store %arg10[%c0_44, %c0_45, %c0_46], %102 {strides = array<i32>} : memref<1x8x128xf32, #tpu.memory_space<vmem>>, vector<1x8x128xf32>,
    return
  }
  func.func @transform_0(%arg0: i32) -> i32 {
    %c0_i32 = arith.constant 0 : i32
    %c0_i32_0 = arith.constant 0 : i32
    return %c0_i32 : i32
  }
  func.func @transform_1(%arg0: i32) -> (i32, i32) {
    %c0_i32 = arith.constant 0 : i32
    %c0_i32_0 = arith.constant 0 : i32
    return %arg0, %c0_i32 : i32, i32
  }
  func.func @transform_2(%arg0: i32) -> (i32, i32) {
    %c0_i32 = arith.constant 0 : i32
    %c0_i32_0 = arith.constant 0 : i32
    return %arg0, %c0_i32 : i32, i32
  }
  func.func @transform_3(%arg0: i32) -> (i32, i32) {
    %c1_i32 = arith.constant 1 : i32
    %0 = arith.addi %arg0, %c1_i32 : i32
    %c3_i32 = arith.constant 3 : i32
    %c0_i32 = arith.constant 0 : i32
    %1 = arith.cmpi eq, %c3_i32, %c0_i32 : i32
    %c1_i32_0 = arith.constant 1 : i32
    %2 = arith.select %1, %c1_i32_0, %c3_i32 : i32
    %3 = arith.remsi %0, %2 : i32
    %c0_i32_1 = arith.constant 0 : i32
    %4 = arith.cmpi ne, %3, %c0_i32_1 : i32
    %c0_i32_2 = arith.constant 0 : i32
    %5 = arith.cmpi slt, %3, %c0_i32_2 : i32
    %c0_i32_3 = arith.constant 0 : i32
    %6 = arith.cmpi slt, %2, %c0_i32_3 : i32
    %7 = arith.xori %5, %6 : i1
    %8 = arith.andi %7, %4 : i1
    %9 = arith.addi %3, %2 : i32
    %10 = arith.select %8, %9, %3 : i32
    %c4_i32 = arith.constant 4 : i32
    %11 = arith.muli %10, %c4_i32 : i32
    %c0_i32_4 = arith.constant 0 : i32
    %c0_i32_5 = arith.constant 0 : i32
    return %11, %c0_i32_4 : i32, i32
  }
  func.func @transform_4(%arg0: i32) -> (i32, i32) {
    %c1_i32 = arith.constant 1 : i32
    %0 = arith.addi %arg0, %c1_i32 : i32
    %c3_i32 = arith.constant 3 : i32
    %c0_i32 = arith.constant 0 : i32
    %1 = arith.cmpi eq, %c3_i32, %c0_i32 : i32
    %c1_i32_0 = arith.constant 1 : i32
    %2 = arith.select %1, %c1_i32_0, %c3_i32 : i32
    %3 = arith.remsi %0, %2 : i32
    %c0_i32_1 = arith.constant 0 : i32
    %4 = arith.cmpi ne, %3, %c0_i32_1 : i32
    %c0_i32_2 = arith.constant 0 : i32
    %5 = arith.cmpi slt, %3, %c0_i32_2 : i32
    %c0_i32_3 = arith.constant 0 : i32
    %6 = arith.cmpi slt, %2, %c0_i32_3 : i32
    %7 = arith.xori %5, %6 : i1
    %8 = arith.andi %7, %4 : i1
    %9 = arith.addi %3, %2 : i32
    %10 = arith.select %8, %9, %3 : i32
    %c4_i32 = arith.constant 4 : i32
    %11 = arith.muli %10, %c4_i32 : i32
    %c0_i32_4 = arith.constant 0 : i32
    %c0_i32_5 = arith.constant 0 : i32
    return %11, %c0_i32_4 : i32, i32
  }
  func.func @transform_5(%arg0: i32) -> (i32, i32) {
    %c0_i32 = arith.constant 0 : i32
    %c0_i32_0 = arith.constant 0 : i32
    %c0_i32_1 = arith.constant 0 : i32
    return %c0_i32, %c0_i32_0 : i32, i32
  }
  func.func @transform_6(%arg0: i32) -> (i32, i32) {
    %c0_i32 = arith.constant 0 : i32
    %c0_i32_0 = arith.constant 0 : i32
    %c0_i32_1 = arith.constant 0 : i32
    return %c0_i32, %c0_i32_0 : i32, i32
  }
  func.func @transform_7(%arg0: i32) -> (i32, i32) {
    %c0_i32 = arith.constant 0 : i32
    %c0_i32_0 = arith.constant 0 : i32
    %c0_i32_1 = arith.constant 0 : i32
    return %c0_i32, %c0_i32_0 : i32, i32
  }
  func.func @transform_8(%arg0: i32) -> (i32, i32, i32) {
    %c0_i32 = arith.constant 0 : i32
    %c0_i32_0 = arith.constant 0 : i32
    %c0_i32_1 = arith.constant 0 : i32
    return %arg0, %c0_i32, %c0_i32_0 : i32, i32, i32
  }
  func.func @transform_9(%arg0: i32) -> (i32, i32, i32) {
    %c0_i32 = arith.constant 0 : i32
    %c0_i32_0 = arith.constant 0 : i32
    %c0_i32_1 = arith.constant 0 : i32
    return %arg0, %c0_i32, %c0_i32_0 : i32, i32, i32
  }
}

</mosaic_0001>

<bundles_post_ra>
// kernel: tpu_custom_call.1
= control target key start
LH: loop header
LB: loop body
LE: loop exit
PB: predicated region body
PF: predicated region fallthrough
CT: control target
= control target key end

     0   :  { %s18096_s0 = inlined_call_operand.vmem [shape: f32[2], index: 0, kind: input, shape index: {}]   ;;  %s18097_s1 = inlined_call_operand.hbm [shape: f32[96,128], index: 1, kind: input, shape index: {}]   ;;  %s18098_s2 = inlined_call_operand.hbm [shape: f32[96,128], index: 2, kind: input, shape index: {}]   ;;  %s18099_s3 = inlined_call_operand.hbm [shape: f32[96,128], index: 3, kind: input, shape index: {}]   ;;  %s18100_s4 = inlined_call_operand.hbm [shape: f32[96,128], index: 4, kind: input, shape index: {}]   ;;  %s18101_s5 = inlined_call_operand.vmem [shape: f32[32,32], index: 5, kind: input, shape index: {}]   ;;  %s18102_s6 = inlined_call_operand.vmem [shape: f32[32,8], index: 6, kind: input, shape index: {}]   ;;  %s18103_s7 = inlined_call_operand.hbm [shape: f32[128,128], index: 7, kind: input, shape index: {}]   ;;  %s18104_s8 = inlined_call_operand.hbm [shape: f32[3,8,128], index: 8, kind: output, shape index: {0}]   ;;  %s18105_s9 = inlined_call_operand.hbm [shape: f32[3,8,128], index: 9, kind: output, shape index: {1}]  }
   0x1   :  { %18313 = sst [smem:[#allocation82_spill]] %s18096_s0 }
   0x2   :  { %18314 = sst [smem:[#allocation83_spill]] %s18101_s5 }
   0x3   :  { %18315 = sst [smem:[#allocation84_spill]] %s18102_s6 }
   0x4   :  { %18316 = sst [smem:[#allocation85_spill]] %s18103_s7 }
   0x5   :  { %18317 = sst [smem:[#allocation86_spill]] %s18104_s8 }
   0x6   :  { %18318 = sst [smem:[#allocation87_spill]] %s18105_s9 }
   0x7   :  { %15 = vsyncpa [#allocation5], 0 }
   0x8   :  { %16 = vsyncpa [#allocation3], 0 }
   0x9   :  { %18 = vsyncpa [#allocation3 + $0x1], 0 }
   0xa   :  { %19 = vsyncpa [#allocation8], 0 }
   0xb   :  { %21 = vsyncpa [#allocation8 + $0x1], 0 }
   0xc   :  { %22 = vsyncpa [#allocation11], 0 }
   0xd   :  { %24 = vsyncpa [#allocation11 + $0x1], 0 }
   0xe   :  { %25 = vsyncpa [#allocation4], 0 }
   0xf   :  { %27 = vsyncpa [#allocation4 + $0x1], 0 }
  0x10   :  { %28 = vsyncpa [#allocation15], 0 }
  0x11   :  { %30 = vsyncpa [#allocation15 + $0x1], 0  ;;  %s15772_s30 = smov 0   ;;  %s15774_s10 = smov 0  }
  0x12   :  { %s15776_s11 = smov 0   ;;  %s15778_s12 = smov 0  }
  0x13   :  { %s15780_s13 = smov 0   ;;  %s15782_s14 = smov 0  }
  0x14   :  { %s15784_s15 = smov 0  }
  0x15 LB: > { %18319 = sst [smem:[#allocation24_spill]] %s15698_s12  ;;  %s15806_s16 = sadd.s32 4294967295, %s15710_s15   ;;  %s15710_s15 = sphi %s15784_s15, %s18621_s15   ;;  %s15706_s14 = sphi %s15782_s14, %s18620_s14   ;;  %s15702_s13 = sphi %s15780_s13, %s18619_s13   ;;  %s15698_s12 = sphi %s15778_s12, %s18618_s12   ;;  %s15694_s11 = sphi %s15776_s11, %s18617_s11   ;;  %s15690_s10 = sphi %s15774_s10, %s18616_s10   ;;  %s15686_s30 = sphi %s15772_s30, %s18615_s30  }
  0x16   : > { %s10888_s17 = sadd.s32 4294967294, %s15710_s15   ;;  %p77_p0 = scmp.ne.s32.totalorder %s15702_s13, %s15698_s12 }
  0x17   : > { %p18109_p1 = scmp.eq.s32.totalorder %s15806_s16, 0  ;;  %p159_p2 = scmp.ne.s32.totalorder %s15690_s10, %s15686_s30 }
  0x18   : > { %p308_p5 = scmp.eq.s32.totalorder %s10888_s17, 2  ;;  %p10905_p7 = scmp.ge.s32.totalorder %s15710_s15, 1 }
  0x19   : > { %p15816_p4 = por %p18109_p1, %p77_p0  ;;  %p15822_p6 = por %p159_p2, %p18109_p1 }
  0x1a   : > { %p15827_p8 = por %p308_p5, %p77_p0  ;;  %p341_p9 = scmp.lt.s32.totalorder %s15710_s15, 4 }
  0x1b   : > { %s18320_s18 = scalar_select %p15816_p4, 1, 0 }
  0x1c   : > { %s18321_s19 = scalar_select %p15822_p6, 1, 0 }
  0x1d   : > { %s18322_s20 = scalar_select %p15827_p8, 1, 0 }
  0x1e   : > { %p15832_p10 = pnand %p10905_p7, %p341_p9  ;;  %s15712_s22 = smov [#allocation12]  }
  0x1f   : > { %18323 = sst [smem:[#allocation25_spill]] %s18322_s20  ;;  %s370_s23 = sshll.u32 %s15712_s22, 4  ;;  %s371_s23 = int_to_ptr.vmem [resolvable:$true] %s370_s23 }
  0x20   : > { %s18324_s21 = scalar_select %p15832_p10, 1, 0 }
  0x21   : > { %p15284_p11 = pneg %p15832_p10  ;;  %s15845_s25 = sadd.s32 1, %s15710_s15  }
  0x22   : > { %s64_s26 = sadd.s32 1, %s15706_s14  ;;  %s61_s27 = ssub.s32 %s15710_s15, %s15845_s25 }
  0x23   : > { %p15840_p12 = pnand %p15284_p11, %p18109_p1  ;;  %s18326_s7 = sld [smem:[#allocation85_spill]] }
  0x25   : > { %p18126_p0 = pneg %p15840_p12 }
  0x29   : > { %s15405_s30 = scalar_lea.hbm %s18326_s7, 2048 }
  0x2a   : > { %p15406_p13 = scmp.ne.s32.totalorder %s18326_s7, %s15405_s30  ;;  %p15412_p7 = scmp.lt.u32.totalorder %s15405_s30, %s18326_s7 }
  0x2c   : > { %p15408_p2 = pnand %p18126_p0, %p15406_p13 }
  0x2e   : > { %p15409_p5 = pneg %p15408_p2 }
  0x30   : > { %p15414_p9 = pnand %p15412_p7, %p15409_p5 }
  0x32   : > { %15417 = shalt.err (!%p15414_p9)
}
  0x33   : > { %s15418_s9 = scalar_lea.vmem %s371_s23, 2048  ;;  %p15426_p8 = scmp.lt.s32.totalorder %s371_s23, %s371_s23 }
  0x34   : > { %p15419_p11 = scmp.ne.s32.totalorder %s371_s23, %s15418_s9  ;;  %p15427_p6 = scmp.lt.s32.totalorder %s15418_s9, %s15418_s9 }
  0x36   : > { %p15421_p1 = pnand %p15419_p11, %p18126_p0  ;;  %p15428_p4 = por %p15427_p6, %p15426_p8 }
  0x38   : > { %p15422_p3 = pneg %p15421_p1 }
  0x3a   : > { %p15429_p10 = pnand %p15428_p4, %p15422_p3 }
  0x3c   : > { %15432 = shalt.err (!%p15429_p10)
}
  0x3d   : > { %s18115_s28 = smov 128   ;;  %s18117_s12 = smov 8  }
  0x3e   : > { %15290 = dma.hbm_to_vmem [thread:$0]  (!%p15840_p12), %s18326_s7, 2048, %s371_s23, [#allocation11], %s18115_s28, %s18115_s28, %s18117_s12  }
  0x3f   : > { %p62_p1 = scmp.eq.s32.totalorder %s61_s27, 0  ;;  %p71_p3 = scmp.ne.s32.totalorder %s15706_s14, %s15702_s13 }
  0x40   : > { %p18125_p4 = scmp.eq.s32.totalorder %s15710_s15, 0  ;;  %p18124_p6 = scmp.lt.s32.totalorder %s15710_s15, 3 }
  0x41   : > { %s15880_s29 = scalar_select %p62_p1, %s15706_s14, %s64_s26  }
  0x42   : > { %p73_p8 = por %p18125_p4, %p71_p3  ;;  %p18328_p10 = scmp.eq.s32.totalorder %s15806_s16, 2 }
  0x43   : > { %18327 = sst [smem:[#allocation26_spill]] %s15880_s29  ;;  %s18114_s17 = sand.u32 1, %s15706_s14  }
  0x44   : > { %p15886_p13 = por %p18328_p10, %p71_p3  ;;  %s18122_s22 = sshll.u32 %s15710_s15, 9 }
  0x45   : > { %s15894_s8 = sshll.u32 %s18114_s17, 5  ;;  %p15898_p2 = pnand %p18124_p6, %p73_p8 }
  0x46   : > { %s18329_s30 = scalar_select %p15886_p13, 1, 0 }
  0x47   : > { %s18128_s26 = sand.u32 1, %s15710_s15   ;;  %s15908_s20 = scalar_lea.hbm %s18098_s2, %s18122_s22 }
  0x48   : > { %18330 = sst [smem:[#allocation27_spill]] %s18329_s30  ;;  %s409_s17 = scalar_lea.vmem [#allocation7], %s15894_s8 }
  0x49   : > { %s416_s28 = sshll.u32 %s409_s17, 4  ;;  %s18332_s0 = sld [smem:[#allocation82_spill]]  ;;  %s15911_s28 = int_to_ptr.vmem [resolvable:$true] %s416_s28 }
  0x4a   : > { %s15918_s30 = scalar_lea.sflag [#allocation8], %s18128_s26  ;;  %s15433_s5 = scalar_lea.hbm %s15908_s20, 512 }
  0x4b   : > { %p15434_p5 = scmp.ne.s32.totalorder %s15908_s20, %s15433_s5  ;;  %p15435_p7 = pneg %p15898_p2 }
  0x4c   : > { %s15438_s17 = scalar_lea.hbm %s18098_s2, 1536  ;;  %p15439_p1 = scmp.lt.u32.totalorder %s15908_s20, %s18098_s2 }
  0x4d   : > { %p15436_p9 = pnand %p15435_p7, %p15434_p5  ;;  %p15440_p3 = scmp.lt.u32.totalorder %s15438_s17, %s15433_s5 }
  0x4e   : > { %p15442_p10 = scmp.lt.u32.totalorder %s15433_s5, %s15908_s20 }
  0x4f   : > { %s354_s29 = sshll.u32 %s18332_s0, 4  ;;  %p15437_p11 = pneg %p15436_p9  ;;  %s355_s29 = int_to_ptr.vmem [resolvable:$true] %s354_s29 }
  0x50   : > { %p15441_p8 = por %p15440_p3, %p15439_p1 }
  0x52   : > { %p15443_p6 = por %p15442_p10, %p15441_p8 }
  0x54   : > { %p15444_p4 = pnand %p15443_p6, %p15437_p11 }
  0x56   : > { %15447 = shalt.err (!%p15444_p4)
}
  0x57   : > { %s15448_s7 = scalar_lea.vmem %s15911_s28, 512  ;;  %s15715_s12 = smov [#allocation7]  }
  0x58   : > { %p15449_p5 = scmp.ne.s32.totalorder %s15911_s28, %s15448_s7  ;;  %s15453_s27 = sshll.u32 %s15715_s12, 4  ;;  %s15454_s27 = int_to_ptr.vmem [resolvable:$false] %s15453_s27 }
  0x59   : > { %s15455_s6 = scalar_lea.vmem %s15454_s27, 1024  ;;  %p15456_p13 = scmp.lt.s32.totalorder %s15911_s28, %s15454_s27 }
  0x5a   : > { %p15451_p9 = pnand %p15449_p5, %p15435_p7  ;;  %p15457_p1 = scmp.lt.s32.totalorder %s15455_s6, %s15448_s7 }
  0x5c   : > { %p15452_p0 = pneg %p15451_p9  ;;  %p15458_p3 = por %p15457_p1, %p15456_p13 }
  0x5e   : > { %p15459_p8 = pnand %p15458_p3, %p15452_p0 }
  0x60   : > { %15462 = shalt.err (!%p15459_p8)
}
  0x61   : > { %s18333_s5 = smov 8   ;;  %s18334_s22 = smov 128  }
  0x62   : > { %15297 = dma.hbm_to_vmem [thread:$0]  (!%p15898_p2), %s15908_s20, 512, %s15911_s28, %s15918_s30, %s18334_s22, %s18334_s22, %s18333_s5  }
  0x63   : > { %s15463_s12 = scalar_lea.vmem %s355_s29, 16  ;;  %p18335_p0 = pneg %p15840_p12 }
  0x64   : > { %p15464_p4 = scmp.ne.s32.totalorder %s355_s29, %s15463_s12  ;;  %p15471_p11 = scmp.lt.s32.totalorder %s355_s29, %s355_s29 }
  0x65   : > { %p15472_p10 = scmp.lt.s32.totalorder %s15463_s12, %s15463_s12 }
  0x66   : > { %p15466_p6 = pnand %p15464_p4, %p18335_p0 }
  0x67   : > { %p15473_p5 = por %p15472_p10, %p15471_p11 }
  0x68   : > { %p15467_p13 = pneg %p15466_p6 }
  0x6a   : > { %p15474_p9 = pnand %p15473_p5, %p15467_p13 }
  0x6c   : > { %15477 = shalt.err (!%p15474_p9)
}
  0x6d   : > { %s15716_s7 = smov [#allocation2]   ;;  %s18336_s28 = sshll.u32 %s15710_s15, 9 }
  0x6e   : > { %15287 = dma.vmem_to_smem (!%p15840_p12), %s355_s29, 16, %s15716_s7, [#allocation5]  }
  0x6f   : > { %s15963_s6 = scalar_lea.hbm %s18097_s1, %s18336_s28  ;;  %s388_s9 = scalar_lea.vmem [#allocation6], %s15894_s8 }
  0x70   : > { %s395_s17 = sshll.u32 %s388_s9, 4  ;;  %s18337_s24 = sand.u32 1, %s15706_s14   ;;  %s15966_s17 = int_to_ptr.vmem [resolvable:$true] %s395_s17 }
  0x71   : > { %s15970_s12 = scalar_lea.sflag [#allocation3], %s18337_s24  ;;  %s15478_s26 = scalar_lea.hbm %s15963_s6, 512 }
  0x72   : > { %p15479_p1 = scmp.ne.s32.totalorder %s15963_s6, %s15478_s26  ;;  %s15483_s28 = scalar_lea.hbm %s18097_s1, 1536 }
  0x73   : > { %p15484_p8 = scmp.lt.u32.totalorder %s15963_s6, %s18097_s1  ;;  %p15485_p4 = scmp.lt.u32.totalorder %s15483_s28, %s15478_s26 }
  0x74   : > { %p15481_p12 = pnand %p15479_p1, %p15435_p7  ;;  %p15487_p6 = scmp.lt.u32.totalorder %s15478_s26, %s15963_s6 }
  0x75   : > { %p15486_p0 = por %p15485_p4, %p15484_p8 }
  0x76   : > { %p15482_p3 = pneg %p15481_p12 }
  0x77   : > { %p15488_p13 = por %p15487_p6, %p15486_p0 }
  0x79   : > { %p15489_p11 = pnand %p15488_p13, %p15482_p3 }
  0x7b   : > { %15492 = shalt.err (!%p15489_p11)
}
  0x7c   : > { %s15493_s8 = scalar_lea.vmem %s15966_s17, 512  ;;  %s15717_s9 = smov [#allocation6]  }
  0x7d   : > { %p15494_p10 = scmp.ne.s32.totalorder %s15966_s17, %s15493_s8  ;;  %s15498_s24 = sshll.u32 %s15717_s9, 4  ;;  %s15499_s24 = int_to_ptr.vmem [resolvable:$false] %s15498_s24 }
  0x7e   : > { %s15500_s29 = scalar_lea.vmem %s15499_s24, 1024  ;;  %p15501_p1 = scmp.lt.s32.totalorder %s15966_s17, %s15499_s24 }
  0x7f   : > { %p15496_p5 = pnand %p15494_p10, %p15435_p7  ;;  %p15502_p12 = scmp.lt.s32.totalorder %s15500_s29, %s15493_s8 }
  0x81   : > { %p15497_p9 = pneg %p15496_p5  ;;  %p15503_p8 = por %p15502_p12, %p15501_p1 }
  0x83   : > { %p15504_p4 = pnand %p15503_p8, %p15497_p9 }
  0x85   : > { %15507 = shalt.err (!%p15504_p4)
}
  0x86   : > { %15294 = dma.hbm_to_vmem [thread:$0]  (!%p15898_p2), %s15963_s6, 512, %s15966_s17, %s15970_s12, %s18334_s22, %s18334_s22, %s18333_s5  }
  0x87   : > { %s115_s26 = ssub.s32 0, %s15845_s25  ;;  %s128_s28 = sadd.s32 1, %s15845_s25 }
  0x88   : > { %s10889_s7 = smin.u32 %s115_s26, %s15845_s25  ;;  %s130_s23 = ssub.s32 0, %s128_s28 }
  0x89   : > { %15378 = sdivrem.u32 %s10889_s7, 3  ;;  %s10893_s20 = smin.u32 %s130_s23, %s128_s28 }
  0x8a   : > { %p153_p7 = scmp.ne.s32.totalorder %s15694_s11, %s15690_s10  ;;  %15380 = sdivrem.u32 %s10893_s20, 3 }
  0x8b   : > { %s428_s27 = sand.u32 1, %s15694_s11   ;;  %p18338_p3 = scmp.eq.s32.totalorder %s15710_s15, 0 }
  0x8c   : > { %s10915_s8 = sshll.u32 %s428_s27, 3  ;;  %p18339_p6 = scmp.lt.s32.totalorder %s15710_s15, 3 }
  0x8d   : > { %p155_p0 = por %p153_p7, %p18338_p3  ;;  %p114_p11 = scmp.lt.s32.totalorder %s15845_s25, 0 }
  0x8e   : > { %p129_p10 = scmp.lt.s32.totalorder %s128_s28, 0  ;;  %s430_s22 = scalar_lea.vmem [#allocation9], %s10915_s8 }
  0x8f   : > { %p16009_p13 = pnand %p18339_p6, %p155_p0  ;;  %s452_s6 = sshll.u32 %s430_s22, 4  ;;  %s16014_s6 = int_to_ptr.vmem [resolvable:$true] %s452_s6 }
  0x90   : > { %s463_s26 = scalar_lea.vmem [#allocation10], %s10915_s8 }
  0x91   : > { %s485_s7 = sshll.u32 %s463_s26, 4  ;;  %p15510_p1 = pneg %p16009_p13  ;;  %s16020_s7 = int_to_ptr.vmem [resolvable:$true] %s485_s7 }
  0x92   : > { %s15379_s5 = spop.drf %15378 }
  0x93   : > { %s119_s17 = ssub.s32 0, %s15379_s5  ;;  %s15381_s12 = spop.drf %15380 }
  0x94   : > { %s18623_s17 = smov (!%p114_p11, %s119_s17), %s15379_s5  ;;  %s134_s29 = ssub.s32 0, %s15381_s12 }
  0x95   : > { %p10891_p2 = scmp.lt.s32.totalorder %s18623_s17, 0  ;;  %s125_s24 = sadd.s32 3, %s18623_s17 }
  0x96   : > { %s18627_s29 = smov (!%p129_p10, %s134_s29), %s15381_s12  ;;  %s15513_s12 = scalar_lea.hbm %s18099_s3, 1536 }
  0x97   : > { %s18625_s24 = smov (!%p10891_p2, %s125_s24), %s18623_s17  ;;  %p10895_p5 = scmp.lt.s32.totalorder %s18627_s29, 0 }
  0x98   : > { %s10946_s23 = sshll.u32 %s18625_s24, 9  ;;  %s140_s20 = sadd.s32 3, %s18627_s29 }
  0x99   : > { %s10892_s27 = sshll.u32 %s18625_s24, 2  ;;  %s16028_s0 = scalar_lea.hbm %s18099_s3, %s10946_s23 }
  0x9a   : > { %s18629_s20 = smov (!%p10895_p5, %s140_s20), %s18627_s29  ;;  %s15508_s28 = scalar_lea.hbm %s16028_s0, 128 }
  0x9b   : > { %p15509_p9 = scmp.ne.s32.totalorder %s16028_s0, %s15508_s28  ;;  %p15514_p4 = scmp.lt.u32.totalorder %s16028_s0, %s18099_s3 }
  0x9c   : > { %p15515_p7 = scmp.lt.u32.totalorder %s15513_s12, %s15508_s28  ;;  %p15517_p0 = scmp.lt.u32.totalorder %s15508_s28, %s16028_s0 }
  0x9d   : > { %p15511_p12 = pnand %p15510_p1, %p15509_p9 }
  0x9e   : > { %p15516_p3 = por %p15515_p7, %p15514_p4 }
  0x9f   : > { %p15512_p8 = pneg %p15511_p12 }
  0xa0   : > { %p15518_p6 = por %p15517_p0, %p15516_p3 }
  0xa2   : > { %p15519_p11 = pnand %p15518_p6, %p15512_p8 }
  0xa4   : > { %15522 = shalt.err (!%p15519_p11)
}
  0xa5   : > { %s15523_s29 = scalar_lea.vmem %s16014_s6, 128  ;;  %s15718_s22 = smov [#allocation9]  }
  0xa6   : > { %p15524_p10 = scmp.ne.s32.totalorder %s16014_s6, %s15523_s29  ;;  %s15528_s8 = sshll.u32 %s15718_s22, 4  ;;  %s15529_s8 = int_to_ptr.vmem [resolvable:$false] %s15528_s8 }
  0xa7   : > { %s15530_s17 = scalar_lea.vmem %s15529_s8, 256  ;;  %p15531_p9 = scmp.lt.s32.totalorder %s16014_s6, %s15529_s8 }
  0xa8   : > { %p15526_p2 = pnand %p15524_p10, %p15510_p1  ;;  %p15532_p12 = scmp.lt.s32.totalorder %s15530_s17, %s15523_s29 }
  0xaa   : > { %p15527_p5 = pneg %p15526_p2  ;;  %p15533_p4 = por %p15532_p12, %p15531_p9 }
  0xac   : > { %p15534_p7 = pnand %p15533_p4, %p15527_p5 }
  0xae   : > { %15537 = shalt.err (!%p15534_p7)
}
  0xaf   : > { %15300 = dma.hbm_to_vmem [thread:$0]  (!%p16009_p13), %s16028_s0, 128, %s16014_s6, %s15918_s30  }
  0xb0   : > { %s10896_s28 = sshll.u32 %s18629_s20, 2  ;;  %s16064_s5 = scalar_lea.hbm %s18100_s4, %s10946_s23 }
  0xb1   : > { %s16068_s29 = ssub.s32 %s10892_s27, %s10896_s28  ;;  %s146_s22 = sadd.s32 1, %s15694_s11 }
  0xb2   : > { %p144_p8 = scmp.eq.s32.totalorder %s16068_s29, 0  ;;  %s18341_s8 = sand.u32 1, %s15710_s15  }
  0xb3   : > { %s460_s17 = scalar_lea.sflag [#allocation11], %s18341_s8  ;;  %s15538_s0 = scalar_lea.hbm %s16064_s5, 128 }
  0xb4   : > { %p15539_p3 = scmp.ne.s32.totalorder %s16064_s5, %s15538_s0  ;;  %s15543_s24 = scalar_lea.hbm %s18100_s4, 1536 }
  0xb5   : > { %p15544_p11 = scmp.lt.u32.totalorder %s16064_s5, %s18100_s4  ;;  %p15545_p10 = scmp.lt.u32.totalorder %s15543_s24, %s15538_s0 }
  0xb6   : > { %p15541_p0 = pnand %p15539_p3, %p15510_p1  ;;  %p15547_p5 = scmp.lt.u32.totalorder %s15538_s0, %s16064_s5 }
  0xb7   : > { %p15546_p2 = por %p15545_p10, %p15544_p11 }
  0xb8   : > { %p15542_p6 = pneg %p15541_p0 }
  0xb9   : > { %p15548_p9 = por %p15547_p5, %p15546_p2 }
  0xbb   : > { %p15549_p12 = pnand %p15548_p9, %p15542_p6 }
  0xbd   : > { %15552 = shalt.err (!%p15549_p12)
}
  0xbe   : > { %s15553_s27 = scalar_lea.vmem %s16020_s7, 128  ;;  %s15719_s28 = smov [#allocation10]  }
  0xbf   : > { %p15554_p4 = scmp.ne.s32.totalorder %s16020_s7, %s15553_s27  ;;  %s15558_s12 = sshll.u32 %s15719_s28, 4  ;;  %s15559_s12 = int_to_ptr.vmem [resolvable:$false] %s15558_s12 }
  0xc0   : > { %s15560_s26 = scalar_lea.vmem %s15559_s12, 256  ;;  %p15561_p0 = scmp.lt.s32.totalorder %s16020_s7, %s15559_s12 }
  0xc1   : > { %p15556_p7 = pnand %p15554_p4, %p15510_p1  ;;  %p15562_p11 = scmp.lt.s32.totalorder %s15560_s26, %s15553_s27 }
  0xc3   : > { %p15557_p3 = pneg %p15556_p7  ;;  %p15563_p10 = por %p15562_p11, %p15561_p0 }
  0xc5   : > { %p15564_p2 = pnand %p15563_p10, %p15557_p3 }
  0xc7   : > { %15567 = shalt.err (!%p15564_p2)
}
  0xc8   : > { %15303 = dma.hbm_to_vmem [thread:$0]  (!%p16009_p13), %s16064_s5, 128, %s16020_s7, %s460_s17  }
  0xc9   : > { %s16102_s8 = scalar_select %p144_p8, %s15694_s11, %s146_s22  }
  0xca   : > { %p18342_p1 = scmp.ne.s32.totalorder %s18324_s21, 0 }
  0xcc   : > { %494 = sbr.rel (%p18342_p1) target bundleno = 2390 (0x956), region = 52 }
  0xd3   : > { %p18343_p6 = scmp.eq.s32.totalorder %s15806_s16, 0 }
  0xd5   : > { %15653 = dma.done.wait (%p18343_p6), [#allocation5], 16   ;;  %p18344_p5 = pmov %p18343_p6 }
  0xd6   : > { %s16111_s9 = sand.u32 1, %s15702_s13   ;;  %p18345_p13 = scmp.ne.s32.totalorder %s18320_s18, 0 }
  0xd7   : > { %15655 = vsyncadd (%p18344_p5), [#allocation5], 4294967280  ;;  %s10929_s7 = sshll.u32 %s16111_s9, 5  ;;  %s501_s5 = scalar_lea.sflag [#allocation3], %s16111_s9 }
  0xd8   : > { %s16115_s29 = scalar_lea.vmem [#allocation6], %s10929_s7 }
  0xd9   : > { %15657 = dma.done.wait (%p18345_p13), %s501_s5, 512  }
  0xda   : > { %15659 = vsyncadd (%p18345_p13), %s501_s5, 4294966784  ;;  %s509_s21 = sand.u32 1, %s15806_s16   ;;  %s16122_s17 = scalar_lea.vmem [#allocation7], %s10929_s7 }
  0xdb   : > { %s510_s22 = scalar_lea.sflag [#allocation8], %s509_s21 }
  0xdc   : > { %15661 = dma.done.wait (%p18345_p13), %s510_s22, 512  }
  0xdd   : > { %15663 = vsyncadd (%p18345_p13), %s510_s22, 4294966784  ;;  %s520_s0 = sand.u32 1, %s15690_s10   ;;  %p18346_p8 = scmp.ne.s32.totalorder %s18321_s19, 0 }
  0xde   : > { %s16129_s30 = sshll.u32 %s520_s0, 3 }
  0xdf   : > { %s16132_s6 = scalar_lea.vmem [#allocation9], %s16129_s30 }
  0xe0   : > { %15665 = dma.done.wait (%p18346_p8), %s510_s22, 128  }
  0xe1   : > { %15667 = vsyncadd (%p18346_p8), %s510_s22, 4294967168  ;;  %s528_s24 = scalar_lea.sflag [#allocation11], %s509_s21  ;;  %s531_s23 = scalar_lea.vmem [#allocation10], %s16129_s30 }
  0xe2   : > { %15669 = dma.done.wait (%p18346_p8), %s528_s24, 128  }
  0xe3   : > { %15671 = vsyncadd (%p18346_p8), %s528_s24, 4294967168  ;;  %p18347_p9 = pmov %p18344_p5 }
  0xe4   : > { %p18348_p12 = pmov %p18344_p5 }
  0xe5   : > { %15673 = dma.done.wait (%p18347_p9), [#allocation11], 2048  }
  0xe6   : > { %15675 = vsyncadd (%p18348_p12), [#allocation11], 4294965248 }
  0xe7   : > { %540 = sfence }
  0xe8   : > { %v633_v0 = vld [vmem:[%s16132_s6] sm:$0xff]  ;;  %s18349_s27 = sld [smem:[#allocation84_spill]]  ;;  %vm679_vm0 = vcmask 64512   ;;  %s18365_s0 = sld [smem:[#allocation83_spill]]  ;;  %vm1267_vm1 = vcmask 261120   ;;  %v16229_v40 = vld [vmem:[%s16115_s29 + $0x10] sm:$0xff] }
  0xe9   : > { %v16154_v3 = vand.u32 4294901760, %v633_v0  ;;  %v625_v34 = vld [vmem:[%s16115_s29] sm:$0xff]  ;;  %v16221_v35 = vld [vmem:[%s16115_s29 + $0x8] sm:$0xff]  ;;  %v16232_v41 = vld [vmem:[%s16115_s29 + $0x18] sm:$0xff]  ;;  %s10937_s30 = sshll.u32 %s15806_s16, 5  ;;  %s10940_s21 = sshll.u32 %s15806_s16, 7 }
  0xea   : > { %v663_v36 = vld [vmem:[#allocation12] sm:$0xff]  ;;  %v1281_v38 = vand.u32 4294901760, %v625_v34  ;;  %v18137_v39 = vand.u32 4294901760, %v16221_v35  ;;  %v664_v42 = vld [vmem:[#allocation12 + $0x8] sm:$0xff]  ;;  %v665_v45 = vld [vmem:[#allocation12 + $0x10] sm:$0xff]  ;;  %s18608_s18 = sld [smem:[#allocation86_spill]] }
  0xeb   : > { %11938 = vmatprep.subr.mxu0 %v16154_v3  ;;  %v800_v12 = vsub.f32 %v633_v0, %v16154_v3  ;;  %v1895_v43 = vand.u32 4294901760, %v663_v36  ;;  %v666_v47 = vld [vmem:[#allocation12 + $0x18] sm:$0xff]  ;;  %v1898_v50 = vand.u32 4294901760, %v664_v42  ;;  %v667_v51 = vld [vmem:[#allocation12 + $0x20] sm:$0xff]  ;;  %v668_v52 = vld [vmem:[#allocation12 + $0x28] sm:$0xff]  ;;  %v1901_v56 = vand.u32 4294901760, %v665_v45 }
  0xec   : > { %11939 = vmatpush3.msra.mxu0 %v16154_v3  ;;  %v16246_v53 = vpack.c.bf16 %v18137_v39, %v1281_v38  ;;  %v1904_v60 = vand.u32 4294901760, %v666_v47  ;;  %v1907_v63 = vand.u32 4294901760, %v667_v51  ;;  %v1910_v0 = vand.u32 4294901760, %v668_v52  ;;  %s10668_s28 = scalar_lea.sflag [#allocation4], %s16111_s9  ;;  %s15720_s19 = smov [#allocation13]  }
  0xed   : > { %v16179_v17 = vand.u32 4294901760, %v800_v12  ;;  %v16251_v55 = vsub.f32 %v663_v36, %v1895_v43  ;;  %v16257_v58 = vpack.c.bf16 %v1898_v50, %v1895_v43  ;;  %v16259_v59 = vsub.f32 %v664_v42, %v1898_v50 }
  0xee   : > { %v659_v1 = vld [vmem:[%s18349_s27] sm:$0xff]  ;;  %v660_v2 = vld [vmem:[%s18349_s27 + $0x8] sm:$0xff]  ;;  %v661_v6 = vld [vmem:[%s18349_s27 + $0x10] sm:$0xff]  ;;  %v16263_v62 = vsub.f32 %v665_v45, %v1901_v56 }
  0xef   : > { %v681_v4 = vsel %vm679_vm0, %v659_v1, 0  ;;  %v684_v5 = vsel %vm679_vm0, %v660_v2, 0  ;;  %v662_v7 = vld [vmem:[%s18349_s27 + $0x18] sm:$0xff]  ;;  %v687_v10 = vsel %vm679_vm0, %v661_v6, 0  ;;  %v802_v22 = vsub.f32 %v800_v12, %v16179_v17  ;;  %v655_v37 = vld [vmem:[%s18365_s0] sm:$0xff]  ;;  %v656_v46 = vld [vmem:[%s18365_s0 + $0x8] sm:$0xff] }
  0xf0   : > { %v16162_v8 = vand.u32 4294901760, %v681_v4  ;;  %v16164_v9 = vand.u32 4294901760, %v684_v5  ;;  %v690_v11 = vsel %vm679_vm0, %v662_v7, 0  ;;  %v16168_v13 = vand.u32 4294901760, %v687_v10  ;;  %v669_v1 = vld [vmem:[#allocation12 + $0x30] sm:$0xff]  ;;  %v670_v7 = vld [vmem:[#allocation12 + $0x38] sm:$0xff]  ;;  %s18017_s20 = scalar_lea.hbm %s18608_s18, %s10940_s21 }
  0xf1   : > { %v16170_v14 = vand.u32 4294901760, %v690_v11  ;;  %v803_v27 = vand.u32 4294901760, %v802_v22  ;;  %v16236_v44 = vsel %vm1267_vm1, %v655_v37, 0  ;;  %v16255_v57 = vsel %vm1267_vm1, %v656_v46, 0  ;;  %v671_v46 = vld [vmem:[#allocation12 + $0x40] sm:$0xff] }
  0xf2   : > { %18350 = vst [vmem:[#allocation28_spill] sm:$0xff] %v16162_v8  ;;  %18351 = vst [vmem:[#allocation29_spill] sm:$0xff] %v16164_v9  ;;  %v16174_v15 = vsub.f32 %v681_v4, %v16162_v8  ;;  %v16177_v16 = vsub.f32 %v684_v5, %v16164_v9  ;;  %v16182_v18 = vsub.f32 %v687_v10, %v16168_v13  ;;  %v16249_v54 = vand.u32 4294901760, %v16236_v44 }
  0xf3   : > { %18352 = vst [vmem:[#allocation30_spill] sm:$0xff] %v16168_v13  ;;  %v16185_v19 = vsub.f32 %v690_v11, %v16170_v14  ;;  %11946 = vmatprep.subr.mxu0 %v803_v27  ;;  %v18135_v61 = vand.u32 4294901760, %v16251_v55  ;;  %v16265_v2 = vsub.f32 %v625_v34, %v1281_v38  ;;  %v18134_v4 = vand.u32 4294901760, %v16259_v59 }
  0xf4   : > { %18353 = vst [vmem:[#allocation31_spill] sm:$0xff] %v16174_v15  ;;  %18354 = vst [vmem:[#allocation32_spill] sm:$0xff] %v16177_v16  ;;  %v16188_v20 = vand.u32 4294901760, %v16174_v15  ;;  %v16191_v21 = vand.u32 4294901760, %v16177_v16  ;;  %v16195_v23 = vand.u32 4294901760, %v16182_v18  ;;  %v16268_v5 = vpack.c.bf16 %v1904_v60, %v1901_v56 }
  0xf5   : > { %18355 = vst [vmem:[#allocation33_spill] sm:$0xff] %v16182_v18  ;;  %18356 = vst [vmem:[#allocation34_spill] sm:$0xff] %v16185_v19  ;;  %v16198_v24 = vand.u32 4294901760, %v16185_v19  ;;  %v16270_v6 = vsub.f32 %v666_v47, %v1904_v60  ;;  %v2019_v10 = vsub.f32 %v16251_v55, %v18135_v61  ;;  %v18133_v11 = vand.u32 4294901760, %v16263_v62  ;;  %v672_v47 = vld [vmem:[#allocation12 + $0x48] sm:$0xff]  ;;  %v673_v60 = vld [vmem:[#allocation12 + $0x50] sm:$0xff] }
  0xf6   : > { %18357 = vst [vmem:[#allocation35_spill] sm:$0xff] %v16188_v20  ;;  %18358 = vst [vmem:[#allocation36_spill] sm:$0xff] %v16191_v21  ;;  %v761_v25 = vsub.f32 %v16174_v15, %v16188_v20  ;;  %v771_v26 = vsub.f32 %v16177_v16, %v16191_v21  ;;  %v781_v28 = vsub.f32 %v16182_v18, %v16195_v23  ;;  %v1916_v37 = vand.u32 4294901760, %v670_v7 }
  0xf7   : > { %18359 = vst [vmem:[#allocation37_spill] sm:$0xff] %v16195_v23  ;;  %18360 = vst [vmem:[#allocation38_spill] sm:$0xff] %v16198_v24  ;;  %v791_v29 = vsub.f32 %v16185_v19, %v16198_v24  ;;  %v16279_v22 = vsub.f32 %v667_v51, %v1907_v63  ;;  %v2033_v34 = vsub.f32 %v16263_v62, %v18133_v11 }
  0xf8   : > { %v16208_v30 = vand.u32 4294901760, %v761_v25  ;;  %v16210_v31 = vand.u32 4294901760, %v771_v26  ;;  %v16212_v32 = vand.u32 4294901760, %v781_v28  ;;  %v2026_v25 = vsub.f32 %v16259_v59, %v18134_v4 }
  0xf9   : > { %v16216_v33 = vand.u32 4294901760, %v791_v29  ;;  %v18131_v26 = vand.u32 4294901760, %v16270_v6  ;;  %v1913_v28 = vand.u32 4294901760, %v669_v1  ;;  %v2020_v29 = vand.u32 4294901760, %v2019_v10 }
  0xfa   : > { %18361 = vst [vmem:[#allocation39_spill] sm:$0xff] %v16208_v30  ;;  %18362 = vst [vmem:[#allocation40_spill] sm:$0xff] %v16210_v31  ;;  %11940 = vmatprep.mubr.f32.mxu0 %v16208_v30  ;;  %v18129_v36 = vand.u32 4294901760, %v16279_v22  ;;  %v2027_v38 = vand.u32 4294901760, %v2026_v25  ;;  %v2034_v50 = vand.u32 4294901760, %v2033_v34  ;;  %v16304_v56 = vsub.f32 %v670_v7, %v1916_v37  ;;  %v674_v25 = vld [vmem:[#allocation12 + $0x58] sm:$0xff] }
  0xfb   : > { %18363 = vst [vmem:[#allocation41_spill] sm:$0xff] %v16212_v32  ;;  %11941 = vmatmul.mubr.f32.vlgmr.msra.gmra.mrb[0].mxu0 %v16210_v31  ;;  %18364 = vst [vmem:[#allocation42_spill] sm:$0xff] %v16216_v33  ;;  %v2040_v42 = vsub.f32 %v16270_v6, %v18131_v26  ;;  %v16296_v45 = vsub.f32 %v669_v1, %v1913_v28  ;;  %v1919_v34 = vand.u32 4294901760, %v671_v46 }
  0xfc   : > { %11947 = vmatpush3.msra.mxu0 %v803_v27  ;;  %11943 = vmatprep.mubr.f32.mxu0 %v16212_v32  ;;  %v16286_v27 = vsub.f32 %v668_v52, %v1910_v0  ;;  %v2047_v51 = vsub.f32 %v16279_v22, %v18129_v36  ;;  %v16302_v52 = vpack.c.bf16 %v1916_v37, %v1913_v28  ;;  %v18136_v7 = vand.u32 4294901760, %v16304_v56 }
  0xfd   : > { %11954 = vmatprep.subr.mxu0 %v800_v12  ;;  %v18132_v10 = vand.u32 4294901760, %v16296_v45  ;;  %v1922_v37 = vand.u32 4294901760, %v672_v47  ;;  %v16329_v26 = vsub.f32 %v671_v46, %v1919_v34 }
  0xfe   : > { %v18130_v43 = vand.u32 4294901760, %v16286_v27  ;;  %v2048_v28 = vand.u32 4294901760, %v2047_v51  ;;  %v2068_v51 = vsub.f32 %v16304_v56, %v18136_v7  ;;  %v657_v7 = vld [vmem:[%s18365_s0 + $0x10] sm:$0xff] }
  0xff   : > { %11944 = vmatmul.mubr.f32.gmra.mrb[2].mxu0 %v16216_v33  ;;  %v16335_v4 = vsub.f32 %v672_v47, %v1922_v37 }
 0x100   : > { %11948 = vmatprep.mubr.f32.mxu0 %v16162_v8  ;;  %v2054_v1 = vsub.f32 %v16286_v27, %v18130_v43  ;;  %v16327_v43 = vpack.c.bf16 %v1922_v37, %v1919_v34  ;;  %v2069_v46 = vand.u32 4294901760, %v2068_v51  ;;  %v18138_v34 = vand.u32 4294901760, %v16329_v26 }
 0x101   : > { %v18139_v39 = vand.u32 4294901760, %v16335_v4  ;;  %v1275_v51 = vsel %vm1267_vm1, %v657_v7, 0 }
 0x103   : > { %11949 = vmatmul.mubr.f32.vlgmr.msra.gmra.mrb[0].mxu0 %v16164_v9 }
 0x104   : > { %11955 = vmatpush3.msra.mxu0 %v800_v12  ;;  %11951 = vmatprep.mubr.f32.mxu0 %v16168_v13  ;;  %v16277_v12 = vpack.c.bf16 %v1910_v0, %v1907_v63  ;;  %v16308_v63 = vpack.c.bf16 %v2027_v38, %v2020_v29  ;;  %v2041_v0 = vand.u32 4294901760, %v2040_v42  ;;  %v2055_v29 = vand.u32 4294901760, %v2054_v1  ;;  %v676_v1 = vld [vmem:[#allocation12 + $0x68] sm:$0xff] }
 0x105   : > { %11962 = vmatprep.subr.mxu0 %v16154_v3  ;;  %v2061_v38 = vsub.f32 %v16296_v45, %v18132_v10  ;;  %v1925_v42 = vand.u32 4294901760, %v673_v60  ;;  %v1934_v47 = vand.u32 4294901760, %v676_v1 }
 0x106   : > { %18366 = vst [vmem:[#allocation43_spill] sm:$0xff] %v16308_v63  ;;  %13819 = vmatprep.subr.bf16.mxu1 %v16308_v63  ;;  %v16317_v36 = vpack.c.bf16 %v2041_v0, %v2034_v50  ;;  %v1928_v50 = vand.u32 4294901760, %v674_v25  ;;  %v675_v0 = vld [vmem:[#allocation12 + $0x60] sm:$0xff]  ;;  %v16333_v10 = vpack.c.bf16 %v2055_v29, %v2048_v28 }
 0x107   : > { %11952 = vmatmul.mubr.f32.gmra.mrb[2].mxu0 %v16170_v14  ;;  %13821 = vmatpush3.bf16.msra.mxu1 %v16308_v63  ;;  %v2062_v11 = vand.u32 4294901760, %v2061_v38  ;;  %v16337_v61 = vsub.f32 %v673_v60, %v1925_v42  ;;  %v1931_v29 = vand.u32 4294901760, %v675_v0  ;;  %v18369_v60 = vand.u32 4294901760, %v16221_v35 }
 0x108   : > { %11956 = vmatprep.mubr.f32.mxu0 %v16174_v15  ;;  %18367 = vst [vmem:[#allocation44_spill] sm:$0xff] %v16317_v36  ;;  %13823 = vmatprep.subr.bf16.mxu1 %v16317_v36  ;;  %18368 = vst [vmem:[#allocation45_spill] sm:$0xff] %v16333_v10  ;;  %v16343_v49 = vpack.c.bf16 %v1928_v50, %v1925_v42  ;;  %v16345_v48 = vsub.f32 %v674_v25, %v1928_v50 }
 0x109   : > { %v18140_v28 = vand.u32 4294901760, %v16337_v61  ;;  %v16353_v37 = vsub.f32 %v16221_v35, %v18369_v60  ;;  %v16356_v38 = vpack.c.bf16 %v2069_v46, %v2062_v11  ;;  %v2075_v25 = vsub.f32 %v16329_v26, %v18138_v34  ;;  %v658_v35 = vld [vmem:[%s18365_s0 + $0x18] sm:$0xff] }
 0x10a   : > { %v18145_v42 = vand.u32 4294901760, %v16345_v48  ;;  %v2082_v11 = vsub.f32 %v16335_v4, %v18139_v39  ;;  %v16374_v46 = vpack.c.bf16 %v1934_v47, %v1931_v29  ;;  %v16381_v60 = vsub.f32 %v675_v0, %v1931_v29 }
 0x10b   : > { %11957 = vmatmul.mubr.f32.vlgmr.msra.gmra.mrb[0].mxu0 %v16177_v16  ;;  %13825 = vmatpush3.bf16.msra.mxu1 %v16317_v36  ;;  %18370 = vst [vmem:[#allocation46_spill] sm:$0xff] %v16356_v38  ;;  %v2089_v50 = vsub.f32 %v16337_v61, %v18140_v28  ;;  %v16383_v34 = vsub.f32 %v676_v1, %v1934_v47  ;;  %v16390_v28 = vand.u32 4294901760, %v16255_v57  ;;  %v18371_v29 = vand.u32 4294901760, %v16229_v40 }
 0x10c   : > { %11963 = vmatpush3.msra.mxu0 %v16154_v3  ;;  %11959 = vmatprep.mubr.f32.mxu0 %v16182_v18  ;;  %v2096_v7 = vsub.f32 %v16345_v48, %v18145_v42  ;;  %v16387_v39 = vsub.f32 %v16236_v44, %v16249_v54  ;;  %v2083_v63 = vand.u32 4294901760, %v2082_v11  ;;  %v1278_v42 = vsel %vm1267_vm1, %v658_v35, 0 }
 0x10d   : > { %11970 = vmatprep.subr.mxu0 %v16179_v17  ;;  %13827 = vmatprep.subr.bf16.mxu1 %v16333_v10  ;;  %v16400_v44 = vand.u32 4294901760, %v1275_v51  ;;  %v16405_v47 = vsub.f32 %v16229_v40, %v18371_v29  ;;  %v2090_v11 = vand.u32 4294901760, %v2089_v50  ;;  %v18372_v35 = vand.u32 4294901760, %v16232_v41 }
 0x10e   : > { %v18374_v1 = vand.u32 4294901760, %v16381_v60  ;;  %v16424_v50 = vsub.f32 %v16255_v57, %v16390_v28 }
 0x10f   : > { %11960 = vmatmul.mubr.f32.gmra.mrb[2].mxu0 %v16185_v19  ;;  %13829 = vmatpush3.bf16.msra.mxu1 %v16333_v10  ;;  %v16411_v36 = vsub.f32 %v16232_v41, %v18372_v35 }
 0x110   : > { %11964 = vmatprep.mubr.f32.mxu0 %v16188_v20  ;;  %13831 = vmatprep.subr.bf16.mxu1 %v16356_v38  ;;  %v2103_v10 = vsub.f32 %v16381_v60, %v18374_v1  ;;  %18376 = vst [vmem:[#allocation48_spill] sm:$0xff] %v16424_v50  ;;  %v16441_v1 = vsub.f32 %v1275_v51, %v16400_v44  ;;  %v16451_v20 = vand.u32 4294901760, %v16424_v50 }
 0x112   : > { %18380 = vst [vmem:[#allocation50_spill] sm:$0xff] %v16441_v1  ;;  %18382 = vst [vmem:[#allocation52_spill] sm:$0xff] %v16451_v20 }
 0x113   : > { %11965 = vmatmul.mubr.f32.vlgmr.msra.gmra.mrb[0].mxu0 %v16191_v21  ;;  %13833 = vmatpush3.bf16.msra.mxu1 %v16356_v38  ;;  %v2104_v38 = vand.u32 4294901760, %v2103_v10 }
 0x114   : > { %11971 = vmatpush3.msra.mxu0 %v16179_v17  ;;  %11967 = vmatprep.mubr.f32.mxu0 %v16195_v23  ;;  %v2076_v17 = vand.u32 4294901760, %v2075_v25  ;;  %v2097_v25 = vand.u32 4294901760, %v2096_v7  ;;  %v18377_v7 = vand.u32 4294901760, %v16265_v2 }
 0x115   : > { %11978 = vmatprep.subr.mxu0 %v16154_v3 }
 0x116   : > { %v16413_v0 = vpack.c.bf16 %v2083_v63, %v2076_v17  ;;  %v1393_v35 = vsub.f32 %v16265_v2, %v18377_v7  ;;  %v16429_v63 = vand.u32 4294901760, %v1278_v42  ;;  %v18379_v17 = vand.u32 4294901760, %v16353_v37 }
 0x117   : > { %11968 = vmatmul.mubr.f32.gmra.mrb[2].mxu0 %v16198_v24  ;;  %v18375_v24 = vand.u32 4294901760, %v16383_v34  ;;  %v16443_v23 = vpack.c.bf16 %v2097_v25, %v2090_v11  ;;  %v18160_v7 = vand.u32 4294901760, %v16405_v47  ;;  %v18384_v25 = vand.u32 4294901760, %v16229_v40 }
 0x118   : > { %11972 = vmatprep.mubr.f32.mxu0 %v16162_v8  ;;  %18373 = vst [vmem:[#allocation47_spill] sm:$0xff] %v16413_v0  ;;  %v1400_v57 = vsub.f32 %v16353_v37, %v18379_v17  ;;  %13835 = vmatprep.subr.bf16.mxu1 %v16413_v0  ;;  %v16454_v51 = vsub.f32 %v1278_v42, %v16429_v63  ;;  %v18385_v11 = vand.u32 4294901760, %v16232_v41  ;;  %v18387_v40 = vand.u32 4294901760, %v16411_v36 }
 0x119   : > { %v2110_v29 = vsub.f32 %v16383_v34, %v18375_v24  ;;  %v16435_v24 = vand.u32 4294901760, %v16387_v39  ;;  %18381 = vst [vmem:[#allocation51_spill] sm:$0xff] %v16443_v23  ;;  %13837 = vmatpush3.bf16.msra.mxu1 %v16413_v0  ;;  %v1407_v0 = vsub.f32 %v16405_v47, %v18160_v7 }
 0x11a   : > { %18383 = vst [vmem:[#allocation53_spill] sm:$0xff] %v16454_v51  ;;  %v16462_v17 = vpack.c.bf16 %v18385_v11, %v18384_v25  ;;  %13839 = vmatprep.subr.bf16.mxu1 %v16443_v23  ;;  %v1401_v42 = vand.u32 4294901760, %v1400_v57  ;;  %v1414_v41 = vsub.f32 %v16411_v36, %v18387_v40  ;;  %v16482_v11 = vand.u32 4294901760, %v16454_v51 }
 0x11b   : > { %11973 = vmatmul.mubr.f32.vlgmr.msra.gmra.mrb[0].mxu0 %v16164_v9  ;;  %18378 = vst [vmem:[#allocation49_spill] sm:$0xff] %v16435_v24  ;;  %v2111_v21 = vand.u32 4294901760, %v2110_v29  ;;  %v1352_v10 = vsub.f32 %v16387_v39, %v16435_v24  ;;  %v1394_v29 = vand.u32 4294901760, %v1393_v35  ;;  %v1362_v35 = vsub.f32 %v16424_v50, %v16451_v20 }
 0x11c   : > { %11979 = vmatpush3.msra.mxu0 %v16154_v3  ;;  %11975 = vmatprep.mubr.f32.mxu0 %v16168_v13  ;;  %v16467_v3 = vand.u32 4294901760, %v16441_v1  ;;  %18389 = vst [vmem:[#allocation56_spill] sm:$0xff] %v16482_v11  ;;  %v1408_v40 = vand.u32 4294901760, %v1407_v0  ;;  %v1415_v7 = vand.u32 4294901760, %v1414_v41  ;;  %v18391_v41 = vand.u32 4294901760, %v16353_v37 }
 0x11d   : > { %13739 = vmatprep.subr.bf16.mxu0 %v16246_v53  ;;  %v16476_v25 = vpack.c.bf16 %v2111_v21, %v2104_v38  ;;  %13841 = vmatpush3.bf16.msra.mxu1 %v16443_v23  ;;  %v16487_v57 = vand.u32 4294901760, %v1352_v10  ;;  %v13746_v38 = vpack.c.bf16 %v1401_v42, %v1394_v29  ;;  %v16494_v19 = vand.u32 4294901760, %v1362_v35 }
 0x11e   : > { %18386 = vst [vmem:[#allocation54_spill] sm:$0xff] %v16467_v3  ;;  %v1372_v21 = vsub.f32 %v16441_v1, %v16467_v3  ;;  %v1382_v23 = vsub.f32 %v16454_v51, %v16482_v11  ;;  %v13750_v0 = vpack.c.bf16 %v1415_v7, %v1408_v40  ;;  %v13754_v42 = vpack.c.bf16 %v16353_v37, %v16265_v2 }
 0x11f   : > { %11976 = vmatmul.mubr.f32.gmra.mrb[2].mxu0 %v16170_v14  ;;  %18388 = vst [vmem:[#allocation55_spill] sm:$0xff] %v16476_v25  ;;  %13843 = vmatprep.subr.bf16.mxu1 %v16476_v25  ;;  %v13758_v7 = vpack.c.bf16 %v16411_v36, %v16405_v47 }
 0x120   : > { %11980 = vmatprep.mubr.f32.mxu0 %v16162_v8  ;;  %v16501_v10 = vand.u32 4294901760, %v1372_v21  ;;  %v16504_v29 = vand.u32 4294901760, %v1382_v23  ;;  %v18390_v23 = vand.u32 4294901760, %v16265_v2  ;;  %v18392_v21 = vand.u32 4294901760, %v16405_v47  ;;  %v678_v2 = vld [vmem:[#allocation12 + $0x78] sm:$0xff] }
 0x121   : > { %13845 = vmatpush3.bf16.msra.mxu1 %v16476_v25  ;;  %v1940_v37 = vand.u32 4294901760, %v678_v2 }
 0x122   : > { %v13770_v35 = vpack.c.bf16 %v18391_v41, %v18390_v23 }
 0x123   : > { %11981 = vmatmul.mubr.f32.vlgmr.msra.gmra.mrb[0].mxu0 %v16164_v9 }
 0x124   : > { %13741 = vmatpush3.bf16.msra.mxu0 %v16246_v53  ;;  %11983 = vmatprep.mubr.f32.mxu0 %v16168_v13 }
 0x125   : > { %13743 = vmatprep.subr.bf16.mxu0 %v16462_v17 }
 0x127   : > { %11984 = vmatmul.mubr.f32.gmra.mrb[2].mxu0 %v16170_v14 }
 0x128   : > { %13745 = vmatpush3.bf16.msra.mxu0 %v16462_v17  ;;  %11994 = vmatprep.mubr.f32.mxu0 %v16487_v57 }
 0x129   : > { %13747 = vmatprep.subr.bf16.mxu0 %v13746_v38 }
 0x12b   : > { %11995 = vmatmul.mubr.f32.vlgmr.msra.gmra.mrb[0].mxu0 %v16494_v19 }
 0x12c   : > { %13749 = vmatpush3.bf16.msra.mxu0 %v13746_v38  ;;  %11997 = vmatprep.mubr.f32.mxu0 %v16501_v10  ;;  %v18393_v38 = vand.u32 4294901760, %v16411_v36 }
 0x12d   : > { %13751 = vmatprep.subr.bf16.mxu0 %v13750_v0 }
 0x12e   : > { %v13774_v40 = vpack.c.bf16 %v18393_v38, %v18392_v21  ;;  %v16580_v38 = vpack.c.bf16 %v16259_v59, %v16251_v55 }
 0x12f   : > { %11998 = vmatmul.mubr.f32.gmra.mrb[2].mxu0 %v16504_v29 }
 0x130   : > { %13753 = vmatpush3.bf16.msra.mxu0 %v13750_v0  ;;  %12008 = vmatprep.mubr.f32.mxu0 %v16249_v54  ;;  %18397 = vst [vmem:[#allocation60_spill] sm:$0xff] %v16580_v38 }
 0x131   : > { %13755 = vmatprep.subr.bf16.mxu0 %v13754_v42 }
 0x133   : > { %12009 = vmatmul.mubr.f32.vlgmr.msra.gmra.mrb[0].mxu0 %v16390_v28 }
 0x134   : > { %13757 = vmatpush3.bf16.msra.mxu0 %v13754_v42  ;;  %12011 = vmatprep.mubr.f32.mxu0 %v16400_v44 }
 0x135   : > { %13759 = vmatprep.subr.bf16.mxu0 %v13758_v7 }
 0x137   : > { %12012 = vmatmul.mubr.f32.gmra.mrb[2].mxu0 %v16429_v63 }
 0x138   : > { %13761 = vmatpush3.bf16.msra.mxu0 %v13758_v7  ;;  %12022 = vmatprep.mubr.f32.mxu0 %v16387_v39 }
 0x139   : > { %13763 = vmatprep.subr.bf16.mxu0 %v16246_v53 }
 0x13b   : > { %12023 = vmatmul.mubr.f32.vlgmr.msra.gmra.mrb[0].mxu0 %v16424_v50 }
 0x13c   : > { %13765 = vmatpush3.bf16.msra.mxu0 %v16246_v53  ;;  %12025 = vmatprep.mubr.f32.mxu0 %v16441_v1 }
 0x13d   : > { %13767 = vmatprep.subr.bf16.mxu0 %v16462_v17 }
 0x13f   : > { %12026 = vmatmul.mubr.f32.gmra.mrb[2].mxu0 %v16454_v51 }
 0x140   : > { %13769 = vmatpush3.bf16.msra.mxu0 %v16462_v17  ;;  %12036 = vmatprep.mubr.f32.mxu0 %v16435_v24 }
 0x141   : > { %13771 = vmatprep.subr.bf16.mxu0 %v13770_v35 }
 0x143   : > { %12037 = vmatmul.mubr.f32.vlgmr.msra.gmra.mrb[0].mxu0 %v16451_v20 }
 0x144   : > { %13773 = vmatpush3.bf16.msra.mxu0 %v13770_v35  ;;  %12039 = vmatprep.mubr.f32.mxu0 %v16467_v3 }
 0x145   : > { %13775 = vmatprep.subr.bf16.mxu0 %v13774_v40 }
 0x147   : > { %12040 = vmatmul.mubr.f32.gmra.mrb[2].mxu0 %v16482_v11 }
 0x148   : > { %13777 = vmatpush3.bf16.msra.mxu0 %v13774_v40  ;;  %12050 = vmatprep.mubr.f32.mxu0 %v16249_v54 }
 0x149   : > { %13779 = vmatprep.subr.bf16.mxu0 %v16246_v53 }
 0x14b   : > { %12051 = vmatmul.mubr.f32.vlgmr.msra.gmra.mrb[0].mxu0 %v16390_v28 }
 0x14c   : > { %13781 = vmatpush3.bf16.msra.mxu0 %v16246_v53  ;;  %12053 = vmatprep.mubr.f32.mxu0 %v16400_v44  ;;  %v677_v53 = vld [vmem:[#allocation12 + $0x70] sm:$0xff] }
 0x14d   : > { %13783 = vmatprep.subr.bf16.mxu0 %v16462_v17  ;;  %v1937_v36 = vand.u32 4294901760, %v677_v53 }
 0x14f   : > { %12054 = vmatmul.mubr.f32.gmra.mrb[2].mxu0 %v16429_v63  ;;  %v16562_v47 = vsub.f32 %v677_v53, %v1937_v36  ;;  %v16583_v40 = vpack.c.bf16 %v1940_v37, %v1937_v36  ;;  %v634_v53 = vld [vmem:[%s531_s23] sm:$0xff] }
 0x150   : > { %13785 = vmatpush3.bf16.msra.mxu0 %v16462_v17  ;;  %12064 = vmatprep.mubr.f32.mxu0 %v16249_v54  ;;  %v16564_v17 = vsub.f32 %v678_v2, %v1940_v37  ;;  %v16589_v2 = vand.u32 4294901760, %v634_v53 }
 0x151   : > { %13787 = vmatprep.subr.bf16.mxu0 %v16257_v58  ;;  %18394 = vst [vmem:[#allocation57_spill] sm:$0xff] %v16562_v47  ;;  %v18166_v0 = vand.u32 4294901760, %v16562_v47 }
 0x152   : > { %18395 = vst [vmem:[#allocation58_spill] sm:$0xff] %v16564_v17  ;;  %v18165_v42 = vand.u32 4294901760, %v16564_v17 }
 0x153   : > { %12065 = vmatmul.mubr.f32.vlgmr.msra.gmra.mrb[0].mxu0 %v16390_v28  ;;  %v2117_v7 = vsub.f32 %v16562_v47, %v18166_v0  ;;  %v16608_v0 = vpack.c.bf16 %v16270_v6, %v16263_v62 }
 0x154   : > { %12067 = vmatprep.mubr.f32.mxu0 %v16400_v44  ;;  %13789 = vmatpush3.bf16.msra.mxu0 %v16257_v58  ;;  %v2124_v23 = vsub.f32 %v16564_v17, %v18165_v42 }
 0x155   : > { %13791 = vmatprep.subr.bf16.mxu0 %v16268_v5  ;;  %v2118_v41 = vand.u32 4294901760, %v2117_v7  ;;  %v16594_v7 = vpack.c.bf16 %v16564_v17, %v16562_v47  ;;  %18400 = vst [vmem:[#allocation63_spill] sm:$0xff] %v16608_v0  ;;  %v16634_v47 = vpack.c.bf16 %v16286_v27, %v16279_v22 }
 0x156   : > { %v2125_v35 = vand.u32 4294901760, %v2124_v23  ;;  %v16597_v23 = vsub.f32 %v634_v53, %v16589_v2 }
 0x157   : > { %12068 = vmatmul.mubr.f32.gmra.mrb[2].mxu0 %v16429_v63  ;;  %18398 = vst [vmem:[#allocation61_spill] sm:$0xff] %v16594_v7  ;;  %18403 = vst [vmem:[#allocation66_spill] sm:$0xff] %v16634_v47 }
 0x158   : > { %13793 = vmatpush3.bf16.msra.mxu0 %v16268_v5  ;;  %v16574_v21 = vpack.c.bf16 %v2125_v35, %v2118_v41 }
 0x159   : > { %13795 = vmatprep.subr.bf16.mxu0 %v16277_v12 }
 0x15a   : > { %18396 = vst [vmem:[#allocation59_spill] sm:$0xff] %v16574_v21  ;;  %13847 = vmatprep.subr.bf16.mxu1 %v16574_v21 }
 0x15b   : > { %13849 = vmatpush3.bf16.msra.mxu1 %v16574_v21  ;;  %v16611_v21 = vand.u32 4294901760, %v16597_v23 }
 0x15c   : > { %13797 = vmatpush3.bf16.msra.mxu0 %v16277_v12  ;;  %13851 = vmatprep.subr.bf16.mxu1 %v16580_v38 }
 0x15d   : > { %13799 = vmatprep.subr.bf16.mxu0 %v16302_v52 }
 0x160   : > { %13801 = vmatpush3.bf16.msra.mxu0 %v16302_v52 }
 0x161   : > { %13803 = vmatprep.subr.bf16.mxu0 %v16327_v43 }
 0x164   : > { %13805 = vmatpush3.bf16.msra.mxu0 %v16327_v43 }
 0x165   : > { %13807 = vmatprep.subr.bf16.mxu0 %v16343_v49 }
 0x168   : > { %13809 = vmatpush3.bf16.msra.mxu0 %v16343_v49 }
 0x169   : > { %13811 = vmatprep.subr.bf16.mxu0 %v16374_v46 }
 0x16c   : > { %13813 = vmatpush3.bf16.msra.mxu0 %v16374_v46 }
 0x16d   : > { %13815 = vmatprep.subr.bf16.mxu0 %v16583_v40 }
 0x170   : > { %13817 = vmatpush3.bf16.msra.mxu0 %v16583_v40 }
 0x171   : > { %12298 = vmatprep.subr.mxu0 %v16589_v2 }
 0x226   : > { %v12066_v41 = vpop.f32.mrb[0].mxu0 }
 0x227   : > { %v16599_v36 = vand.u32 4294901760, %v12066_v41  ;;  %v1872_v37 = vpop.f32.mrb[1].mxu0 }
 0x228   : > { %v16601_v35 = vand.u32 4294901760, %v1872_v37 }
 0x229   : > { %18399 = vst [vmem:[#allocation62_spill] sm:$0xff] %v16599_v36  ;;  %v16604_v42 = vsub.f32 %v12066_v41, %v16599_v36  ;;  %v2778_v41 = vsub.f32 %v16597_v23, %v16611_v21 }
 0x22a   : > { %v16614_v25 = vsub.f32 %v1872_v37, %v16601_v35  ;;  %v12069_v53 = vpop.f32.mrb[2].mxu0  ;;  %12140 = vmatprep.mubr.f32.mxu1 %v16601_v35 }
 0x22b   : > { %v18185_v11 = vand.u32 4294901760, %v16604_v42  ;;  %v16618_v3 = vand.u32 4294901760, %v12069_v53  ;;  %v1884_v20 = vpop.f32.mrb[3].mxu0  ;;  %12141 = vmatmul.mubr.f32.vlgmr.msra.gmra.mrb[0].mxu1 %v16599_v36 }
 0x22c   : > { %v16622_v24 = vand.u32 4294901760, %v1884_v20  ;;  %13853 = vmatpush3.bf16.msra.mxu1 %v16580_v38  ;;  %v18404_v38 = vand.u32 4294901760, %v16614_v25 }
 0x22d   : > { %18401 = vst [vmem:[#allocation64_spill] sm:$0xff] %v16618_v3  ;;  %v1988_v37 = vsub.f32 %v16604_v42, %v18185_v11  ;;  %v16629_v17 = vsub.f32 %v12069_v53, %v16618_v3  ;;  %13855 = vmatprep.subr.bf16.mxu1 %v16608_v0 }
 0x22e   : > { %18402 = vst [vmem:[#allocation65_spill] sm:$0xff] %v16622_v24  ;;  %v16639_v36 = vsub.f32 %v1884_v20, %v16622_v24  ;;  %12143 = vmatprep.mubr.f32.mxu1 %v16622_v24  ;;  %v1978_v11 = vsub.f32 %v16614_v25, %v18404_v38  ;;  %v16653_v20 = vpack.c.bf16 %v16304_v56, %v16296_v45  ;;  %v2779_v24 = vand.u32 4294901760, %v2778_v41 }
 0x22f   : > { %v18198_v53 = vand.u32 4294901760, %v16629_v17  ;;  %12144 = vmatmul.mubr.f32.gmra.mrb[2].mxu1 %v16618_v3  ;;  %v1989_v50 = vand.u32 4294901760, %v1988_v37  ;;  %v16666_v3 = vpack.c.bf16 %v16335_v4, %v16329_v26  ;;  %v18412_v41 = vand.u32 4294901760, %v16614_v25 }
 0x230   : > { %v18199_v51 = vand.u32 4294901760, %v16639_v36  ;;  %13857 = vmatpush3.bf16.msra.mxu1 %v16608_v0  ;;  %12178 = vmatprep.mubr.f32.mxu1 %v16614_v25  ;;  %v1979_v1 = vand.u32 4294901760, %v1978_v11  ;;  %18405 = vst [vmem:[#allocation67_spill] sm:$0xff] %v16653_v20  ;;  %v18417_v25 = vld [vmem:[#allocation37_spill] sm:$0xff] }
 0x231   : > { %13859 = vmatprep.subr.bf16.mxu1 %v16634_v47  ;;  %v2008_v38 = vsub.f32 %v16629_v17, %v18198_v53  ;;  %18406 = vst [vmem:[#allocation68_spill] sm:$0xff] %v16666_v3  ;;  %v18414_v53 = vld [vmem:[#allocation36_spill] sm:$0xff] }
 0x232   : > { %12102 = vmatprep.mubr.f32.mxu0 %v1979_v1  ;;  %v1998_v0 = vsub.f32 %v16639_v36, %v18199_v51  ;;  %v16681_v1 = vpack.c.bf16 %v16383_v34, %v16381_v60  ;;  %v16723_v51 = vld [vmem:[%s16122_s17 + $0x10] sm:$0xff] }
 0x233   : > { %12103 = vmatmul.mubr.f32.vlgmr.msra.gmra.mrb[4].mxu0 %v1989_v50  ;;  %v2009_v37 = vand.u32 4294901760, %v2008_v38  ;;  %v16673_v50 = vpack.c.bf16 %v16345_v48, %v16337_v61  ;;  %v18413_v38 = vld [vmem:[#allocation35_spill] sm:$0xff]  ;;  %18415 = vst [vmem:[#allocation73_spill] sm:$0xff] %v16723_v51 }
 0x234   : > { %13861 = vmatpush3.bf16.msra.mxu1 %v16634_v47  ;;  %12299 = vmatpush3.msra.mxu0 %v16589_v2  ;;  %v1999_v11 = vand.u32 4294901760, %v1998_v0  ;;  %18408 = vst [vmem:[#allocation70_spill] sm:$0xff] %v16681_v1  ;;  %v16709_v0 = vld [vmem:[%s16122_s17] sm:$0xff] }
 0x235   : > { %13863 = vmatprep.subr.bf16.mxu1 %v16653_v20  ;;  %12306 = vmatprep.subr.mxu0 %v2779_v24  ;;  %18407 = vst [vmem:[#allocation69_spill] sm:$0xff] %v16673_v50  ;;  %18410 = vst [vmem:[#allocation71_spill] sm:$0xff] %v16709_v0 }
 0x236   : > { %12105 = vmatprep.mubr.f32.mxu0 %v1999_v11  ;;  %v3244_v11 = vand.u32 4294901760, %v16709_v0 }
 0x237   : > { %12106 = vmatmul.mubr.f32.gmra.mrb[6].mxu0 %v2009_v37 }
 0x238   : > { %13865 = vmatpush3.bf16.msra.mxu1 %v16653_v20  ;;  %12300 = vmatprep.mubr.f32.mxu0 %v16208_v30 }
 0x239   : > { %13867 = vmatprep.subr.bf16.mxu1 %v16666_v3 }
 0x23b   : > { %12301 = vmatmul.mubr.f32.vlgmr.msra.gmra.mrb[8].mxu0 %v16210_v31  ;;  %v18418_v31 = vld [vmem:[#allocation38_spill] sm:$0xff] }
 0x23c   : > { %13869 = vmatpush3.bf16.msra.mxu1 %v16666_v3  ;;  %12307 = vmatpush3.msra.mxu0 %v2779_v24  ;;  %v18409_v24 = vld [vmem:[#allocation34_spill] sm:$0xff] }
 0x23d   : > { %13871 = vmatprep.subr.bf16.mxu1 %v16673_v50  ;;  %12303 = vmatprep.mubr.f32.mxu0 %v16212_v32 }
 0x23e   : > { %12314 = vmatprep.subr.mxu0 %v16597_v23 }
 0x23f   : > { %12304 = vmatmul.mubr.f32.gmra.mrb[10].mxu0 %v16216_v33  ;;  %v16736_v33 = vsub.f32 %v16709_v0, %v3244_v11 }
 0x240   : > { %13873 = vmatpush3.bf16.msra.mxu1 %v16673_v50  ;;  %12308 = vmatprep.mubr.f32.mxu0 %v16162_v8 }
 0x241   : > { %13875 = vmatprep.subr.bf16.mxu1 %v16681_v1  ;;  %v18220_v30 = vand.u32 4294901760, %v16736_v33 }
 0x243   : > { %12309 = vmatmul.mubr.f32.vlgmr.msra.gmra.mrb[8].mxu0 %v16164_v9 }
 0x244   : > { %13877 = vmatpush3.bf16.msra.mxu1 %v16681_v1  ;;  %12315 = vmatpush3.msra.mxu0 %v16597_v23  ;;  %v16712_v23 = vld [vmem:[%s16122_s17 + $0x8] sm:$0xff] }
 0x245   : > { %13879 = vmatprep.subr.bf16.mxu1 %v16594_v7  ;;  %12311 = vmatprep.mubr.f32.mxu0 %v16168_v13  ;;  %18411 = vst [vmem:[#allocation72_spill] sm:$0xff] %v16712_v23  ;;  %v3247_v37 = vand.u32 4294901760, %v16712_v23 }
 0x246   : > { %12322 = vmatprep.subr.mxu0 %v16589_v2 }
 0x247   : > { %12312 = vmatmul.mubr.f32.gmra.mrb[10].mxu0 %v16170_v14  ;;  %v16739_v32 = vsub.f32 %v16712_v23, %v3247_v37 }
 0x248   : > { %13881 = vmatpush3.bf16.msra.mxu1 %v16594_v7  ;;  %12316 = vmatprep.mubr.f32.mxu0 %v16174_v15 }
 0x249   : > { %13883 = vmatprep.subr.bf16.mxu1 %v16257_v58  ;;  %v18221_v7 = vand.u32 4294901760, %v16739_v32 }
 0x24b   : > { %12179 = vmatmul.mubr.f32.vlgmr.msra.gmra.mrb[0].mxu1 %v16604_v42  ;;  %12317 = vmatmul.mubr.f32.vlgmr.msra.gmra.mrb[8].mxu0 %v16177_v16  ;;  %v16726_v16 = vld [vmem:[%s16122_s17 + $0x18] sm:$0xff] }
 0x24c   : > { %12181 = vmatprep.mubr.f32.mxu1 %v16639_v36  ;;  %13885 = vmatpush3.bf16.msra.mxu1 %v16257_v58  ;;  %18416 = vst [vmem:[#allocation74_spill] sm:$0xff] %v16726_v16  ;;  %v3253_v15 = vand.u32 4294901760, %v16726_v16 }
 0x24d   : > { %12323 = vmatpush3.msra.mxu0 %v16589_v2  ;;  %13887 = vmatprep.subr.bf16.mxu1 %v16268_v5 }
 0x24e   : > { %12319 = vmatprep.mubr.f32.mxu0 %v16182_v18  ;;  %12330 = vmatprep.subr.mxu0 %v16611_v21  ;;  %v16753_v23 = vsub.f32 %v16726_v16, %v3253_v15 }
 0x24f   : > { %12182 = vmatmul.mubr.f32.gmra.mrb[2].mxu1 %v16629_v17  ;;  %12320 = vmatmul.mubr.f32.gmra.mrb[10].mxu0 %v18409_v24 }
 0x250   : > { %13889 = vmatpush3.bf16.msra.mxu1 %v16268_v5  ;;  %12216 = vmatprep.mubr.f32.mxu1 %v18412_v41  ;;  %v3250_v41 = vand.u32 4294901760, %v16723_v51 }
 0x251   : > { %13891 = vmatprep.subr.bf16.mxu1 %v16277_v12  ;;  %12324 = vmatprep.mubr.f32.mxu0 %v18413_v38 }
 0x252   : > { %v16750_v0 = vsub.f32 %v16723_v51, %v3250_v41  ;;  %v18224_v51 = vand.u32 4294901760, %v16753_v23 }
 0x253   : > { %12325 = vmatmul.mubr.f32.vlgmr.msra.gmra.mrb[8].mxu0 %v18414_v53 }
 0x254   : > { %13893 = vmatpush3.bf16.msra.mxu1 %v16277_v12  ;;  %12331 = vmatpush3.msra.mxu0 %v16611_v21  ;;  %v16745_v21 = vpack.c.bf16 %v3247_v37, %v3244_v11  ;;  %v3356_v11 = vsub.f32 %v16736_v33, %v18220_v30  ;;  %v3363_v37 = vsub.f32 %v16739_v32, %v18221_v7  ;;  %v18225_v16 = vand.u32 4294901760, %v16750_v0 }
 0x255   : > { %13895 = vmatprep.subr.bf16.mxu1 %v16302_v52  ;;  %12327 = vmatprep.mubr.f32.mxu0 %v18417_v25  ;;  %v3377_v50 = vsub.f32 %v16753_v23, %v18224_v51 }
 0x256   : > { %12338 = vmatprep.subr.mxu0 %v16589_v2  ;;  %v3357_v1 = vand.u32 4294901760, %v3356_v11  ;;  %v3364_v30 = vand.u32 4294901760, %v3363_v37  ;;  %v3370_v7 = vsub.f32 %v16750_v0, %v18225_v16 }
 0x257   : > { %12328 = vmatmul.mubr.f32.gmra.mrb[10].mxu0 %v18418_v31  ;;  %v3378_v16 = vand.u32 4294901760, %v3377_v50  ;;  %v18426_v50 = vand.u32 4294901760, %v16639_v36  ;;  %v18434_v36 = vand.u32 4294901760, %v16329_v26  ;;  %v18441_v26 = vand.u32 4294901760, %v16381_v60 }
 0x258   : > { %13897 = vmatpush3.bf16.msra.mxu1 %v16302_v52  ;;  %12332 = vmatprep.mubr.f32.mxu0 %v16162_v8  ;;  %v13986_v37 = vpack.c.bf16 %v3364_v30, %v3357_v1  ;;  %v3371_v51 = vand.u32 4294901760, %v3370_v7  ;;  %v18425_v7 = vand.u32 4294901760, %v16604_v42 }
 0x259   : > { %13899 = vmatprep.subr.bf16.mxu1 %v16327_v43 }
 0x25a   : > { %v13990_v30 = vpack.c.bf16 %v3378_v16, %v3371_v51  ;;  %v13994_v16 = vpack.c.bf16 %v16739_v32, %v16736_v33  ;;  %v18430_v51 = vand.u32 4294901760, %v16629_v17  ;;  %v13998_v17 = vpack.c.bf16 %v16753_v23, %v16750_v0 }
 0x25b   : > { %12333 = vmatmul.mubr.f32.vlgmr.msra.gmra.mrb[8].mxu0 %v16164_v9 }
 0x25c   : > { %13901 = vmatpush3.bf16.msra.mxu1 %v16327_v43  ;;  %12339 = vmatpush3.msra.mxu0 %v16589_v2  ;;  %v16773_v2 = vpack.c.bf16 %v3253_v15, %v3250_v41  ;;  %v18419_v15 = vand.u32 4294901760, %v16251_v55  ;;  %v18420_v41 = vand.u32 4294901760, %v16259_v59  ;;  %v18422_v55 = vand.u32 4294901760, %v16263_v62 }
 0x25d   : > { %13903 = vmatprep.subr.bf16.mxu1 %v16343_v49  ;;  %12335 = vmatprep.mubr.f32.mxu0 %v16168_v13  ;;  %v18423_v59 = vand.u32 4294901760, %v16270_v6  ;;  %v18427_v62 = vand.u32 4294901760, %v16279_v22  ;;  %v18428_v6 = vand.u32 4294901760, %v16286_v27  ;;  %v18431_v22 = vand.u32 4294901760, %v16296_v45 }
 0x25e   : > { %13979 = vmatprep.subr.bf16.mxu0 %v16745_v21  ;;  %v16790_v11 = vpack.c.bf16 %v18420_v41, %v18419_v15  ;;  %v18432_v27 = vand.u32 4294901760, %v16304_v56  ;;  %v18435_v45 = vand.u32 4294901760, %v16335_v4  ;;  %v18437_v41 = vand.u32 4294901760, %v16337_v61  ;;  %v18440_v4 = vld [vmem:[#allocation48_spill] sm:$0xff] }
 0x25f   : > { %12336 = vmatmul.mubr.f32.gmra.mrb[10].mxu0 %v16170_v14  ;;  %v16802_v15 = vpack.c.bf16 %v18423_v59, %v18422_v55  ;;  %v16815_v1 = vpack.c.bf16 %v18428_v6, %v18427_v62  ;;  %v18442_v61 = vand.u32 4294901760, %v16383_v34  ;;  %v18447_v62 = vld [vmem:[#allocation53_spill] sm:$0xff]  ;;  %v18450_v6 = vld [vmem:[#allocation58_spill] sm:$0xff] }
 0x260   : > { %13905 = vmatpush3.bf16.msra.mxu1 %v16343_v49  ;;  %12340 = vmatprep.mubr.f32.mxu0 %v16162_v8  ;;  %18421 = vst [vmem:[#allocation75_spill] sm:$0xff] %v16790_v11  ;;  %v16830_v42 = vpack.c.bf16 %v18432_v27, %v18431_v22  ;;  %v16842_v56 = vpack.c.bf16 %v18435_v45, %v18434_v36  ;;  %v18448_v34 = vld [vmem:[#allocation57_spill] sm:$0xff]  ;;  %v18457_v36 = vld [vmem:[#allocation54_spill] sm:$0xff]  ;;  %v18458_v45 = vld [vmem:[#allocation56_spill] sm:$0xff] }
 0x261   : > { %13907 = vmatprep.subr.bf16.mxu1 %v16374_v46  ;;  %18424 = vst [vmem:[#allocation76_spill] sm:$0xff] %v16802_v15  ;;  %18429 = vst [vmem:[#allocation77_spill] sm:$0xff] %v16815_v1  ;;  %v16864_v59 = vpack.c.bf16 %v18442_v61, %v18441_v26  ;;  %v18449_v60 = vand.u32 4294901760, %v18448_v34  ;;  %v18453_v22 = vld [vmem:[#allocation49_spill] sm:$0xff] }
 0x262   : > { %18433 = vst [vmem:[#allocation78_spill] sm:$0xff] %v16830_v42  ;;  %18436 = vst [vmem:[#allocation79_spill] sm:$0xff] %v16842_v56  ;;  %v15390_v61 = vld [vmem:[%s16132_s6] sm:$0xff] }
 0x263   : > { %12341 = vmatmul.mubr.f32.vlgmr.msra.gmra.mrb[8].mxu0 %v16164_v9  ;;  %18443 = vst [vmem:[#allocation48_spill] sm:$0xff] %v16864_v59 }
 0x264   : > { %13909 = vmatpush3.bf16.msra.mxu1 %v16374_v46  ;;  %13981 = vmatpush3.bf16.msra.mxu0 %v16745_v21 }
 0x265   : > { %13911 = vmatprep.subr.bf16.mxu1 %v16583_v40  ;;  %12343 = vmatprep.mubr.f32.mxu0 %v16168_v13 }
 0x266   : > { %13983 = vmatprep.subr.bf16.mxu0 %v16773_v2 }
 0x267   : > { %12344 = vmatmul.mubr.f32.gmra.mrb[10].mxu0 %v16170_v14 }
 0x268   : > { %13913 = vmatpush3.bf16.msra.mxu1 %v16583_v40  ;;  %13985 = vmatpush3.bf16.msra.mxu0 %v16773_v2 }
 0x269   : > { %13915 = vmatprep.subr.bf16.mxu1 %v16790_v11  ;;  %12354 = vmatprep.mubr.f32.mxu0 %v16487_v57 }
 0x26a   : > { %13987 = vmatprep.subr.bf16.mxu0 %v13986_v37 }
 0x26b   : > { %12217 = vmatmul.mubr.f32.vlgmr.msra.gmra.mrb[0].mxu1 %v18425_v7  ;;  %12355 = vmatmul.mubr.f32.vlgmr.msra.gmra.mrb[8].mxu0 %v16494_v19  ;;  %v18446_v7 = vand.u32 4294901760, %v16739_v32  ;;  %v18454_v32 = vand.u32 4294901760, %v16750_v0  ;;  %v18459_v0 = vld [vmem:[#allocation62_spill] sm:$0xff] }
 0x26c   : > { %12219 = vmatprep.mubr.f32.mxu1 %v18426_v50  ;;  %13917 = vmatpush3.bf16.msra.mxu1 %v16790_v11 }
 0x26d   : > { %13989 = vmatpush3.bf16.msra.mxu0 %v13986_v37  ;;  %13919 = vmatprep.subr.bf16.mxu1 %v16802_v15  ;;  %v18438_v37 = vand.u32 4294901760, %v16345_v48  ;;  %v18444_v48 = vld [vmem:[#allocation50_spill] sm:$0xff] }
 0x26e   : > { %12357 = vmatprep.mubr.f32.mxu0 %v16501_v10  ;;  %13991 = vmatprep.subr.bf16.mxu0 %v13990_v30 }
 0x26f   : > { %12220 = vmatmul.mubr.f32.gmra.mrb[2].mxu1 %v18430_v51  ;;  %12358 = vmatmul.mubr.f32.gmra.mrb[10].mxu0 %v16504_v29  ;;  %v16852_v55 = vpack.c.bf16 %v18438_v37, %v18437_v41  ;;  %v18461_v41 = vld [vmem:[#allocation64_spill] sm:$0xff] }
 0x270   : > { %13921 = vmatpush3.bf16.msra.mxu1 %v16802_v15  ;;  %12254 = vmatprep.mubr.f32.mxu1 %v16601_v35 }
 0x271   : > { %13993 = vmatpush3.bf16.msra.mxu0 %v13990_v30  ;;  %13923 = vmatprep.subr.bf16.mxu1 %v16815_v1  ;;  %18439 = vst [vmem:[#allocation80_spill] sm:$0xff] %v16852_v55  ;;  %v18445_v30 = vand.u32 4294901760, %v16736_v33  ;;  %v18455_v33 = vand.u32 4294901760, %v16753_v23  ;;  %v18460_v23 = vld [vmem:[#allocation65_spill] sm:$0xff] }
 0x272   : > { %12368 = vmatprep.mubr.f32.mxu0 %v16249_v54  ;;  %13995 = vmatprep.subr.bf16.mxu0 %v13994_v16 }
 0x273   : > { %v14010_v50 = vpack.c.bf16 %v18446_v7, %v18445_v30  ;;  %v14014_v27 = vpack.c.bf16 %v18455_v33, %v18454_v32  ;;  %v4635_v30 = vmul.f32 %v15390_v61, %v15390_v61  ;;  %v15394_v61 = vld [vmem:[%s16115_s29 + $0x18] sm:$0xff] }
 0x274   : > { %13925 = vmatpush3.bf16.msra.mxu1 %v16815_v1  ;;  %12369 = vmatmul.mubr.f32.vlgmr.msra.gmra.mrb[8].mxu0 %v16390_v28 }
 0x275   : > { %13997 = vmatpush3.bf16.msra.mxu0 %v13994_v16  ;;  %13927 = vmatprep.subr.bf16.mxu1 %v16830_v42  ;;  %v18451_v16 = vand.u32 4294901760, %v18450_v6  ;;  %v16955_v7 = vand.u32 4294901760, %v4635_v30 }
 0x276   : > { %12371 = vmatprep.mubr.f32.mxu0 %v16400_v44  ;;  %13999 = vmatprep.subr.bf16.mxu0 %v13998_v17 }
 0x277   : > { %v16880_v51 = vpack.c.bf16 %v18451_v16, %v18449_v60  ;;  %18463 = vst [vmem:[#allocation53_spill] sm:$0xff] %v16955_v7  ;;  %v15391_v60 = vld [vmem:[%s16115_s29] sm:$0xff]  ;;  %v15392_v16 = vld [vmem:[%s16115_s29 + $0x8] sm:$0xff] }
 0x278   : > { %13929 = vmatpush3.bf16.msra.mxu1 %v16830_v42  ;;  %12372 = vmatmul.mubr.f32.gmra.mrb[10].mxu0 %v16429_v63  ;;  %v4631_v6 = vmul.f32 %v15391_v60, %v15391_v60  ;;  %v4632_v32 = vmul.f32 %v15392_v16, %v15392_v16 }
 0x279   : > { %14001 = vmatpush3.bf16.msra.mxu0 %v13998_v17  ;;  %13931 = vmatprep.subr.bf16.mxu1 %v16842_v56  ;;  %18452 = vst [vmem:[#allocation50_spill] sm:$0xff] %v16880_v51  ;;  %v18456_v17 = vld [vmem:[#allocation52_spill] sm:$0xff] }
 0x27a   : > { %12382 = vmatprep.mubr.f32.mxu0 %v16387_v39  ;;  %14003 = vmatprep.subr.bf16.mxu0 %v16745_v21  ;;  %v5212_v33 = vand.u32 4294901760, %v4631_v6 }
 0x27c   : > { %13933 = vmatpush3.bf16.msra.mxu1 %v16842_v56  ;;  %12383 = vmatmul.mubr.f32.vlgmr.msra.gmra.mrb[8].mxu0 %v18440_v4 }
 0x27d   : > { %14005 = vmatpush3.bf16.msra.mxu0 %v16745_v21  ;;  %13935 = vmatprep.subr.bf16.mxu1 %v16852_v55 }
 0x27e   : > { %12385 = vmatprep.mubr.f32.mxu0 %v18444_v48  ;;  %14007 = vmatprep.subr.bf16.mxu0 %v16773_v2 }
 0x280   : > { %13937 = vmatpush3.bf16.msra.mxu1 %v16852_v55  ;;  %12386 = vmatmul.mubr.f32.gmra.mrb[10].mxu0 %v18447_v62 }
 0x281   : > { %14009 = vmatpush3.bf16.msra.mxu0 %v16773_v2  ;;  %13939 = vmatprep.subr.bf16.mxu1 %v16864_v59 }
 0x282   : > { %12396 = vmatprep.mubr.f32.mxu0 %v18453_v22  ;;  %14011 = vmatprep.subr.bf16.mxu0 %v14010_v50 }
 0x284   : > { %13941 = vmatpush3.bf16.msra.mxu1 %v16864_v59  ;;  %12397 = vmatmul.mubr.f32.vlgmr.msra.gmra.mrb[8].mxu0 %v18456_v17 }
 0x285   : > { %14013 = vmatpush3.bf16.msra.mxu0 %v14010_v50  ;;  %13943 = vmatprep.subr.bf16.mxu1 %v16880_v51  ;;  %v16958_v50 = vsub.f32 %v4635_v30, %v16955_v7  ;;  %v4634_v30 = vmul.f32 %v15394_v61, %v15394_v61 }
 0x286   : > { %12399 = vmatprep.mubr.f32.mxu0 %v18457_v36  ;;  %14015 = vmatprep.subr.bf16.mxu0 %v14014_v27 }
 0x287   : > { %18464 = vst [vmem:[#allocation57_spill] sm:$0xff] %v16958_v50  ;;  %v16970_v34 = vand.u32 4294901760, %v16958_v50  ;;  %v5221_v16 = vand.u32 4294901760, %v4634_v30 }
 0x288   : > { %13945 = vmatpush3.bf16.msra.mxu1 %v16880_v51  ;;  %12400 = vmatmul.mubr.f32.gmra.mrb[10].mxu0 %v18458_v45 }
 0x289   : > { %14017 = vmatpush3.bf16.msra.mxu0 %v14014_v27  ;;  %13947 = vmatprep.subr.bf16.mxu1 %v16257_v58  ;;  %18465 = vst [vmem:[#allocation58_spill] sm:$0xff] %v16970_v34  ;;  %v5215_v27 = vand.u32 4294901760, %v4632_v32 }
 0x28a   : > { %12410 = vmatprep.mubr.f32.mxu0 %v16249_v54  ;;  %14019 = vmatprep.subr.bf16.mxu0 %v16745_v21 }
 0x28b   : > { %12255 = vmatmul.mubr.f32.vlgmr.msra.gmra.mrb[0].mxu1 %v18459_v0 }
 0x28c   : > { %12257 = vmatprep.mubr.f32.mxu1 %v18460_v23  ;;  %13949 = vmatpush3.bf16.msra.mxu1 %v16257_v58 }
 0x28d   : > { %12411 = vmatmul.mubr.f32.vlgmr.msra.gmra.mrb[8].mxu0 %v16390_v28  ;;  %13951 = vmatprep.subr.bf16.mxu1 %v16268_v5 }
 0x28e   : > { %14021 = vmatpush3.bf16.msra.mxu0 %v16745_v21  ;;  %12413 = vmatprep.mubr.f32.mxu0 %v16400_v44 }
 0x28f   : > { %12258 = vmatmul.mubr.f32.gmra.mrb[2].mxu1 %v18461_v41  ;;  %14023 = vmatprep.subr.bf16.mxu0 %v16773_v2 }
 0x290   : > { %13953 = vmatpush3.bf16.msra.mxu1 %v16268_v5  ;;  %12292 = vmatprep.mubr.f32.mxu1 %v16601_v35  ;;  %v18462_v35 = vld [vmem:[#allocation43_spill] sm:$0xff] }
 0x291   : > { %12414 = vmatmul.mubr.f32.gmra.mrb[10].mxu0 %v16429_v63  ;;  %13955 = vmatprep.subr.bf16.mxu1 %v16277_v12 }
 0x292   : > { %14025 = vmatpush3.bf16.msra.mxu0 %v16773_v2  ;;  %12424 = vmatprep.mubr.f32.mxu0 %v16249_v54 }
 0x293   : > { %14027 = vmatprep.subr.bf16.mxu0 %v16257_v58 }
 0x294   : > { %13957 = vmatpush3.bf16.msra.mxu1 %v16277_v12 }
 0x295   : > { %12425 = vmatmul.mubr.f32.vlgmr.msra.gmra.mrb[8].mxu0 %v16390_v28  ;;  %13959 = vmatprep.subr.bf16.mxu1 %v16302_v52 }
 0x296   : > { %12427 = vmatprep.mubr.f32.mxu0 %v16400_v44  ;;  %14029 = vmatpush3.bf16.msra.mxu0 %v16257_v58 }
 0x297   : > { %14031 = vmatprep.subr.bf16.mxu0 %v16268_v5 }
 0x298   : > { %13961 = vmatpush3.bf16.msra.mxu1 %v16302_v52 }
 0x299   : > { %12428 = vmatmul.mubr.f32.gmra.mrb[10].mxu0 %v16429_v63  ;;  %13963 = vmatprep.subr.bf16.mxu1 %v16327_v43 }
 0x29a   : > { %14033 = vmatpush3.bf16.msra.mxu0 %v16268_v5 }
 0x29b   : > { %14035 = vmatprep.subr.bf16.mxu0 %v16277_v12 }
 0x29c   : > { %13965 = vmatpush3.bf16.msra.mxu1 %v16327_v43 }
 0x29d   : > { %13967 = vmatprep.subr.bf16.mxu1 %v16343_v49 }
 0x29e   : > { %14037 = vmatpush3.bf16.msra.mxu0 %v16277_v12 }
 0x29f   : > { %14039 = vmatprep.subr.bf16.mxu0 %v16302_v52 }
 0x2a0   : > { %13969 = vmatpush3.bf16.msra.mxu1 %v16343_v49 }
 0x2a1   : > { %13971 = vmatprep.subr.bf16.mxu1 %v16374_v46 }
 0x2a2   : > { %14041 = vmatpush3.bf16.msra.mxu0 %v16302_v52 }
 0x2a3   : > { %14043 = vmatprep.subr.bf16.mxu0 %v16327_v43 }
 0x2a4   : > { %13973 = vmatpush3.bf16.msra.mxu1 %v16374_v46 }
 0x2a5   : > { %13975 = vmatprep.subr.bf16.mxu1 %v16583_v40 }
 0x2a6   : > { %14045 = vmatpush3.bf16.msra.mxu0 %v16327_v43 }
 0x2a7   : > { %14047 = vmatprep.subr.bf16.mxu0 %v16343_v49 }
 0x2a8   : > { %13977 = vmatpush3.bf16.msra.mxu1 %v16583_v40 }
 0x2a9   : > { %14938 = vmatprep.subr.mxu1 %v16958_v50 }
 0x2aa   : > { %14049 = vmatpush3.bf16.msra.mxu0 %v16343_v49 }
 0x2ab   : > { %12293 = vmatmul.mubr.f32.vlgmr.msra.gmra.mrb[0].mxu1 %v18459_v0  ;;  %14051 = vmatprep.subr.bf16.mxu0 %v16374_v46  ;;  %v16983_v0 = vpack.c.bf16 %v5215_v27, %v5212_v33 }
 0x2ac   : > { %12295 = vmatprep.mubr.f32.mxu1 %v18460_v23  ;;  %14939 = vmatpush3.msra.mxu1 %v16958_v50  ;;  %v15393_v23 = vld [vmem:[%s16115_s29 + $0x10] sm:$0xff] }
 0x2ad   : > { %12682 = vmatprep.subr.mxu1 %v16955_v7 }
 0x2ae   : > { %14053 = vmatpush3.bf16.msra.mxu0 %v16374_v46 }
 0x2af   : > { %12296 = vmatmul.mubr.f32.gmra.mrb[2].mxu1 %v18461_v41  ;;  %14055 = vmatprep.subr.bf16.mxu0 %v16583_v40  ;;  %v4633_v41 = vmul.f32 %v15393_v23, %v15393_v23  ;;  %v5343_v23 = vsub.f32 %v4634_v30, %v5221_v16 }
 0x2b0   : > { %12679 = vmatprep.mubr.f32.mxu1 %v16182_v18 }
 0x2b1   : > { %v5218_v60 = vand.u32 4294901760, %v4633_v41 }
 0x2b2   : > { %14057 = vmatpush3.bf16.msra.mxu0 %v16583_v40 }
 0x2b3   : > { %14059 = vmatprep.subr.bf16.mxu0 %v18462_v35  ;;  %12680 = vmatmul.mubr.f32.vlgmr.msra.gmra.mrb[4].mxu1 %v18409_v24  ;;  %v14222_v24 = vpack.c.bf16 %v5221_v16, %v5218_v60 }
 0x2b4   : > { %12683 = vmatpush3.msra.mxu1 %v16955_v7  ;;  %12684 = vmatprep.mubr.f32.mxu1 %v18413_v38 }
 0x2b5   : > { %12690 = vmatprep.subr.mxu1 %v16970_v34 }
 0x2b7   : > { %12685 = vmatmul.mubr.f32.vlgmr.msra.gmra.mrb[6].mxu1 %v18414_v53 }
 0x2b8   : > { %12687 = vmatprep.mubr.f32.mxu1 %v18417_v25  ;;  %12691 = vmatpush3.msra.mxu1 %v16970_v34  ;;  %v5329_v25 = vsub.f32 %v4632_v32, %v5215_v27 }
 0x2b9   : > { %12698 = vmatprep.subr.mxu1 %v16955_v7 }
 0x2ba   : > { %v5330_v38 = vand.u32 4294901760, %v5329_v25 }
 0x2bb   : > { %12688 = vmatmul.mubr.f32.gmra.mrb[4].mxu1 %v18418_v31  ;;  %v5322_v31 = vsub.f32 %v4631_v6, %v5212_v33  ;;  %v5344_v33 = vand.u32 4294901760, %v5343_v23 }
 0x2bc   : > { %12692 = vmatprep.mubr.f32.mxu1 %v16162_v8 }
 0x2bd   : > { %v5323_v53 = vand.u32 4294901760, %v5322_v31 }
 0x2bf   : > { %12693 = vmatmul.mubr.f32.vlgmr.msra.gmra.mrb[6].mxu1 %v16164_v9  ;;  %v5324_v18 = vsub.f32 %v5322_v31, %v5323_v53 }
 0x2c0   : > { %12695 = vmatprep.mubr.f32.mxu1 %v16168_v13  ;;  %12699 = vmatpush3.msra.mxu1 %v16955_v7  ;;  %v5331_v7 = vsub.f32 %v5329_v25, %v5330_v38 }
 0x2c1   : > { %14219 = vmatprep.subr.bf16.mxu1 %v16983_v0  ;;  %v5325_v6 = vand.u32 4294901760, %v5324_v18  ;;  %v14234_v18 = vpack.c.bf16 %v5329_v25, %v5322_v31 }
 0x2c2   : > { %v5332_v27 = vand.u32 4294901760, %v5331_v7 }
 0x2c3   : > { %12696 = vmatmul.mubr.f32.gmra.mrb[4].mxu1 %v16170_v14 }
 0x2c4   : > { %12700 = vmatprep.mubr.f32.mxu1 %v16162_v8  ;;  %v5336_v8 = vsub.f32 %v4633_v41, %v5218_v60  ;;  %v14226_v50 = vpack.c.bf16 %v5332_v27, %v5325_v6 }
 0x2c6   : > { %v5337_v32 = vand.u32 4294901760, %v5336_v8  ;;  %v14238_v7 = vpack.c.bf16 %v5343_v23, %v5336_v8 }
 0x2c7   : > { %12701 = vmatmul.mubr.f32.vlgmr.msra.gmra.mrb[6].mxu1 %v16164_v9  ;;  %v5345_v9 = vsub.f32 %v5343_v23, %v5344_v33 }
 0x2c8   : > { %14221 = vmatpush3.bf16.msra.mxu1 %v16983_v0  ;;  %12703 = vmatprep.mubr.f32.mxu1 %v16168_v13  ;;  %v5338_v61 = vsub.f32 %v5336_v8, %v5337_v32  ;;  %v14250_v8 = vpack.c.bf16 %v5330_v38, %v5323_v53 }
 0x2c9   : > { %14223 = vmatprep.subr.bf16.mxu1 %v14222_v24  ;;  %v5346_v34 = vand.u32 4294901760, %v5345_v9  ;;  %v14254_v9 = vpack.c.bf16 %v5344_v33, %v5337_v32 }
 0x2ca   : > { %v5339_v13 = vand.u32 4294901760, %v5338_v61 }
 0x2cb   : > { %12704 = vmatmul.mubr.f32.gmra.mrb[4].mxu1 %v16170_v14 }
 0x2cc   : > { %14225 = vmatpush3.bf16.msra.mxu1 %v14222_v24  ;;  %12714 = vmatprep.mubr.f32.mxu1 %v16487_v57  ;;  %v14230_v41 = vpack.c.bf16 %v5346_v34, %v5339_v13 }
 0x2cd   : > { %14227 = vmatprep.subr.bf16.mxu1 %v14226_v50 }
 0x2cf   : > { %12715 = vmatmul.mubr.f32.vlgmr.msra.gmra.mrb[6].mxu1 %v16494_v19 }
 0x2d0   : > { %12717 = vmatprep.mubr.f32.mxu1 %v16501_v10  ;;  %14229 = vmatpush3.bf16.msra.mxu1 %v14226_v50 }
 0x2d1   : > { %14231 = vmatprep.subr.bf16.mxu1 %v14230_v41 }
 0x2d3   : > { %12718 = vmatmul.mubr.f32.gmra.mrb[4].mxu1 %v16504_v29 }
 0x2d4   : > { %12728 = vmatprep.mubr.f32.mxu1 %v16249_v54  ;;  %14233 = vmatpush3.bf16.msra.mxu1 %v14230_v41 }
 0x2d5   : > { %14235 = vmatprep.subr.bf16.mxu1 %v14234_v18 }
 0x2d7   : > { %12729 = vmatmul.mubr.f32.vlgmr.msra.gmra.mrb[6].mxu1 %v16390_v28 }
 0x2d8   : > { %14237 = vmatpush3.bf16.msra.mxu1 %v14234_v18  ;;  %12731 = vmatprep.mubr.f32.mxu1 %v16400_v44 }
 0x2d9   : > { %14239 = vmatprep.subr.bf16.mxu1 %v14238_v7 }
 0x2db   : > { %12732 = vmatmul.mubr.f32.gmra.mrb[4].mxu1 %v16429_v63 }
 0x2dc   : > { %14241 = vmatpush3.bf16.msra.mxu1 %v14238_v7  ;;  %12742 = vmatprep.mubr.f32.mxu1 %v16387_v39 }
 0x2dd   : > { %14243 = vmatprep.subr.bf16.mxu1 %v16983_v0 }
 0x2df   : > { %12743 = vmatmul.mubr.f32.vlgmr.msra.gmra.mrb[6].mxu1 %v18440_v4 }
 0x2e0   : > { %14245 = vmatpush3.bf16.msra.mxu1 %v16983_v0  ;;  %12745 = vmatprep.mubr.f32.mxu1 %v18444_v48 }
 0x2e1   : > { %14247 = vmatprep.subr.bf16.mxu1 %v14222_v24 }
 0x2e3   : > { %12746 = vmatmul.mubr.f32.gmra.mrb[4].mxu1 %v18447_v62 }
 0x2e4   : > { %14249 = vmatpush3.bf16.msra.mxu1 %v14222_v24  ;;  %12756 = vmatprep.mubr.f32.mxu1 %v18453_v22 }
 0x2e5   : > { %14251 = vmatprep.subr.bf16.mxu1 %v14250_v8 }
 0x2e7   : > { %12757 = vmatmul.mubr.f32.vlgmr.msra.gmra.mrb[6].mxu1 %v18456_v17 }
 0x2e8   : > { %14253 = vmatpush3.bf16.msra.mxu1 %v14250_v8  ;;  %12759 = vmatprep.mubr.f32.mxu1 %v18457_v36 }
 0x2e9   : > { %14255 = vmatprep.subr.bf16.mxu1 %v14254_v9 }
 0x2eb   : > { %12760 = vmatmul.mubr.f32.gmra.mrb[4].mxu1 %v18458_v45 }
 0x2ec   : > { %14257 = vmatpush3.bf16.msra.mxu1 %v14254_v9  ;;  %12770 = vmatprep.mubr.f32.mxu1 %v16249_v54 }
 0x2ed   : > { %14259 = vmatprep.subr.bf16.mxu1 %v16983_v0 }
 0x2ef   : > { %12771 = vmatmul.mubr.f32.vlgmr.msra.gmra.mrb[6].mxu1 %v16390_v28 }
 0x2f0   : > { %14261 = vmatpush3.bf16.msra.mxu1 %v16983_v0  ;;  %12773 = vmatprep.mubr.f32.mxu1 %v16400_v44 }
 0x2f1   : > { %14263 = vmatprep.subr.bf16.mxu1 %v14222_v24 }
 0x2f3   : > { %12774 = vmatmul.mubr.f32.gmra.mrb[4].mxu1 %v16429_v63 }
 0x2f4   : > { %14265 = vmatpush3.bf16.msra.mxu1 %v14222_v24  ;;  %12784 = vmatprep.mubr.f32.mxu1 %v16249_v54 }
 0x2f5   : > { %14267 = vmatprep.subr.bf16.mxu1 %v16257_v58 }
 0x2f7   : > { %12785 = vmatmul.mubr.f32.vlgmr.msra.gmra.mrb[6].mxu1 %v16390_v28 }
 0x2f8   : > { %12787 = vmatprep.mubr.f32.mxu1 %v16400_v44  ;;  %14269 = vmatpush3.bf16.msra.mxu1 %v16257_v58 }
 0x2f9   : > { %14271 = vmatprep.subr.bf16.mxu1 %v16268_v5 }
 0x2fb   : > { %12788 = vmatmul.mubr.f32.gmra.mrb[4].mxu1 %v16429_v63 }
 0x2fc   : > { %14273 = vmatpush3.bf16.msra.mxu1 %v16268_v5 }
 0x2fd   : > { %14275 = vmatprep.subr.bf16.mxu1 %v16277_v12 }
 0x300   : > { %14277 = vmatpush3.bf16.msra.mxu1 %v16277_v12 }
 0x301   : > { %14279 = vmatprep.subr.bf16.mxu1 %v16302_v52 }
 0x304   : > { %14281 = vmatpush3.bf16.msra.mxu1 %v16302_v52 }
 0x305   : > { %14283 = vmatprep.subr.bf16.mxu1 %v16327_v43 }
 0x306   : > { %v16946_v21 = vpop.f32.mrb[4].mxu0 }
 0x307   : > { %v16948_v2 = vpop.f32.mrb[5].mxu0 }
 0x308   : > { %14285 = vmatpush3.bf16.msra.mxu1 %v16327_v43 }
 0x309   : > { %14287 = vmatprep.subr.bf16.mxu1 %v16343_v49 }
 0x30a   : > { %v16950_v37 = vpop.f32.mrb[6].mxu0 }
 0x30b   : > { %v16952_v26 = vpop.f32.mrb[7].mxu0 }
 0x30c   : > { %14289 = vmatpush3.bf16.msra.mxu1 %v16343_v49 }
 0x30d   : > { %14291 = vmatprep.subr.bf16.mxu1 %v16374_v46 }
 0x310   : > { %14293 = vmatpush3.bf16.msra.mxu1 %v16374_v46 }
 0x311   : > { %14295 = vmatprep.subr.bf16.mxu1 %v16583_v40 }
 0x314   : > { %14297 = vmatpush3.bf16.msra.mxu1 %v16583_v40 }
 0x315   : > { %14299 = vmatprep.subr.bf16.mxu1 %v18462_v35 }
 0x368   : > { %v12426_v13 = vpop.f32.mrb[8].mxu0 }
 0x369   : > { %v17022_v31 = vand.u32 4294901760, %v12426_v13  ;;  %v3835_v53 = vpop.f32.mrb[9].mxu0 }
 0x36a   : > { %v17025_v38 = vand.u32 4294901760, %v3835_v53 }
 0x36b   : > { %v17029_v24 = vsub.f32 %v12426_v13, %v17022_v31  ;;  %v18466_v13 = vld [vmem:[#allocation44_spill] sm:$0xff] }
 0x36c   : > { %v17033_v25 = vsub.f32 %v3835_v53, %v17025_v38  ;;  %v12429_v50 = vpop.f32.mrb[10].mxu0 }
 0x36d   : > { %v3950_v34 = vand.u32 4294901760, %v17029_v24  ;;  %v17036_v0 = vand.u32 4294901760, %v12429_v50  ;;  %v3847_v30 = vpop.f32.mrb[11].mxu0 }
 0x36e   : > { %v3940_v60 = vand.u32 4294901760, %v17033_v25  ;;  %v17039_v16 = vand.u32 4294901760, %v3847_v30 }
 0x36f   : > { %v3951_v23 = vsub.f32 %v17029_v24, %v3950_v34  ;;  %v17046_v6 = vsub.f32 %v12429_v50, %v17036_v0  ;;  %v18467_v50 = vld [vmem:[#allocation45_spill] sm:$0xff] }
 0x370   : > { %v17050_v32 = vsub.f32 %v3847_v30, %v17039_v16  ;;  %v3941_v33 = vsub.f32 %v17033_v25, %v3940_v60 }
 0x371   : > { %v18244_v27 = vand.u32 4294901760, %v17046_v6  ;;  %v3952_v18 = vand.u32 4294901760, %v3951_v23 }
 0x372   : > { %v3960_v61 = vand.u32 4294901760, %v17050_v32  ;;  %v3942_v41 = vand.u32 4294901760, %v3941_v33 }
 0x373   : > { %v3971_v7 = vsub.f32 %v17046_v6, %v18244_v27  ;;  %v18477_v27 = vld [vmem:[#allocation61_spill] sm:$0xff] }
 0x374   : > { %12462 = vmatprep.mubr.f32.mxu0 %v3942_v41  ;;  %v3961_v8 = vsub.f32 %v17050_v32, %v3960_v61  ;;  %v18468_v41 = vld [vmem:[#allocation46_spill] sm:$0xff] }
 0x375   : > { %12463 = vmatmul.mubr.f32.vlgmr.msra.gmra.mrb[12].mxu0 %v3952_v18  ;;  %v3972_v53 = vand.u32 4294901760, %v3971_v7 }
 0x376   : > { %14061 = vmatpush3.bf16.msra.mxu0 %v18462_v35  ;;  %v3962_v9 = vand.u32 4294901760, %v3961_v8 }
 0x377   : > { %14063 = vmatprep.subr.bf16.mxu0 %v18466_v13 }
 0x378   : > { %12465 = vmatprep.mubr.f32.mxu0 %v3962_v9 }
 0x379   : > { %12466 = vmatmul.mubr.f32.gmra.mrb[14].mxu0 %v3972_v53  ;;  %v18469_v53 = vld [vmem:[#allocation47_spill] sm:$0xff] }
 0x37a   : > { %14065 = vmatpush3.bf16.msra.mxu0 %v18466_v13  ;;  %12500 = vmatprep.mubr.f32.mxu0 %v17025_v38 }
 0x37b   : > { %14067 = vmatprep.subr.bf16.mxu0 %v18467_v50 }
 0x37e   : > { %14069 = vmatpush3.bf16.msra.mxu0 %v18467_v50  ;;  %v12294_v30 = vpop.f32.mrb[0].mxu1 }
 0x37f   : > { %v17076_v23 = vadd.f32 %v12294_v30, %v16946_v21  ;;  %v2642_v33 = vpop.f32.mrb[1].mxu1  ;;  %14071 = vmatprep.subr.bf16.mxu0 %v18468_v41  ;;  %v18471_v30 = vld [vmem:[#allocation55_spill] sm:$0xff] }
 0x380   : > { %v17081_v18 = vadd.f32 %v2642_v33, %v16948_v2  ;;  %v18470_v2 = vld [vmem:[#allocation51_spill] sm:$0xff]  ;;  %v18473_v33 = vld [vmem:[#allocation60_spill] sm:$0xff] }
 0x382   : > { %14073 = vmatpush3.bf16.msra.mxu0 %v18468_v41  ;;  %v12297_v7 = vpop.f32.mrb[2].mxu1 }
 0x383   : > { %v17086_v8 = vadd.f32 %v12297_v7, %v16950_v37  ;;  %v2654_v9 = vpop.f32.mrb[3].mxu1  ;;  %14075 = vmatprep.subr.bf16.mxu0 %v18469_v53  ;;  %v18472_v37 = vld [vmem:[#allocation59_spill] sm:$0xff]  ;;  %v18475_v7 = vld [vmem:[#allocation69_spill] sm:$0xff] }
 0x384   : > { %v17091_v21 = vadd.f32 %v2654_v9, %v16952_v26  ;;  %v18474_v26 = vld [vmem:[#allocation63_spill] sm:$0xff]  ;;  %v18476_v9 = vld [vmem:[#allocation70_spill] sm:$0xff] }
 0x386   : > { %14077 = vmatpush3.bf16.msra.mxu0 %v18469_v53 }
 0x387   : > { %14079 = vmatprep.subr.bf16.mxu0 %v18470_v2 }
 0x38a   : > { %14081 = vmatpush3.bf16.msra.mxu0 %v18470_v2 }
 0x38b   : > { %14083 = vmatprep.subr.bf16.mxu0 %v18471_v30 }
 0x38e   : > { %14085 = vmatpush3.bf16.msra.mxu0 %v18471_v30 }
 0x38f   : > { %14087 = vmatprep.subr.bf16.mxu0 %v18472_v37 }
 0x392   : > { %14089 = vmatpush3.bf16.msra.mxu0 %v18472_v37 }
 0x393   : > { %14091 = vmatprep.subr.bf16.mxu0 %v18473_v33 }
 0x395   : > { %12501 = vmatmul.mubr.f32.vlgmr.msra.gmra.mrb[12].mxu0 %v17022_v31 }
 0x396   : > { %12503 = vmatprep.mubr.f32.mxu0 %v17039_v16  ;;  %14093 = vmatpush3.bf16.msra.mxu0 %v18473_v33 }
 0x397   : > { %14095 = vmatprep.subr.bf16.mxu0 %v18474_v26 }
 0x399   : > { %12504 = vmatmul.mubr.f32.gmra.mrb[14].mxu0 %v17036_v0 }
 0x39a   : > { %14097 = vmatpush3.bf16.msra.mxu0 %v18474_v26  ;;  %12538 = vmatprep.mubr.f32.mxu0 %v17033_v25  ;;  %v18478_v25 = vand.u32 4294901760, %v17046_v6 }
 0x39b   : > { %14099 = vmatprep.subr.bf16.mxu0 %v16634_v47 }
 0x39e   : > { %14101 = vmatpush3.bf16.msra.mxu0 %v16634_v47 }
 0x39f   : > { %14103 = vmatprep.subr.bf16.mxu0 %v16653_v20 }
 0x3a2   : > { %14105 = vmatpush3.bf16.msra.mxu0 %v16653_v20 }
 0x3a3   : > { %14107 = vmatprep.subr.bf16.mxu0 %v16666_v3 }
 0x3a6   : > { %14109 = vmatpush3.bf16.msra.mxu0 %v16666_v3  ;;  %v18500_v3 = vld [vmem:[#allocation37_spill] sm:$0xff] }
 0x3a7   : > { %14111 = vmatprep.subr.bf16.mxu0 %v18475_v7 }
 0x3aa   : > { %14113 = vmatpush3.bf16.msra.mxu0 %v18475_v7  ;;  %v18499_v7 = vld [vmem:[#allocation36_spill] sm:$0xff] }
 0x3ab   : > { %14115 = vmatprep.subr.bf16.mxu0 %v18476_v9 }
 0x3ae   : > { %14117 = vmatpush3.bf16.msra.mxu0 %v18476_v9  ;;  %v18498_v9 = vld [vmem:[#allocation74_spill] sm:$0xff] }
 0x3af   : > { %14119 = vmatprep.subr.bf16.mxu0 %v18477_v27 }
 0x3b2   : > { %14121 = vmatpush3.bf16.msra.mxu0 %v18477_v27 }
 0x3b3   : > { %14123 = vmatprep.subr.bf16.mxu0 %v16257_v58 }
 0x3b5   : > { %12539 = vmatmul.mubr.f32.vlgmr.msra.gmra.mrb[12].mxu0 %v17029_v24  ;;  %v18480_v24 = vld [vmem:[#allocation57_spill] sm:$0xff] }
 0x3b6   : > { %12541 = vmatprep.mubr.f32.mxu0 %v17050_v32  ;;  %14125 = vmatpush3.bf16.msra.mxu0 %v16257_v58  ;;  %v17193_v32 = vld [vmem:[%s531_s23] sm:$0xff]  ;;  %s10934_s23 = sshll.u32 %s16111_s9, 3 }
 0x3b7   : > { %14127 = vmatprep.subr.bf16.mxu0 %v16268_v5  ;;  %18482 = vst [vmem:[#allocation62_spill] sm:$0xff] %v17193_v32  ;;  %s583_s7 = scalar_lea.vmem [#allocation13], %s10934_s23 }
 0x3b8   : > { %s10686_s5 = sshll.u32 %s583_s7, 4  ;;  %s10687_s5 = int_to_ptr.vmem [resolvable:$true] %s10686_s5 }
 0x3b9   : > { %12542 = vmatmul.mubr.f32.gmra.mrb[14].mxu0 %v17046_v6  ;;  %s15568_s12 = scalar_lea.vmem %s10687_s5, 128 }
 0x3ba   : > { %14129 = vmatpush3.bf16.msra.mxu0 %v16268_v5  ;;  %12576 = vmatprep.mubr.f32.mxu0 %v3940_v60  ;;  %v18481_v60 = vld [vmem:[#allocation53_spill] sm:$0xff]  ;;  %p15569_p4 = scmp.ne.s32.totalorder %s10687_s5, %s15568_s12 }
 0x3bb   : > { %14131 = vmatprep.subr.bf16.mxu0 %v16277_v12 }
 0x3be   : > { %14133 = vmatpush3.bf16.msra.mxu0 %v16277_v12 }
 0x3bf   : > { %14135 = vmatprep.subr.bf16.mxu0 %v16302_v52 }
 0x3c2   : > { %14137 = vmatpush3.bf16.msra.mxu0 %v16302_v52 }
 0x3c3   : > { %14139 = vmatprep.subr.bf16.mxu0 %v16327_v43 }
 0x3c6   : > { %14141 = vmatpush3.bf16.msra.mxu0 %v16327_v43 }
 0x3c7   : > { %14143 = vmatprep.subr.bf16.mxu0 %v16343_v49 }
 0x3ca   : > { %14145 = vmatpush3.bf16.msra.mxu0 %v16343_v49 }
 0x3cb   : > { %14147 = vmatprep.subr.bf16.mxu0 %v16374_v46 }
 0x3ce   : > { %14149 = vmatpush3.bf16.msra.mxu0 %v16374_v46 }
 0x3cf   : > { %14151 = vmatprep.subr.bf16.mxu0 %v16583_v40 }
 0x3d2   : > { %14153 = vmatpush3.bf16.msra.mxu0 %v16583_v40 }
 0x3d3   : > { %14155 = vmatprep.subr.bf16.mxu0 %v16790_v11 }
 0x3d5   : > { %12577 = vmatmul.mubr.f32.vlgmr.msra.gmra.mrb[12].mxu0 %v3950_v34 }
 0x3d6   : > { %12579 = vmatprep.mubr.f32.mxu0 %v3960_v61  ;;  %14157 = vmatpush3.bf16.msra.mxu0 %v16790_v11  ;;  %v6603_v61 = vmul.f32 %v17193_v32, %v17193_v32 }
 0x3d7   : > { %14159 = vmatprep.subr.bf16.mxu0 %v16802_v15 }
 0x3d9   : > { %12580 = vmatmul.mubr.f32.gmra.mrb[14].mxu0 %v18478_v25  ;;  %v18483_v25 = vld [vmem:[#allocation39_spill] sm:$0xff] }
 0x3da   : > { %14161 = vmatpush3.bf16.msra.mxu0 %v16802_v15  ;;  %12614 = vmatprep.mubr.f32.mxu0 %v17025_v38  ;;  %v18496_v15 = vld [vmem:[#allocation35_spill] sm:$0xff] }
 0x3db   : > { %14163 = vmatprep.subr.bf16.mxu0 %v16815_v1 }
 0x3de   : > { %14165 = vmatpush3.bf16.msra.mxu0 %v16815_v1  ;;  %v18495_v1 = vld [vmem:[#allocation34_spill] sm:$0xff] }
 0x3df   : > { %14167 = vmatprep.subr.bf16.mxu0 %v16830_v42 }
 0x3e2   : > { %14169 = vmatpush3.bf16.msra.mxu0 %v16830_v42 }
 0x3e3   : > { %14171 = vmatprep.subr.bf16.mxu0 %v16842_v56 }
 0x3e6   : > { %14173 = vmatpush3.bf16.msra.mxu0 %v16842_v56 }
 0x3e7   : > { %14175 = vmatprep.subr.bf16.mxu0 %v16852_v55 }
 0x3ea   : > { %14177 = vmatpush3.bf16.msra.mxu0 %v16852_v55  ;;  %v18490_v55 = vld [vmem:[#allocation31_spill] sm:$0xff] }
 0x3eb   : > { %14179 = vmatprep.subr.bf16.mxu0 %v16864_v59 }
 0x3ee   : > { %14181 = vmatpush3.bf16.msra.mxu0 %v16864_v59  ;;  %v18488_v59 = vld [vmem:[#allocation29_spill] sm:$0xff] }
 0x3ef   : > { %14183 = vmatprep.subr.bf16.mxu0 %v16880_v51 }
 0x3f2   : > { %14185 = vmatpush3.bf16.msra.mxu0 %v16880_v51  ;;  %v18487_v51 = vld [vmem:[#allocation28_spill] sm:$0xff] }
 0x3f3   : > { %14187 = vmatprep.subr.bf16.mxu0 %v16257_v58 }
 0x3f5   : > { %12615 = vmatmul.mubr.f32.vlgmr.msra.gmra.mrb[12].mxu0 %v17022_v31 }
 0x3f6   : > { %12617 = vmatprep.mubr.f32.mxu0 %v17039_v16  ;;  %14189 = vmatpush3.bf16.msra.mxu0 %v16257_v58 }
 0x3f7   : > { %14191 = vmatprep.subr.bf16.mxu0 %v16268_v5 }
 0x3f9   : > { %12618 = vmatmul.mubr.f32.gmra.mrb[14].mxu0 %v17036_v0 }
 0x3fa   : > { %14193 = vmatpush3.bf16.msra.mxu0 %v16268_v5  ;;  %12652 = vmatprep.mubr.f32.mxu0 %v17025_v38  ;;  %v18479_v38 = vld [vmem:[#allocation58_spill] sm:$0xff] }
 0x3fb   : > { %14195 = vmatprep.subr.bf16.mxu0 %v16277_v12  ;;  %v4746_v34 = vsub.f32 %v18480_v24, %v18479_v38  ;;  %v17199_v38 = vand.u32 4294901760, %v6603_v61 }
 0x3fd   : > { %v4747_v6 = vand.u32 4294901760, %v4746_v34  ;;  %v18484_v34 = vld [vmem:[#allocation40_spill] sm:$0xff] }
 0x3fe   : > { %14197 = vmatpush3.bf16.msra.mxu0 %v16277_v12 }
 0x3ff   : > { %14199 = vmatprep.subr.bf16.mxu0 %v16302_v52 }
 0x402   : > { %14201 = vmatpush3.bf16.msra.mxu0 %v16302_v52 }
 0x403   : > { %14203 = vmatprep.subr.bf16.mxu0 %v16327_v43 }
 0x406   : > { %14205 = vmatpush3.bf16.msra.mxu0 %v16327_v43 }
 0x407   : > { %14207 = vmatprep.subr.bf16.mxu0 %v16343_v49 }
 0x40a   : > { %14209 = vmatpush3.bf16.msra.mxu0 %v16343_v49 }
 0x40b   : > { %14211 = vmatprep.subr.bf16.mxu0 %v16374_v46 }
 0x40e   : > { %14213 = vmatpush3.bf16.msra.mxu0 %v16374_v46 }
 0x40f   : > { %14215 = vmatprep.subr.bf16.mxu0 %v16583_v40 }
 0x412   : > { %14217 = vmatpush3.bf16.msra.mxu0 %v16583_v40 }
 0x413   : > { %12658 = vmatprep.subr.mxu0 %v18481_v60 }
 0x415   : > { %12653 = vmatmul.mubr.f32.vlgmr.msra.gmra.mrb[12].mxu0 %v17022_v31  ;;  %v18485_v31 = vld [vmem:[#allocation41_spill] sm:$0xff] }
 0x416   : > { %12655 = vmatprep.mubr.f32.mxu0 %v17039_v16  ;;  %12659 = vmatpush3.msra.mxu0 %v18481_v60  ;;  %v6712_v16 = vsub.f32 %v6603_v61, %v17199_v38  ;;  %v18486_v60 = vld [vmem:[#allocation42_spill] sm:$0xff]  ;;  %v18491_v61 = vld [vmem:[#allocation32_spill] sm:$0xff] }
 0x417   : > { %12666 = vmatprep.subr.mxu0 %v4747_v6 }
 0x418   : > { %v6713_v32 = vand.u32 4294901760, %v6712_v16 }
 0x419   : > { %12656 = vmatmul.mubr.f32.gmra.mrb[14].mxu0 %v17036_v0  ;;  %v18489_v0 = vld [vmem:[#allocation30_spill] sm:$0xff] }
 0x41a   : > { %12660 = vmatprep.mubr.f32.mxu0 %v18483_v25 }
 0x41d   : > { %12661 = vmatmul.mubr.f32.vlgmr.msra.gmra.mrb[16].mxu0 %v18484_v34 }
 0x41e   : > { %12667 = vmatpush3.msra.mxu0 %v4747_v6  ;;  %12663 = vmatprep.mubr.f32.mxu0 %v18485_v31  ;;  %v6714_v6 = vsub.f32 %v6712_v16, %v6713_v32 }
 0x41f   : > { %12674 = vmatprep.subr.mxu0 %v18480_v24 }
 0x420   : > { %v6715_v56 = vand.u32 4294901760, %v6714_v6 }
 0x421   : > { %12664 = vmatmul.mubr.f32.gmra.mrb[18].mxu0 %v18486_v60 }
 0x422   : > { %12668 = vmatprep.mubr.f32.mxu0 %v18487_v51 }
 0x425   : > { %12669 = vmatmul.mubr.f32.vlgmr.msra.gmra.mrb[16].mxu0 %v18488_v59 }
 0x426   : > { %12675 = vmatpush3.msra.mxu0 %v18480_v24  ;;  %12671 = vmatprep.mubr.f32.mxu0 %v18489_v0  ;;  %v17220_v24 = vpop.f32.mrb[6].mxu1 }
 0x427   : > { %13018 = vmatprep.subr.mxu0 %v17199_v38  ;;  %v17223_v6 = vpop.f32.mrb[7].mxu1 }
 0x429   : > { %12672 = vmatmul.mubr.f32.gmra.mrb[18].mxu0 %v16170_v14 }
 0x42a   : > { %12676 = vmatprep.mubr.f32.mxu0 %v18490_v55 }
 0x42d   : > { %12677 = vmatmul.mubr.f32.vlgmr.msra.gmra.mrb[16].mxu0 %v18491_v61 }
 0x42e   : > { %13019 = vmatpush3.msra.mxu0 %v17199_v38  ;;  %13020 = vmatprep.mubr.f32.mxu0 %v18483_v25  ;;  %v18494_v25 = vld [vmem:[#allocation72_spill] sm:$0xff] }
 0x42f   : > { %13026 = vmatprep.subr.mxu0 %v6715_v56  ;;  %v6600_v42 = vmul.f32 %v18494_v25, %v18494_v25 }
 0x431   : > { %13021 = vmatmul.mubr.f32.vlgmr.msra.gmra.mrb[20].mxu0 %v18484_v34  ;;  %v17227_v34 = vpop.f32.mrb[4].mxu1  ;;  %v7183_v27 = vand.u32 4294901760, %v6600_v42 }
 0x432   : > { %13023 = vmatprep.mubr.f32.mxu0 %v18485_v31  ;;  %13027 = vmatpush3.msra.mxu0 %v6715_v56  ;;  %v17230_v56 = vpop.f32.mrb[5].mxu1  ;;  %v18493_v31 = vld [vmem:[#allocation71_spill] sm:$0xff] }
 0x433   : > { %13034 = vmatprep.subr.mxu0 %v6712_v16  ;;  %v7297_v20 = vsub.f32 %v6600_v42, %v7183_v27 }
 0x435   : > { %13024 = vmatmul.mubr.f32.gmra.mrb[22].mxu0 %v18486_v60  ;;  %v18492_v60 = vld [vmem:[#allocation33_spill] sm:$0xff]  ;;  %v7298_v26 = vand.u32 4294901760, %v7297_v20 }
 0x436   : > { %13028 = vmatprep.mubr.f32.mxu0 %v18487_v51 }
 0x437   : > { %v7299_v42 = vsub.f32 %v7297_v20, %v7298_v26 }
 0x439   : > { %13029 = vmatmul.mubr.f32.vlgmr.msra.gmra.mrb[20].mxu0 %v18488_v59 }
 0x43a   : > { %13031 = vmatprep.mubr.f32.mxu0 %v18489_v0  ;;  %13035 = vmatpush3.msra.mxu0 %v6712_v16  ;;  %v6599_v16 = vmul.f32 %v18493_v31, %v18493_v31 }
 0x43b   : > { %13042 = vmatprep.subr.mxu0 %v17199_v38 }
 0x43c   : > { %v7180_v11 = vand.u32 4294901760, %v6599_v16 }
 0x43d   : > { %13032 = vmatmul.mubr.f32.gmra.mrb[22].mxu0 %v16170_v14 }
 0x43e   : > { %13036 = vmatprep.mubr.f32.mxu0 %v18490_v55  ;;  %v18497_v55 = vld [vmem:[#allocation73_spill] sm:$0xff]  ;;  %v17251_v47 = vpack.c.bf16 %v7183_v27, %v7180_v11 }
 0x441   : > { %13037 = vmatmul.mubr.f32.vlgmr.msra.gmra.mrb[20].mxu0 %v18491_v61  ;;  %v6601_v61 = vmul.f32 %v18497_v55, %v18497_v55 }
 0x442   : > { %13039 = vmatprep.mubr.f32.mxu0 %v18492_v60  ;;  %13043 = vmatpush3.msra.mxu0 %v17199_v38  ;;  %v6602_v60 = vmul.f32 %v18498_v9, %v18498_v9 }
 0x443   : > { %13050 = vmatprep.subr.mxu0 %v6713_v32  ;;  %v7186_v25 = vand.u32 4294901760, %v6601_v61 }
 0x444   : > { %v7189_v31 = vand.u32 4294901760, %v6602_v60 }
 0x445   : > { %13040 = vmatmul.mubr.f32.gmra.mrb[22].mxu0 %v18495_v1  ;;  %v7290_v1 = vsub.f32 %v6599_v16, %v7180_v11  ;;  %v7304_v9 = vsub.f32 %v6601_v61, %v7186_v25  ;;  %v7300_v61 = vand.u32 4294901760, %v7299_v42 }
 0x446   : > { %13044 = vmatprep.mubr.f32.mxu0 %v18496_v15  ;;  %v18501_v15 = vld [vmem:[#allocation38_spill] sm:$0xff]  ;;  %v7311_v33 = vsub.f32 %v6602_v60, %v7189_v31  ;;  %v14462_v11 = vpack.c.bf16 %v7189_v31, %v7186_v25 }
 0x447   : > { %v7291_v55 = vand.u32 4294901760, %v7290_v1  ;;  %v7305_v16 = vand.u32 4294901760, %v7304_v9  ;;  %v14474_v31 = vpack.c.bf16 %v7297_v20, %v7290_v1 }
 0x449   : > { %13045 = vmatmul.mubr.f32.vlgmr.msra.gmra.mrb[20].mxu0 %v18499_v7  ;;  %v7306_v60 = vsub.f32 %v7304_v9, %v7305_v16  ;;  %v14490_v20 = vpack.c.bf16 %v7298_v26, %v7291_v55  ;;  %v2667_v26 = vmul.f32 0.020408163, %v17086_v8 }
 0x44a   : > { %13047 = vmatprep.mubr.f32.mxu0 %v18500_v3  ;;  %13051 = vmatpush3.msra.mxu0 %v6713_v32  ;;  %v7292_v32 = vsub.f32 %v7290_v1, %v7291_v55 }
 0x44b   : > { %13058 = vmatprep.subr.mxu0 %v17199_v38  ;;  %v7307_v7 = vand.u32 4294901760, %v7306_v60 }
 0x44c   : > { %v7293_v27 = vand.u32 4294901760, %v7292_v32  ;;  %v2666_v32 = vmul.f32 0.020408163, %v17091_v21 }
 0x44d   : > { %13048 = vmatmul.mubr.f32.gmra.mrb[22].mxu0 %v18501_v15  ;;  %v7312_v15 = vand.u32 4294901760, %v7311_v33 }
 0x44e   : > { %13052 = vmatprep.mubr.f32.mxu0 %v18487_v51 }
 0x44f   : > { %v7313_v3 = vsub.f32 %v7311_v33, %v7312_v15  ;;  %v14494_v1 = vpack.c.bf16 %v7312_v15, %v7305_v16  ;;  %v2664_v15 = vmul.f32 0.020408163, %v17081_v18 }
 0x451   : > { %13053 = vmatmul.mubr.f32.vlgmr.msra.gmra.mrb[20].mxu0 %v18488_v59  ;;  %v7314_v37 = vand.u32 4294901760, %v7313_v3  ;;  %v14478_v3 = vpack.c.bf16 %v7311_v33, %v7304_v9  ;;  %v10571_v9 = vmul.f32 2.0, %v2664_v15  ;;  %v17322_v60 = vmul.f32 %v2664_v15, %v2664_v15 }
 0x452   : > { %13055 = vmatprep.mubr.f32.mxu0 %v18489_v0  ;;  %13059 = vmatpush3.msra.mxu0 %v17199_v38  ;;  %v14466_v38 = vpack.c.bf16 %v7300_v61, %v7293_v27 }
 0x453   : > { %14459 = vmatprep.subr.bf16.mxu0 %v17251_v47  ;;  %v14470_v25 = vpack.c.bf16 %v7314_v37, %v7307_v7  ;;  %18507 = vst [vmem:[#allocation46_spill] sm:$0xff] %v17322_v60 }
 0x455   : > { %13056 = vmatmul.mubr.f32.gmra.mrb[22].mxu0 %v16170_v14 }
 0x456   : > { %13060 = vmatprep.mubr.f32.mxu0 %v18487_v51 }
 0x459   : > { %13061 = vmatmul.mubr.f32.vlgmr.msra.gmra.mrb[20].mxu0 %v18488_v59 }
 0x45a   : > { %14461 = vmatpush3.bf16.msra.mxu0 %v17251_v47  ;;  %13063 = vmatprep.mubr.f32.mxu0 %v18489_v0 }
 0x45b   : > { %14463 = vmatprep.subr.bf16.mxu0 %v14462_v11 }
 0x45d   : > { %13064 = vmatmul.mubr.f32.gmra.mrb[22].mxu0 %v16170_v14 }
 0x45e   : > { %14465 = vmatpush3.bf16.msra.mxu0 %v14462_v11  ;;  %13074 = vmatprep.mubr.f32.mxu0 %v16487_v57 }
 0x45f   : > { %14467 = vmatprep.subr.bf16.mxu0 %v14466_v38 }
 0x461   : > { %13075 = vmatmul.mubr.f32.vlgmr.msra.gmra.mrb[20].mxu0 %v16494_v19 }
 0x462   : > { %14469 = vmatpush3.bf16.msra.mxu0 %v14466_v38  ;;  %13077 = vmatprep.mubr.f32.mxu0 %v16501_v10 }
 0x463   : > { %14471 = vmatprep.subr.bf16.mxu0 %v14470_v25 }
 0x465   : > { %13078 = vmatmul.mubr.f32.gmra.mrb[22].mxu0 %v16504_v29 }
 0x466   : > { %14473 = vmatpush3.bf16.msra.mxu0 %v14470_v25  ;;  %13088 = vmatprep.mubr.f32.mxu0 %v16249_v54  ;;  %v10574_v25 = vmul.f32 2.0, %v2667_v26 }
 0x467   : > { %14475 = vmatprep.subr.bf16.mxu0 %v14474_v31 }
 0x469   : > { %13089 = vmatmul.mubr.f32.vlgmr.msra.gmra.mrb[20].mxu0 %v16390_v28 }
 0x46a   : > { %14477 = vmatpush3.bf16.msra.mxu0 %v14474_v31  ;;  %13091 = vmatprep.mubr.f32.mxu0 %v16400_v44 }
 0x46b   : > { %14479 = vmatprep.subr.bf16.mxu0 %v14478_v3 }
 0x46d   : > { %13092 = vmatmul.mubr.f32.gmra.mrb[22].mxu0 %v16429_v63 }
 0x46e   : > { %14481 = vmatpush3.bf16.msra.mxu0 %v14478_v3  ;;  %13102 = vmatprep.mubr.f32.mxu0 %v16387_v39 }
 0x46f   : > { %14483 = vmatprep.subr.bf16.mxu0 %v17251_v47 }
 0x471   : > { %13103 = vmatmul.mubr.f32.vlgmr.msra.gmra.mrb[20].mxu0 %v18440_v4 }
 0x472   : > { %14485 = vmatpush3.bf16.msra.mxu0 %v17251_v47  ;;  %13105 = vmatprep.mubr.f32.mxu0 %v18444_v48 }
 0x473   : > { %14487 = vmatprep.subr.bf16.mxu0 %v14462_v11 }
 0x475   : > { %13106 = vmatmul.mubr.f32.gmra.mrb[22].mxu0 %v18447_v62 }
 0x476   : > { %14489 = vmatpush3.bf16.msra.mxu0 %v14462_v11  ;;  %13116 = vmatprep.mubr.f32.mxu0 %v18453_v22 }
 0x477   : > { %14491 = vmatprep.subr.bf16.mxu0 %v14490_v20 }
 0x479   : > { %13117 = vmatmul.mubr.f32.vlgmr.msra.gmra.mrb[20].mxu0 %v18456_v17 }
 0x47a   : > { %14493 = vmatpush3.bf16.msra.mxu0 %v14490_v20  ;;  %13119 = vmatprep.mubr.f32.mxu0 %v18457_v36  ;;  %v10573_v20 = vmul.f32 2.0, %v2666_v32 }
 0x47b   : > { %14495 = vmatprep.subr.bf16.mxu0 %v14494_v1 }
 0x47d   : > { %13120 = vmatmul.mubr.f32.gmra.mrb[22].mxu0 %v18458_v45 }
 0x47e   : > { %14497 = vmatpush3.bf16.msra.mxu0 %v14494_v1  ;;  %13130 = vmatprep.mubr.f32.mxu0 %v16249_v54 }
 0x47f   : > { %14499 = vmatprep.subr.bf16.mxu0 %v17251_v47 }
 0x481   : > { %13131 = vmatmul.mubr.f32.vlgmr.msra.gmra.mrb[20].mxu0 %v16390_v28 }
 0x482   : > { %14501 = vmatpush3.bf16.msra.mxu0 %v17251_v47  ;;  %13133 = vmatprep.mubr.f32.mxu0 %v16400_v44  ;;  %v2665_v47 = vmul.f32 0.020408163, %v17076_v23 }
 0x483   : > { %14503 = vmatprep.subr.bf16.mxu0 %v14462_v11 }
 0x484   : > { %v10572_v33 = vmul.f32 2.0, %v2665_v47 }
 0x485   : > { %13134 = vmatmul.mubr.f32.gmra.mrb[22].mxu0 %v16429_v63 }
 0x486   : > { %14505 = vmatpush3.bf16.msra.mxu0 %v14462_v11  ;;  %13144 = vmatprep.mubr.f32.mxu0 %v16249_v54  ;;  %v17314_v11 = vmul.f32 %v2665_v47, %v2665_v47 }
 0x487   : > { %14507 = vmatprep.subr.bf16.mxu0 %v16257_v58 }
 0x488   : > { %18503 = vst [vmem:[#allocation64_spill] sm:$0xff] %v17314_v11 }
 0x489   : > { %13145 = vmatmul.mubr.f32.vlgmr.msra.gmra.mrb[20].mxu0 %v16390_v28 }
 0x48a   : > { %13147 = vmatprep.mubr.f32.mxu0 %v16400_v44  ;;  %14509 = vmatpush3.bf16.msra.mxu0 %v16257_v58 }
 0x48b   : > { %14511 = vmatprep.subr.bf16.mxu0 %v16268_v5 }
 0x48d   : > { %13148 = vmatmul.mubr.f32.gmra.mrb[22].mxu0 %v16429_v63 }
 0x48e   : > { %14513 = vmatpush3.bf16.msra.mxu0 %v16268_v5 }
 0x48f   : > { %14515 = vmatprep.subr.bf16.mxu0 %v16277_v12 }
 0x492   : > { %14517 = vmatpush3.bf16.msra.mxu0 %v16277_v12 }
 0x493   : > { %14519 = vmatprep.subr.bf16.mxu0 %v16302_v52 }
 0x496   : > { %14521 = vmatpush3.bf16.msra.mxu0 %v16302_v52 }
 0x497   : > { %14523 = vmatprep.subr.bf16.mxu0 %v16327_v43 }
 0x49a   : > { %14525 = vmatpush3.bf16.msra.mxu0 %v16327_v43 }
 0x49b   : > { %14527 = vmatprep.subr.bf16.mxu0 %v16343_v49 }
 0x49e   : > { %14529 = vmatpush3.bf16.msra.mxu0 %v16343_v49 }
 0x49f   : > { %14531 = vmatprep.subr.bf16.mxu0 %v16374_v46 }
 0x4a2   : > { %14533 = vmatpush3.bf16.msra.mxu0 %v16374_v46 }
 0x4a3   : > { %14535 = vmatprep.subr.bf16.mxu0 %v16583_v40 }
 0x4a6   : > { %14537 = vmatpush3.bf16.msra.mxu0 %v16583_v40 }
 0x4a7   : > { %14539 = vmatprep.subr.bf16.mxu0 %v18462_v35 }
 0x4e8   : > { %v12654_v37 = vpop.f32.mrb[12].mxu0 }
 0x4e9   : > { %v4628_v7 = vmul.f32 0.020408163, %v12654_v37  ;;  %v4605_v55 = vpop.f32.mrb[13].mxu0 }
 0x4ea   : > { %v4627_v42 = vmul.f32 0.020408163, %v4605_v55 }
 0x4eb   : > { %v17312_v16 = vmul.f32 %v10572_v33, %v4628_v7  ;;  %v17316_v27 = vmul.f32 %v4628_v7, %v4628_v7  ;;  %v17318_v61 = vmul.f32 %v4628_v7, %v2665_v47  ;;  %v17338_v33 = vmul.f32 %v2667_v26, %v2667_v26 }
 0x4ec   : > { %v17320_v23 = vmul.f32 %v10571_v9, %v4627_v42  ;;  %v12657_v18 = vpop.f32.mrb[14].mxu0  ;;  %v17324_v8 = vmul.f32 %v4627_v42, %v4627_v42  ;;  %v17326_v38 = vmul.f32 %v4627_v42, %v2664_v15  ;;  %v17346_v9 = vmul.f32 %v2666_v32, %v2666_v32 }
 0x4ed   : > { %18502 = vst [vmem:[#allocation65_spill] sm:$0xff] %v17312_v16  ;;  %18504 = vst [vmem:[#allocation43_spill] sm:$0xff] %v17316_v27  ;;  %v4630_v21 = vmul.f32 0.020408163, %v12657_v18  ;;  %v4617_v31 = vpop.f32.mrb[15].mxu0  ;;  %v17330_v3 = vadd.f32 %v17316_v27, %v17314_v11 }
 0x4ee   : > { %18505 = vst [vmem:[#allocation44_spill] sm:$0xff] %v17318_v61  ;;  %18506 = vst [vmem:[#allocation45_spill] sm:$0xff] %v17320_v23  ;;  %v4629_v1 = vmul.f32 0.020408163, %v4617_v31  ;;  %v17334_v47 = vadd.f32 %v17324_v8, %v17322_v60 }
 0x4ef   : > { %18508 = vst [vmem:[#allocation47_spill] sm:$0xff] %v17324_v8  ;;  %18509 = vst [vmem:[#allocation51_spill] sm:$0xff] %v17326_v38  ;;  %v17336_v37 = vmul.f32 %v10574_v25, %v4630_v21  ;;  %v17340_v7 = vmul.f32 %v4630_v21, %v4630_v21  ;;  %v17342_v15 = vmul.f32 %v4630_v21, %v2667_v26 }
 0x4f0   : > { %18510 = vst [vmem:[#allocation55_spill] sm:$0xff] %v17330_v3  ;;  %18511 = vst [vmem:[#allocation58_spill] sm:$0xff] %v17334_v47  ;;  %v17344_v55 = vmul.f32 %v10573_v20, %v4629_v1  ;;  %v17348_v42 = vmul.f32 %v4629_v1, %v4629_v1  ;;  %v17350_v18 = vmul.f32 %v4629_v1, %v2666_v32 }
 0x4f1   : > { %18512 = vst [vmem:[#allocation57_spill] sm:$0xff] %v17336_v37  ;;  %18513 = vst [vmem:[#allocation53_spill] sm:$0xff] %v17338_v33  ;;  %v17354_v31 = vadd.f32 %v17340_v7, %v17338_v33 }
 0x4f2   : > { %18514 = vst [vmem:[#allocation28_spill] sm:$0xff] %v17340_v7  ;;  %18515 = vst [vmem:[#allocation29_spill] sm:$0xff] %v17342_v15  ;;  %v17358_v25 = vadd.f32 %v17348_v42, %v17346_v9 }
 0x4f3   : > { %18516 = vst [vmem:[#allocation30_spill] sm:$0xff] %v17344_v55  ;;  %18517 = vst [vmem:[#allocation71_spill] sm:$0xff] %v17346_v9 }
 0x4f4   : > { %18518 = vst [vmem:[#allocation72_spill] sm:$0xff] %v17348_v42  ;;  %18519 = vst [vmem:[#allocation73_spill] sm:$0xff] %v17350_v18 }
 0x4f5   : > { %18520 = vst [vmem:[#allocation74_spill] sm:$0xff] %v17354_v31  ;;  %18521 = vst [vmem:[#allocation81_spill] sm:$0xff] %v17358_v25 }
 0x4fc   : > { %v12673_v37 = vpop.f32.mrb[18].mxu0 }
 0x4fd   : > { %v14946_v26 = vadd.f32 %v17227_v34, %v12673_v37  ;;  %v4826_v21 = vpop.f32.mrb[19].mxu0 }
 0x4fe   : > { %v14947_v20 = vadd.f32 %v17230_v56, %v4826_v21 }
 0x4ff   : > { %v17364_v15 = vand.u32 4294901760, %v14946_v26 }
 0x500   : > { %v17362_v55 = vand.u32 4294901760, %v14947_v20  ;;  %v12678_v23 = vpop.f32.mrb[16].mxu0 }
 0x501   : > { %v14944_v32 = vadd.f32 %v17220_v24, %v12678_v23  ;;  %v4906_v1 = vpop.f32.mrb[17].mxu0  ;;  %v17376_v34 = vsub.f32 %v14946_v26, %v17364_v15 }
 0x502   : > { %v17368_v18 = vsub.f32 %v14947_v20, %v17362_v55  ;;  %v14945_v16 = vadd.f32 %v17223_v6, %v4906_v1 }
 0x503   : > { %v17371_v38 = vand.u32 4294901760, %v14944_v32  ;;  %v18281_v20 = vand.u32 4294901760, %v17376_v34 }
 0x504   : > { %v17373_v61 = vand.u32 4294901760, %v14945_v16  ;;  %v18282_v24 = vand.u32 4294901760, %v17368_v18 }
 0x505   : > { %v17379_v56 = vsub.f32 %v14944_v32, %v17371_v38 }
 0x506   : > { %v5907_v37 = vsub.f32 %v14945_v16, %v17373_v61  ;;  %v5929_v26 = vsub.f32 %v17368_v18, %v18282_v24  ;;  %v5939_v16 = vsub.f32 %v17376_v34, %v18281_v20 }
 0x507   : > { %v18280_v23 = vand.u32 4294901760, %v17379_v56 }
 0x508   : > { %v5908_v21 = vand.u32 4294901760, %v5907_v37  ;;  %v5930_v31 = vand.u32 4294901760, %v5929_v26  ;;  %v18527_v26 = vld [vmem:[#allocation68_spill] sm:$0xff] }
 0x509   : > { %v5919_v6 = vsub.f32 %v17379_v56, %v18280_v23  ;;  %v5940_v23 = vand.u32 4294901760, %v5939_v16  ;;  %v18529_v16 = vld [vmem:[#allocation70_spill] sm:$0xff] }
 0x50a   : > { %v5909_v1 = vsub.f32 %v5907_v37, %v5908_v21 }
 0x50b   : > { %v5920_v25 = vand.u32 4294901760, %v5919_v6  ;;  %v18525_v6 = vld [vmem:[#allocation66_spill] sm:$0xff] }
 0x50c   : > { %v5910_v32 = vand.u32 4294901760, %v5909_v1  ;;  %v18526_v1 = vld [vmem:[#allocation67_spill] sm:$0xff] }
 0x50e   : > { %12822 = vmatprep.mubr.f32.mxu1 %v5910_v32  ;;  %v18528_v32 = vld [vmem:[#allocation69_spill] sm:$0xff] }
 0x50f   : > { %12823 = vmatmul.mubr.f32.vlgmr.msra.gmra.mrb[8].mxu1 %v5920_v25  ;;  %v18523_v25 = vld [vmem:[#allocation60_spill] sm:$0xff] }
 0x510   : > { %14301 = vmatpush3.bf16.msra.mxu1 %v18462_v35  ;;  %12825 = vmatprep.mubr.f32.mxu1 %v5930_v31  ;;  %v18522_v31 = vld [vmem:[#allocation59_spill] sm:$0xff] }
 0x511   : > { %14303 = vmatprep.subr.bf16.mxu1 %v18466_v13 }
 0x513   : > { %12826 = vmatmul.mubr.f32.gmra.mrb[10].mxu1 %v5940_v23  ;;  %v18524_v23 = vld [vmem:[#allocation63_spill] sm:$0xff] }
 0x514   : > { %14305 = vmatpush3.bf16.msra.mxu1 %v18466_v13  ;;  %12860 = vmatprep.mubr.f32.mxu1 %v17373_v61 }
 0x515   : > { %14307 = vmatprep.subr.bf16.mxu1 %v18467_v50 }
 0x518   : > { %14309 = vmatpush3.bf16.msra.mxu1 %v18467_v50 }
 0x519   : > { %14311 = vmatprep.subr.bf16.mxu1 %v18468_v41 }
 0x51c   : > { %14313 = vmatpush3.bf16.msra.mxu1 %v18468_v41 }
 0x51d   : > { %14315 = vmatprep.subr.bf16.mxu1 %v18469_v53 }
 0x520   : > { %14317 = vmatpush3.bf16.msra.mxu1 %v18469_v53 }
 0x521   : > { %14319 = vmatprep.subr.bf16.mxu1 %v18470_v2 }
 0x524   : > { %14321 = vmatpush3.bf16.msra.mxu1 %v18470_v2 }
 0x525   : > { %14323 = vmatprep.subr.bf16.mxu1 %v18471_v30 }
 0x528   : > { %14325 = vmatpush3.bf16.msra.mxu1 %v18471_v30 }
 0x529   : > { %14327 = vmatprep.subr.bf16.mxu1 %v18522_v31 }
 0x52c   : > { %14329 = vmatpush3.bf16.msra.mxu1 %v18522_v31 }
 0x52d   : > { %14331 = vmatprep.subr.bf16.mxu1 %v18523_v25 }
 0x52f   : > { %12861 = vmatmul.mubr.f32.vlgmr.msra.gmra.mrb[8].mxu1 %v17371_v38 }
 0x530   : > { %12863 = vmatprep.mubr.f32.mxu1 %v17362_v55  ;;  %14333 = vmatpush3.bf16.msra.mxu1 %v18523_v25 }
 0x531   : > { %14335 = vmatprep.subr.bf16.mxu1 %v18524_v23 }
 0x533   : > { %12864 = vmatmul.mubr.f32.gmra.mrb[10].mxu1 %v17364_v15 }
 0x534   : > { %14337 = vmatpush3.bf16.msra.mxu1 %v18524_v23  ;;  %12898 = vmatprep.mubr.f32.mxu1 %v5907_v37  ;;  %v18530_v37 = vld [vmem:[#allocation61_spill] sm:$0xff] }
 0x535   : > { %14339 = vmatprep.subr.bf16.mxu1 %v18525_v6 }
 0x538   : > { %14341 = vmatpush3.bf16.msra.mxu1 %v18525_v6 }
 0x539   : > { %14343 = vmatprep.subr.bf16.mxu1 %v18526_v1 }
 0x53c   : > { %14345 = vmatpush3.bf16.msra.mxu1 %v18526_v1 }
 0x53d   : > { %14347 = vmatprep.subr.bf16.mxu1 %v18527_v26 }
 0x540   : > { %14349 = vmatpush3.bf16.msra.mxu1 %v18527_v26 }
 0x541   : > { %14351 = vmatprep.subr.bf16.mxu1 %v18528_v32 }
 0x544   : > { %14353 = vmatpush3.bf16.msra.mxu1 %v18528_v32 }
 0x545   : > { %14355 = vmatprep.subr.bf16.mxu1 %v18529_v16 }
 0x548   : > { %14357 = vmatpush3.bf16.msra.mxu1 %v18529_v16 }
 0x549   : > { %14359 = vmatprep.subr.bf16.mxu1 %v18530_v37 }
 0x54c   : > { %14361 = vmatpush3.bf16.msra.mxu1 %v18530_v37 }
 0x54d   : > { %14363 = vmatprep.subr.bf16.mxu1 %v16257_v58 }
 0x54f   : > { %12899 = vmatmul.mubr.f32.vlgmr.msra.gmra.mrb[8].mxu1 %v17379_v56 }
 0x550   : > { %12901 = vmatprep.mubr.f32.mxu1 %v17368_v18  ;;  %14365 = vmatpush3.bf16.msra.mxu1 %v16257_v58 }
 0x551   : > { %14367 = vmatprep.subr.bf16.mxu1 %v16268_v5 }
 0x553   : > { %12902 = vmatmul.mubr.f32.gmra.mrb[10].mxu1 %v17376_v34 }
 0x554   : > { %14369 = vmatpush3.bf16.msra.mxu1 %v16268_v5  ;;  %12936 = vmatprep.mubr.f32.mxu1 %v5908_v21 }
 0x555   : > { %14371 = vmatprep.subr.bf16.mxu1 %v16277_v12 }
 0x558   : > { %14373 = vmatpush3.bf16.msra.mxu1 %v16277_v12 }
 0x559   : > { %14375 = vmatprep.subr.bf16.mxu1 %v16302_v52 }
 0x55c   : > { %14377 = vmatpush3.bf16.msra.mxu1 %v16302_v52  ;;  %v13146_v20 = vpop.f32.mrb[20].mxu0 }
 0x55d   : > { %v17440_v24 = vand.u32 4294901760, %v13146_v20  ;;  %v7771_v42 = vpop.f32.mrb[21].mxu0  ;;  %14379 = vmatprep.subr.bf16.mxu1 %v16327_v43 }
 0x55e   : > { %v17443_v47 = vand.u32 4294901760, %v7771_v42 }
 0x55f   : > { %v17446_v7 = vsub.f32 %v13146_v20, %v17440_v24 }
 0x560   : > { %v17449_v21 = vsub.f32 %v7771_v42, %v17443_v47  ;;  %14381 = vmatpush3.bf16.msra.mxu1 %v16327_v43  ;;  %v13149_v3 = vpop.f32.mrb[22].mxu0 }
 0x561   : > { %v18295_v8 = vand.u32 4294901760, %v17446_v7  ;;  %14383 = vmatprep.subr.bf16.mxu1 %v16343_v49  ;;  %v17454_v27 = vand.u32 4294901760, %v13149_v3  ;;  %v7783_v9 = vpop.f32.mrb[23].mxu0 }
 0x562   : > { %v18298_v33 = vand.u32 4294901760, %v17449_v21  ;;  %v17457_v60 = vand.u32 4294901760, %v7783_v9 }
 0x563   : > { %v7887_v20 = vsub.f32 %v17446_v7, %v18295_v8  ;;  %v17463_v42 = vsub.f32 %v13149_v3, %v17454_v27 }
 0x564   : > { %14385 = vmatpush3.bf16.msra.mxu1 %v16343_v49  ;;  %v7877_v11 = vsub.f32 %v17449_v21, %v18298_v33  ;;  %v17470_v45 = vsub.f32 %v7783_v9, %v17457_v60 }
 0x565   : > { %v7888_v36 = vand.u32 4294901760, %v7887_v20  ;;  %14387 = vmatprep.subr.bf16.mxu1 %v16374_v46  ;;  %v18296_v17 = vand.u32 4294901760, %v17463_v42 }
 0x566   : > { %v7878_v22 = vand.u32 4294901760, %v7877_v11  ;;  %v18297_v8 = vand.u32 4294901760, %v17470_v45 }
 0x567   : > { %v7907_v3 = vsub.f32 %v17463_v42, %v18296_v17  ;;  %v18531_v17 = vld [vmem:[#allocation75_spill] sm:$0xff] }
 0x568   : > { %14389 = vmatpush3.bf16.msra.mxu1 %v16374_v46  ;;  %13182 = vmatprep.mubr.f32.mxu0 %v7878_v22  ;;  %v7897_v9 = vsub.f32 %v17470_v45, %v18297_v8  ;;  %v18532_v22 = vand.u32 4294901760, %v17379_v56  ;;  %v18536_v56 = vld [vmem:[#allocation77_spill] sm:$0xff] }
 0x569   : > { %13183 = vmatmul.mubr.f32.vlgmr.msra.gmra.mrb[24].mxu0 %v7888_v36  ;;  %14391 = vmatprep.subr.bf16.mxu1 %v16583_v40  ;;  %v7908_v20 = vand.u32 4294901760, %v7907_v3  ;;  %v18533_v36 = vand.u32 4294901760, %v17368_v18  ;;  %v18534_v3 = vld [vmem:[#allocation76_spill] sm:$0xff]  ;;  %v18537_v18 = vld [vmem:[#allocation78_spill] sm:$0xff] }
 0x56a   : > { %14541 = vmatpush3.bf16.msra.mxu0 %v18462_v35  ;;  %v7898_v11 = vand.u32 4294901760, %v7897_v9  ;;  %v18535_v9 = vand.u32 4294901760, %v17376_v34  ;;  %v18538_v34 = vld [vmem:[#allocation79_spill] sm:$0xff] }
 0x56b   : > { %14543 = vmatprep.subr.bf16.mxu0 %v18466_v13 }
 0x56c   : > { %14393 = vmatpush3.bf16.msra.mxu1 %v16583_v40  ;;  %13185 = vmatprep.mubr.f32.mxu0 %v7898_v11  ;;  %v18540_v11 = vld [vmem:[#allocation48_spill] sm:$0xff] }
 0x56d   : > { %14395 = vmatprep.subr.bf16.mxu1 %v18531_v17  ;;  %13186 = vmatmul.mubr.f32.gmra.mrb[26].mxu0 %v7908_v20  ;;  %v18539_v20 = vld [vmem:[#allocation80_spill] sm:$0xff] }
 0x56e   : > { %14545 = vmatpush3.bf16.msra.mxu0 %v18466_v13  ;;  %13220 = vmatprep.mubr.f32.mxu0 %v17443_v47 }
 0x56f   : > { %12937 = vmatmul.mubr.f32.vlgmr.msra.gmra.mrb[8].mxu1 %v18532_v22  ;;  %14547 = vmatprep.subr.bf16.mxu0 %v18467_v50  ;;  %v18541_v22 = vld [vmem:[#allocation50_spill] sm:$0xff] }
 0x570   : > { %12939 = vmatprep.mubr.f32.mxu1 %v18533_v36  ;;  %14397 = vmatpush3.bf16.msra.mxu1 %v18531_v17  ;;  %v15396_v36 = vld [vmem:[%s16132_s6] sm:$0xff]  ;;  %s18607_s6 = sld [smem:[#allocation27_spill]] }
 0x571   : > { %14399 = vmatprep.subr.bf16.mxu1 %v18534_v3 }
 0x572   : > { %14549 = vmatpush3.bf16.msra.mxu0 %v18467_v50 }
 0x573   : > { %12940 = vmatmul.mubr.f32.gmra.mrb[10].mxu1 %v18535_v9  ;;  %14551 = vmatprep.subr.bf16.mxu0 %v18468_v41  ;;  %v18542_v9 = vld [vmem:[#allocation62_spill] sm:$0xff] }
 0x574   : > { %14401 = vmatpush3.bf16.msra.mxu1 %v18534_v3  ;;  %12974 = vmatprep.mubr.f32.mxu1 %v17373_v61  ;;  %v8571_v8 = vmul.f32 %v15396_v36, %v18542_v9 }
 0x575   : > { %14403 = vmatprep.subr.bf16.mxu1 %v18536_v56 }
 0x576   : > { %14553 = vmatpush3.bf16.msra.mxu0 %v18468_v41  ;;  %p18609_p7 = scmp.ne.s32.totalorder %s18607_s6, 0 }
 0x577   : > { %14555 = vmatprep.subr.bf16.mxu0 %v18469_v53 }
 0x578   : > { %14405 = vmatpush3.bf16.msra.mxu1 %v18536_v56  ;;  %p15570_p3 = pnand %p15569_p4, %p18609_p7 }
 0x579   : > { %14407 = vmatprep.subr.bf16.mxu1 %v18537_v18 }
 0x57a   : > { %14557 = vmatpush3.bf16.msra.mxu0 %v18469_v53  ;;  %p15571_p0 = pneg %p15570_p3 }
 0x57b   : > { %14559 = vmatprep.subr.bf16.mxu0 %v18470_v2 }
 0x57c   : > { %14409 = vmatpush3.bf16.msra.mxu1 %v18537_v18 }
 0x57d   : > { %14411 = vmatprep.subr.bf16.mxu1 %v18538_v34 }
 0x57e   : > { %14561 = vmatpush3.bf16.msra.mxu0 %v18470_v2 }
 0x57f   : > { %14563 = vmatprep.subr.bf16.mxu0 %v18471_v30 }
 0x580   : > { %14413 = vmatpush3.bf16.msra.mxu1 %v18538_v34 }
 0x581   : > { %14415 = vmatprep.subr.bf16.mxu1 %v18539_v20 }
 0x582   : > { %14565 = vmatpush3.bf16.msra.mxu0 %v18471_v30 }
 0x583   : > { %14567 = vmatprep.subr.bf16.mxu0 %v18522_v31 }
 0x584   : > { %14417 = vmatpush3.bf16.msra.mxu1 %v18539_v20 }
 0x585   : > { %14419 = vmatprep.subr.bf16.mxu1 %v18540_v11 }
 0x586   : > { %14569 = vmatpush3.bf16.msra.mxu0 %v18522_v31 }
 0x587   : > { %14571 = vmatprep.subr.bf16.mxu0 %v18523_v25 }
 0x588   : > { %14421 = vmatpush3.bf16.msra.mxu1 %v18540_v11 }
 0x589   : > { %13221 = vmatmul.mubr.f32.vlgmr.msra.gmra.mrb[24].mxu0 %v17440_v24  ;;  %14423 = vmatprep.subr.bf16.mxu1 %v18541_v22 }
 0x58a   : > { %14573 = vmatpush3.bf16.msra.mxu0 %v18523_v25  ;;  %13223 = vmatprep.mubr.f32.mxu0 %v17457_v60 }
 0x58b   : > { %14575 = vmatprep.subr.bf16.mxu0 %v18524_v23 }
 0x58c   : > { %14425 = vmatpush3.bf16.msra.mxu1 %v18541_v22 }
 0x58d   : > { %14427 = vmatprep.subr.bf16.mxu1 %v16257_v58  ;;  %13224 = vmatmul.mubr.f32.gmra.mrb[26].mxu0 %v17454_v27 }
 0x58e   : > { %14577 = vmatpush3.bf16.msra.mxu0 %v18524_v23  ;;  %13258 = vmatprep.mubr.f32.mxu0 %v17449_v21 }
 0x58f   : > { %12975 = vmatmul.mubr.f32.vlgmr.msra.gmra.mrb[8].mxu1 %v17371_v38  ;;  %14579 = vmatprep.subr.bf16.mxu0 %v18525_v6 }
 0x590   : > { %12977 = vmatprep.mubr.f32.mxu1 %v17362_v55  ;;  %14429 = vmatpush3.bf16.msra.mxu1 %v16257_v58 }
 0x591   : > { %14431 = vmatprep.subr.bf16.mxu1 %v16268_v5 }
 0x592   : > { %14581 = vmatpush3.bf16.msra.mxu0 %v18525_v6 }
 0x593   : > { %12978 = vmatmul.mubr.f32.gmra.mrb[10].mxu1 %v17364_v15  ;;  %14583 = vmatprep.subr.bf16.mxu0 %v18526_v1 }
 0x594   : > { %14433 = vmatpush3.bf16.msra.mxu1 %v16268_v5  ;;  %13012 = vmatprep.mubr.f32.mxu1 %v17373_v61  ;;  %v17553_v61 = vand.u32 4294901760, %v8571_v8 }
 0x595   : > { %14435 = vmatprep.subr.bf16.mxu1 %v16277_v12 }
 0x596   : > { %14585 = vmatpush3.bf16.msra.mxu0 %v18526_v1  ;;  %v8680_v36 = vsub.f32 %v8571_v8, %v17553_v61 }
 0x597   : > { %14587 = vmatprep.subr.bf16.mxu0 %v18527_v26 }
 0x598   : > { %14437 = vmatpush3.bf16.msra.mxu1 %v16277_v12  ;;  %v17564_v9 = vand.u32 4294901760, %v8680_v36 }
 0x599   : > { %14439 = vmatprep.subr.bf16.mxu1 %v16302_v52 }
 0x59a   : > { %14589 = vmatpush3.bf16.msra.mxu0 %v18527_v26  ;;  %v8682_v8 = vsub.f32 %v8680_v36, %v17564_v9 }
 0x59b   : > { %14591 = vmatprep.subr.bf16.mxu0 %v18528_v32 }
 0x59c   : > { %14441 = vmatpush3.bf16.msra.mxu1 %v16302_v52  ;;  %v8683_v33 = vand.u32 4294901760, %v8682_v8  ;;  %v18544_v8 = vld [vmem:[#allocation39_spill] sm:$0xff] }
 0x59d   : > { %14443 = vmatprep.subr.bf16.mxu1 %v16327_v43 }
 0x59e   : > { %14593 = vmatpush3.bf16.msra.mxu0 %v18528_v32  ;;  %v17640_v32 = vld [vmem:[%s16122_s17 + $0x10] sm:$0xff] }
 0x59f   : > { %14595 = vmatprep.subr.bf16.mxu0 %v18529_v16  ;;  %18560 = vst [vmem:[#allocation68_spill] sm:$0xff] %v17640_v32 }
 0x5a0   : > { %14445 = vmatpush3.bf16.msra.mxu1 %v16327_v43 }
 0x5a1   : > { %14447 = vmatprep.subr.bf16.mxu1 %v16343_v49 }
 0x5a2   : > { %14597 = vmatpush3.bf16.msra.mxu0 %v18529_v16 }
 0x5a3   : > { %14599 = vmatprep.subr.bf16.mxu0 %v18530_v37 }
 0x5a4   : > { %14449 = vmatpush3.bf16.msra.mxu1 %v16343_v49 }
 0x5a5   : > { %14451 = vmatprep.subr.bf16.mxu1 %v16374_v46 }
 0x5a6   : > { %14601 = vmatpush3.bf16.msra.mxu0 %v18530_v37  ;;  %v18543_v37 = vand.u32 4294901760, %v17449_v21  ;;  %v18550_v21 = vld [vmem:[#allocation33_spill] sm:$0xff] }
 0x5a7   : > { %14603 = vmatprep.subr.bf16.mxu0 %v16257_v58 }
 0x5a8   : > { %14453 = vmatpush3.bf16.msra.mxu1 %v16374_v46 }
 0x5a9   : > { %13259 = vmatmul.mubr.f32.vlgmr.msra.gmra.mrb[24].mxu0 %v17446_v7  ;;  %14455 = vmatprep.subr.bf16.mxu1 %v16583_v40 }
 0x5aa   : > { %14605 = vmatpush3.bf16.msra.mxu0 %v16257_v58  ;;  %13261 = vmatprep.mubr.f32.mxu0 %v17470_v45 }
 0x5ab   : > { %14607 = vmatprep.subr.bf16.mxu0 %v16268_v5 }
 0x5ac   : > { %14457 = vmatpush3.bf16.msra.mxu1 %v16583_v40 }
 0x5ad   : > { %13378 = vmatprep.subr.mxu1 %v17553_v61  ;;  %13262 = vmatmul.mubr.f32.gmra.mrb[26].mxu0 %v17463_v42 }
 0x5ae   : > { %14609 = vmatpush3.bf16.msra.mxu0 %v16268_v5  ;;  %13296 = vmatprep.mubr.f32.mxu0 %v18543_v37  ;;  %v18545_v37 = vld [vmem:[#allocation40_spill] sm:$0xff] }
 0x5af   : > { %13013 = vmatmul.mubr.f32.vlgmr.msra.gmra.mrb[8].mxu1 %v17371_v38  ;;  %14611 = vmatprep.subr.bf16.mxu0 %v16277_v12  ;;  %v18546_v38 = vld [vmem:[#allocation41_spill] sm:$0xff] }
 0x5b0   : > { %13015 = vmatprep.mubr.f32.mxu1 %v17362_v55  ;;  %13379 = vmatpush3.msra.mxu1 %v17553_v61  ;;  %v18547_v55 = vld [vmem:[#allocation42_spill] sm:$0xff] }
 0x5b1   : > { %13386 = vmatprep.subr.mxu1 %v8683_v33 }
 0x5b2   : > { %14613 = vmatpush3.bf16.msra.mxu0 %v16277_v12 }
 0x5b3   : > { %13016 = vmatmul.mubr.f32.gmra.mrb[10].mxu1 %v17364_v15  ;;  %14615 = vmatprep.subr.bf16.mxu0 %v16302_v52  ;;  %v18549_v15 = vld [vmem:[#allocation32_spill] sm:$0xff] }
 0x5b4   : > { %13380 = vmatprep.mubr.f32.mxu1 %v18544_v8  ;;  %v17615_v8 = vld [vmem:[%s16115_s29] sm:$0xff] }
 0x5b5   : > { %18552 = vst [vmem:[#allocation59_spill] sm:$0xff] %v17615_v8 }
 0x5b6   : > { %14617 = vmatpush3.bf16.msra.mxu0 %v16302_v52 }
 0x5b7   : > { %13381 = vmatmul.mubr.f32.vlgmr.msra.gmra.mrb[12].mxu1 %v18545_v37  ;;  %14619 = vmatprep.subr.bf16.mxu0 %v16327_v43  ;;  %v17618_v37 = vld [vmem:[%s16122_s17] sm:$0xff] }
 0x5b8   : > { %13387 = vmatpush3.msra.mxu1 %v8683_v33  ;;  %13383 = vmatprep.mubr.f32.mxu1 %v18546_v38  ;;  %v18548_v33 = vld [vmem:[#allocation31_spill] sm:$0xff]  ;;  %18553 = vst [vmem:[#allocation60_spill] sm:$0xff] %v17618_v37  ;;  %v8567_v38 = vmul.f32 %v17618_v37, %v17615_v8  ;;  %v17637_v37 = vld [vmem:[%s16115_s29 + $0x10] sm:$0xff] }
 0x5b9   : > { %13394 = vmatprep.subr.mxu1 %v8680_v36  ;;  %18559 = vst [vmem:[#allocation67_spill] sm:$0xff] %v17637_v37 }
 0x5ba   : > { %14621 = vmatpush3.bf16.msra.mxu0 %v16327_v43  ;;  %v9148_v16 = vand.u32 4294901760, %v8567_v38 }
 0x5bb   : > { %13384 = vmatmul.mubr.f32.gmra.mrb[14].mxu1 %v18547_v55  ;;  %14623 = vmatprep.subr.bf16.mxu0 %v16343_v49  ;;  %v17623_v55 = vld [vmem:[%s16115_s29 + $0x8] sm:$0xff] }
 0x5bc   : > { %13388 = vmatprep.mubr.f32.mxu1 %v18487_v51  ;;  %18554 = vst [vmem:[#allocation63_spill] sm:$0xff] %v17623_v55 }
 0x5be   : > { %14625 = vmatpush3.bf16.msra.mxu0 %v16343_v49 }
 0x5bf   : > { %13389 = vmatmul.mubr.f32.vlgmr.msra.gmra.mrb[12].mxu1 %v18488_v59  ;;  %14627 = vmatprep.subr.bf16.mxu0 %v16374_v46 }
 0x5c0   : > { %13395 = vmatpush3.msra.mxu1 %v8680_v36  ;;  %13391 = vmatprep.mubr.f32.mxu1 %v18489_v0  ;;  %v18551_v36 = vand.u32 4294901760, %v17446_v7 }
 0x5c1   : > { %13402 = vmatprep.subr.mxu1 %v17553_v61 }
 0x5c2   : > { %14629 = vmatpush3.bf16.msra.mxu0 %v16374_v46 }
 0x5c3   : > { %13392 = vmatmul.mubr.f32.gmra.mrb[14].mxu1 %v16170_v14  ;;  %14631 = vmatprep.subr.bf16.mxu0 %v16583_v40 }
 0x5c4   : > { %13396 = vmatprep.mubr.f32.mxu1 %v18548_v33  ;;  %v17626_v33 = vld [vmem:[%s16122_s17 + $0x8] sm:$0xff] }
 0x5c5   : > { %18555 = vst [vmem:[#allocation66_spill] sm:$0xff] %v17626_v33  ;;  %v8568_v7 = vmul.f32 %v17626_v33, %v17623_v55  ;;  %v8569_v55 = vmul.f32 %v17640_v32, %v17637_v37  ;;  %v17645_v33 = vld [vmem:[%s16115_s29 + $0x18] sm:$0xff]  ;;  %s623_s29 = sld [smem:[#allocation2]] }
 0x5c6   : > { %14633 = vmatpush3.bf16.msra.mxu0 %v16583_v40  ;;  %18561 = vst [vmem:[#allocation76_spill] sm:$0xff] %v17645_v33 }
 0x5c7   : > { %13397 = vmatmul.mubr.f32.vlgmr.msra.gmra.mrb[12].mxu1 %v18549_v15  ;;  %14635 = vmatprep.subr.bf16.mxu0 %v18531_v17  ;;  %v18556_v15 = vand.u32 4294901760, %v17470_v45  ;;  %v9151_v8 = vand.u32 4294901760, %v8568_v7  ;;  %v9154_v37 = vand.u32 4294901760, %v8569_v55 }
 0x5c8   : > { %13403 = vmatpush3.msra.mxu1 %v17553_v61  ;;  %13399 = vmatprep.mubr.f32.mxu1 %v18550_v21  ;;  %v18557_v21 = vld [vmem:[#allocation34_spill] sm:$0xff] }
 0x5c9   : > { %13297 = vmatmul.mubr.f32.vlgmr.msra.gmra.mrb[24].mxu0 %v18551_v36  ;;  %13410 = vmatprep.subr.mxu1 %v17564_v9  ;;  %v18558_v36 = vld [vmem:[#allocation35_spill] sm:$0xff] }
 0x5ca   : > { %14637 = vmatpush3.bf16.msra.mxu0 %v18531_v17  ;;  %13299 = vmatprep.mubr.f32.mxu0 %v18556_v15  ;;  %v17648_v17 = vld [vmem:[%s16122_s17 + $0x18] sm:$0xff]  ;;  %v18563_v15 = vand.u32 4294901760, %v17463_v42  ;;  %v17663_v42 = vsub.f32 %v8568_v7, %v9151_v8  ;;  %s10936_s17 = sld [smem:[#allocation2 + $0x1]] }
 0x5cb   : > { %13400 = vmatmul.mubr.f32.gmra.mrb[14].mxu1 %v18557_v21  ;;  %14639 = vmatprep.subr.bf16.mxu0 %v18534_v3  ;;  %18562 = vst [vmem:[#allocation77_spill] sm:$0xff] %v17648_v17  ;;  %v8570_v45 = vmul.f32 %v17648_v17, %v17645_v33  ;;  %v18564_v21 = vld [vmem:[#allocation36_spill] sm:$0xff]  ;;  %v17661_v33 = vsub.f32 %v8567_v38, %v9148_v16 }
 0x5cc   : > { %13404 = vmatprep.mubr.f32.mxu1 %v18558_v36  ;;  %v18565_v36 = vld [vmem:[#allocation37_spill] sm:$0xff]  ;;  %v17673_v17 = vsub.f32 %v8569_v55, %v9154_v37 }
 0x5cd   : > { %13300 = vmatmul.mubr.f32.gmra.mrb[26].mxu0 %v18563_v15  ;;  %v9157_v32 = vand.u32 4294901760, %v8570_v45  ;;  %v18566_v15 = vld [vmem:[#allocation38_spill] sm:$0xff] }
 0x5ce   : > { %14641 = vmatpush3.bf16.msra.mxu0 %v18534_v3  ;;  %13334 = vmatprep.mubr.f32.mxu0 %v17443_v47  ;;  %v9273_v55 = vand.u32 4294901760, %v17673_v17 }
 0x5cf   : > { %13405 = vmatmul.mubr.f32.vlgmr.msra.gmra.mrb[12].mxu1 %v18564_v21  ;;  %14643 = vmatprep.subr.bf16.mxu0 %v18536_v56  ;;  %v17669_v21 = vpack.c.bf16 %v9151_v8, %v9148_v16  ;;  %v17675_v38 = vsub.f32 %v8570_v45, %v9157_v32 }
 0x5d0   : > { %13411 = vmatpush3.msra.mxu1 %v17564_v9  ;;  %13407 = vmatprep.mubr.f32.mxu1 %v18565_v36  ;;  %v18312_v9 = vand.u32 4294901760, %v17661_v33  ;;  %v18311_v36 = vand.u32 4294901760, %v17663_v42 }
 0x5d1   : > { %13418 = vmatprep.subr.mxu1 %v17553_v61  ;;  %v9280_v7 = vand.u32 4294901760, %v17675_v38 }
 0x5d2   : > { %14645 = vmatpush3.bf16.msra.mxu0 %v18536_v56  ;;  %v9260_v16 = vsub.f32 %v17661_v33, %v18312_v9  ;;  %v9267_v8 = vsub.f32 %v17663_v42, %v18311_v36  ;;  %v9274_v36 = vsub.f32 %v17673_v17, %v9273_v55 }
 0x5d3   : > { %13408 = vmatmul.mubr.f32.gmra.mrb[14].mxu1 %v18566_v15  ;;  %14647 = vmatprep.subr.bf16.mxu0 %v18537_v18  ;;  %v9281_v9 = vsub.f32 %v17675_v38, %v9280_v7 }
 0x5d4   : > { %13412 = vmatprep.mubr.f32.mxu1 %v18487_v51  ;;  %v9261_v45 = vand.u32 4294901760, %v9260_v16  ;;  %v9268_v15 = vand.u32 4294901760, %v9267_v8 }
 0x5d6   : > { %14649 = vmatpush3.bf16.msra.mxu0 %v18537_v18 }
 0x5d7   : > { %13413 = vmatmul.mubr.f32.vlgmr.msra.gmra.mrb[12].mxu1 %v18488_v59  ;;  %14651 = vmatprep.subr.bf16.mxu0 %v18538_v34 }
 0x5d8   : > { %13419 = vmatpush3.msra.mxu1 %v17553_v61  ;;  %13415 = vmatprep.mubr.f32.mxu1 %v18489_v0  ;;  %v17695_v61 = vpack.c.bf16 %v9157_v32, %v9154_v37  ;;  %v9275_v32 = vand.u32 4294901760, %v9274_v36  ;;  %v9282_v37 = vand.u32 4294901760, %v9281_v9  ;;  %v18575_v9 = vld [vmem:[#allocation53_spill] sm:$0xff] }
 0x5d9   : > { %14699 = vmatprep.subr.bf16.mxu1 %v17669_v21 }
 0x5da   : > { %14653 = vmatpush3.bf16.msra.mxu0 %v18538_v34 }
 0x5db   : > { %13416 = vmatmul.mubr.f32.gmra.mrb[14].mxu1 %v16170_v14  ;;  %14655 = vmatprep.subr.bf16.mxu0 %v18539_v20 }
 0x5dc   : > { %13420 = vmatprep.mubr.f32.mxu1 %v18487_v51  ;;  %v14706_v51 = vpack.c.bf16 %v9268_v15, %v9261_v45  ;;  %v18577_v45 = vld [vmem:[#allocation43_spill] sm:$0xff] }
 0x5de   : > { %14657 = vmatpush3.bf16.msra.mxu0 %v18539_v20 }
 0x5df   : > { %13421 = vmatmul.mubr.f32.vlgmr.msra.gmra.mrb[12].mxu1 %v18488_v59  ;;  %14659 = vmatprep.subr.bf16.mxu0 %v18540_v11  ;;  %v14710_v59 = vpack.c.bf16 %v9282_v37, %v9275_v32  ;;  %v18578_v37 = vld [vmem:[#allocation47_spill] sm:$0xff] }
 0x5e0   : > { %14701 = vmatpush3.bf16.msra.mxu1 %v17669_v21  ;;  %13423 = vmatprep.mubr.f32.mxu1 %v18489_v0  ;;  %v18572_v0 = vld [vmem:[#allocation56_spill] sm:$0xff] }
 0x5e1   : > { %14703 = vmatprep.subr.bf16.mxu1 %v17695_v61 }
 0x5e2   : > { %14661 = vmatpush3.bf16.msra.mxu0 %v18540_v11 }
 0x5e3   : > { %13424 = vmatmul.mubr.f32.gmra.mrb[14].mxu1 %v16170_v14  ;;  %14663 = vmatprep.subr.bf16.mxu0 %v18541_v22  ;;  %v14714_v14 = vpack.c.bf16 %v17663_v42, %v17661_v33 }
 0x5e4   : > { %14705 = vmatpush3.bf16.msra.mxu1 %v17695_v61  ;;  %13434 = vmatprep.mubr.f32.mxu1 %v16487_v57  ;;  %v18567_v57 = vand.u32 4294901760, %v17661_v33 }
 0x5e5   : > { %14707 = vmatprep.subr.bf16.mxu1 %v14706_v51 }
 0x5e6   : > { %14665 = vmatpush3.bf16.msra.mxu0 %v18541_v22 }
 0x5e7   : > { %13435 = vmatmul.mubr.f32.vlgmr.msra.gmra.mrb[12].mxu1 %v16494_v19  ;;  %14667 = vmatprep.subr.bf16.mxu0 %v16257_v58  ;;  %v14718_v19 = vpack.c.bf16 %v17675_v38, %v17673_v17  ;;  %v18573_v17 = vld [vmem:[#allocation64_spill] sm:$0xff]  ;;  %v18576_v38 = vld [vmem:[#allocation71_spill] sm:$0xff] }
 0x5e8   : > { %14709 = vmatpush3.bf16.msra.mxu1 %v14706_v51  ;;  %13437 = vmatprep.mubr.f32.mxu1 %v16501_v10  ;;  %v18568_v10 = vand.u32 4294901760, %v17663_v42 }
 0x5e9   : > { %13335 = vmatmul.mubr.f32.vlgmr.msra.gmra.mrb[24].mxu0 %v17440_v24  ;;  %14711 = vmatprep.subr.bf16.mxu1 %v14710_v59 }
 0x5ea   : > { %14669 = vmatpush3.bf16.msra.mxu0 %v16257_v58  ;;  %13337 = vmatprep.mubr.f32.mxu0 %v17457_v60 }
 0x5eb   : > { %13438 = vmatmul.mubr.f32.gmra.mrb[14].mxu1 %v16504_v29  ;;  %14671 = vmatprep.subr.bf16.mxu0 %v16268_v5  ;;  %v14730_v29 = vpack.c.bf16 %v18568_v10, %v18567_v57 }
 0x5ec   : > { %14713 = vmatpush3.bf16.msra.mxu1 %v14710_v59  ;;  %13448 = vmatprep.mubr.f32.mxu1 %v16249_v54 }
 0x5ed   : > { %14715 = vmatprep.subr.bf16.mxu1 %v14714_v14  ;;  %13338 = vmatmul.mubr.f32.gmra.mrb[26].mxu0 %v17454_v27 }
 0x5ee   : > { %14673 = vmatpush3.bf16.msra.mxu0 %v16268_v5  ;;  %13372 = vmatprep.mubr.f32.mxu0 %v17443_v47 }
 0x5ef   : > { %13449 = vmatmul.mubr.f32.vlgmr.msra.gmra.mrb[12].mxu1 %v16390_v28  ;;  %14675 = vmatprep.subr.bf16.mxu0 %v16277_v12 }
 0x5f0   : > { %14717 = vmatpush3.bf16.msra.mxu1 %v14714_v14  ;;  %13451 = vmatprep.mubr.f32.mxu1 %v16400_v44 }
 0x5f1   : > { %14719 = vmatprep.subr.bf16.mxu1 %v14718_v19 }
 0x5f2   : > { %14677 = vmatpush3.bf16.msra.mxu0 %v16277_v12 }
 0x5f3   : > { %13452 = vmatmul.mubr.f32.gmra.mrb[14].mxu1 %v16429_v63  ;;  %14679 = vmatprep.subr.bf16.mxu0 %v16302_v52 }
 0x5f4   : > { %14721 = vmatpush3.bf16.msra.mxu1 %v14718_v19  ;;  %13462 = vmatprep.mubr.f32.mxu1 %v16387_v39  ;;  %v18569_v39 = vld [vmem:[#allocation49_spill] sm:$0xff] }
 0x5f5   : > { %14723 = vmatprep.subr.bf16.mxu1 %v17669_v21 }
 0x5f6   : > { %14681 = vmatpush3.bf16.msra.mxu0 %v16302_v52 }
 0x5f7   : > { %13463 = vmatmul.mubr.f32.vlgmr.msra.gmra.mrb[12].mxu1 %v18440_v4  ;;  %14683 = vmatprep.subr.bf16.mxu0 %v16327_v43  ;;  %v14734_v4 = vpack.c.bf16 %v9280_v7, %v9273_v55 }
 0x5f8   : > { %14725 = vmatpush3.bf16.msra.mxu1 %v17669_v21  ;;  %13465 = vmatprep.mubr.f32.mxu1 %v18444_v48  ;;  %v18570_v48 = vld [vmem:[#allocation52_spill] sm:$0xff] }
 0x5f9   : > { %14727 = vmatprep.subr.bf16.mxu1 %v17695_v61 }
 0x5fa   : > { %14685 = vmatpush3.bf16.msra.mxu0 %v16327_v43 }
 0x5fb   : > { %13466 = vmatmul.mubr.f32.gmra.mrb[14].mxu1 %v18447_v62  ;;  %14687 = vmatprep.subr.bf16.mxu0 %v16343_v49  ;;  %v18571_v62 = vld [vmem:[#allocation54_spill] sm:$0xff] }
 0x5fc   : > { %14729 = vmatpush3.bf16.msra.mxu1 %v17695_v61  ;;  %13476 = vmatprep.mubr.f32.mxu1 %v18569_v39  ;;  %v17806_v39 = vstv %s10936_s17 }
 0x5fd   : > { %14731 = vmatprep.subr.bf16.mxu1 %v14730_v29 }
 0x5fe   : > { %14689 = vmatpush3.bf16.msra.mxu0 %v16343_v49 }
 0x5ff   : > { %13477 = vmatmul.mubr.f32.vlgmr.msra.gmra.mrb[12].mxu1 %v18570_v48  ;;  %14691 = vmatprep.subr.bf16.mxu0 %v16374_v46 }
 0x600   : > { %14733 = vmatpush3.bf16.msra.mxu1 %v14730_v29  ;;  %13479 = vmatprep.mubr.f32.mxu1 %v18571_v62  ;;  %v17804_v29 = vstv %s623_s29  ;;  %s15572_s29 = sshll.u32 %s15720_s19, 4  ;;  %s15573_s29 = int_to_ptr.vmem [resolvable:$false] %s15572_s29 }
 0x601   : > { %14735 = vmatprep.subr.bf16.mxu1 %v14734_v4  ;;  %s15574_s17 = scalar_lea.vmem %s15573_s29, 256  ;;  %p15575_p11 = scmp.lt.s32.totalorder %s10687_s5, %s15573_s29 }
 0x602   : > { %14693 = vmatpush3.bf16.msra.mxu0 %v16374_v46  ;;  %p15576_p10 = scmp.lt.s32.totalorder %s15574_s17, %s15568_s12 }
 0x603   : > { %13480 = vmatmul.mubr.f32.gmra.mrb[14].mxu1 %v18572_v0  ;;  %14695 = vmatprep.subr.bf16.mxu0 %v16583_v40  ;;  %v18579_v0 = vld [vmem:[#allocation55_spill] sm:$0xff] }
 0x604   : > { %14737 = vmatpush3.bf16.msra.mxu1 %v14734_v4  ;;  %13490 = vmatprep.mubr.f32.mxu1 %v16249_v54  ;;  %p15577_p2 = por %p15576_p10, %p15575_p11 }
 0x605   : > { %14739 = vmatprep.subr.bf16.mxu1 %v17669_v21 }
 0x606   : > { %14697 = vmatpush3.bf16.msra.mxu0 %v16583_v40  ;;  %p15578_p1 = pnand %p15577_p2, %p15571_p0 }
 0x607   : > { %13491 = vmatmul.mubr.f32.vlgmr.msra.gmra.mrb[12].mxu1 %v16390_v28 }
 0x608   : > { %14741 = vmatpush3.bf16.msra.mxu1 %v17669_v21  ;;  %13493 = vmatprep.mubr.f32.mxu1 %v16400_v44 }
 0x609   : > { %13373 = vmatmul.mubr.f32.vlgmr.msra.gmra.mrb[24].mxu0 %v17440_v24  ;;  %14743 = vmatprep.subr.bf16.mxu1 %v17695_v61 }
 0x60a   : > { %13375 = vmatprep.mubr.f32.mxu0 %v17457_v60  ;;  %v18574_v60 = vld [vmem:[#allocation46_spill] sm:$0xff] }
 0x60b   : > { %13494 = vmatmul.mubr.f32.gmra.mrb[14].mxu1 %v16429_v63 }
 0x60c   : > { %14745 = vmatpush3.bf16.msra.mxu1 %v17695_v61  ;;  %13504 = vmatprep.mubr.f32.mxu1 %v16249_v54 }
 0x60d   : > { %13376 = vmatmul.mubr.f32.gmra.mrb[26].mxu0 %v17454_v27  ;;  %14747 = vmatprep.subr.bf16.mxu1 %v16257_v58 }
 0x60f   : > { %13505 = vmatmul.mubr.f32.vlgmr.msra.gmra.mrb[12].mxu1 %v16390_v28 }
 0x610   : > { %13507 = vmatprep.mubr.f32.mxu1 %v16400_v44  ;;  %14749 = vmatpush3.bf16.msra.mxu1 %v16257_v58 }
 0x611   : > { %14751 = vmatprep.subr.bf16.mxu1 %v16268_v5 }
 0x613   : > { %13508 = vmatmul.mubr.f32.gmra.mrb[14].mxu1 %v16429_v63 }
 0x614   : > { %14753 = vmatpush3.bf16.msra.mxu1 %v16268_v5 }
 0x615   : > { %14755 = vmatprep.subr.bf16.mxu1 %v16277_v12 }
 0x618   : > { %14757 = vmatpush3.bf16.msra.mxu1 %v16277_v12 }
 0x619   : > { %14759 = vmatprep.subr.bf16.mxu1 %v16302_v52 }
 0x61c   : > { %14761 = vmatpush3.bf16.msra.mxu1 %v16302_v52 }
 0x61d   : > { %14763 = vmatprep.subr.bf16.mxu1 %v16327_v43 }
 0x620   : > { %14765 = vmatpush3.bf16.msra.mxu1 %v16327_v43 }
 0x621   : > { %14767 = vmatprep.subr.bf16.mxu1 %v16343_v49 }
 0x624   : > { %14769 = vmatpush3.bf16.msra.mxu1 %v16343_v49 }
 0x625   : > { %14771 = vmatprep.subr.bf16.mxu1 %v16374_v46 }
 0x628   : > { %14773 = vmatpush3.bf16.msra.mxu1 %v16374_v46 }
 0x629   : > { %14775 = vmatprep.subr.bf16.mxu1 %v16583_v40 }
 0x62c   : > { %14777 = vmatpush3.bf16.msra.mxu1 %v16583_v40 }
 0x62d   : > { %14779 = vmatprep.subr.bf16.mxu1 %v18462_v35 }
 0x682   : > { %v13014_v54 = vpop.f32.mrb[8].mxu1 }
 0x683   : > { %v6596_v28 = vmul.f32 0.020408163, %v13014_v54  ;;  %v6573_v44 = vpop.f32.mrb[9].mxu1  ;;  %v10602_v54 = vadd.f32 %v18579_v0, %v17804_v29 }
 0x684   : > { %v6595_v63 = vmul.f32 0.020408163, %v6573_v44  ;;  %v18580_v44 = vld [vmem:[#allocation28_spill] sm:$0xff] }
 0x685   : > { %v10540_v27 = vsub.f32 %v6596_v28, %v18573_v17 }
 0x686   : > { %v10539_v47 = vsub.f32 %v6595_v63, %v18574_v60  ;;  %v13017_v24 = vpop.f32.mrb[10].mxu1  ;;  %v18581_v60 = vld [vmem:[#allocation58_spill] sm:$0xff] }
 0x687   : > { %v6598_v33 = vmul.f32 0.020408163, %v13017_v24  ;;  %v6585_v42 = vpop.f32.mrb[11].mxu1  ;;  %v10544_v51 = vmul.f32 1.0208334, %v10540_v27 }
 0x688   : > { %v6597_v21 = vmul.f32 0.020408163, %v6585_v42  ;;  %v10543_v32 = vmul.f32 1.0208334, %v10539_v47  ;;  %v10601_v47 = vadd.f32 %v18581_v60, %v17804_v29 }
 0x689   : > { %v10542_v36 = vsub.f32 %v6598_v33, %v18575_v9  ;;  %v18582_v33 = vld [vmem:[#allocation72_spill] sm:$0xff] }
 0x68a   : > { %v10541_v16 = vsub.f32 %v6597_v21, %v18576_v38 }
 0x68b   : > { %v10546_v9 = vmul.f32 1.0208334, %v10542_v36 }
 0x6dc   : > { %v13374_v8 = vpop.f32.mrb[24].mxu0 }
 0x6dd   : > { %v8564_v55 = vmul.f32 0.020408163, %v13374_v8  ;;  %v8541_v7 = vpop.f32.mrb[25].mxu0 }
 0x6de   : > { %v8563_v61 = vmul.f32 0.020408163, %v8541_v7  ;;  %v10545_v7 = vmul.f32 1.0208334, %v10541_v16 }
 0x6df   : > { %v10552_v15 = vsub.f32 %v8564_v55, %v18577_v45 }
 0x6e0   : > { %v10551_v59 = vsub.f32 %v8563_v61, %v18578_v37  ;;  %v13377_v14 = vpop.f32.mrb[26].mxu0 }
 0x6e1   : > { %v10556_v19 = vmul.f32 1.0208334, %v10552_v15  ;;  %v8566_v57 = vmul.f32 0.020408163, %v13377_v14  ;;  %v8553_v10 = vpop.f32.mrb[27].mxu0 }
 0x6e2   : > { %v10555_v4 = vmul.f32 1.0208334, %v10551_v59  ;;  %v8565_v48 = vmul.f32 0.020408163, %v8553_v10  ;;  %v13506_v62 = vpop.f32.mrb[12].mxu1 }
 0x6e3   : > { %v10606_v28 = vadd.f32 %v10556_v19, %v10544_v51  ;;  %v10554_v63 = vsub.f32 %v8566_v57, %v18580_v44  ;;  %v17811_v17 = vand.u32 4294901760, %v13506_v62  ;;  %v9739_v27 = vpop.f32.mrb[13].mxu1 }
 0x6e4   : > { %v10605_v24 = vadd.f32 %v10555_v4, %v10543_v32  ;;  %v10553_v42 = vsub.f32 %v8565_v48, %v18582_v33  ;;  %v17816_v21 = vand.u32 4294901760, %v9739_v27  ;;  %v18583_v4 = vld [vmem:[#allocation74_spill] sm:$0xff] }
 0x6e5   : > { %v10610_v38 = vadd.f32 %v10606_v28, %v17806_v39  ;;  %v10558_v8 = vmul.f32 1.0208334, %v10554_v63  ;;  %v17820_v55 = vsub.f32 %v13506_v62, %v17811_v17  ;;  %v10604_v48 = vadd.f32 %v18583_v4, %v17804_v29  ;;  %v18584_v28 = vld [vmem:[#allocation81_spill] sm:$0xff] }
 0x6e6   : > { %v10609_v61 = vadd.f32 %v10605_v24, %v17806_v39  ;;  %v10557_v45 = vmul.f32 1.0208334, %v10553_v42  ;;  %v17824_v15 = vsub.f32 %v9739_v27, %v17816_v21  ;;  %v13509_v51 = vpop.f32.mrb[14].mxu1  ;;  %v10603_v44 = vadd.f32 %v18584_v28, %v17804_v29 }
 0x6e7   : > { %v17826_v32 = vmul.f32 %v10610_v38, %v10602_v54  ;;  %v10608_v37 = vadd.f32 %v10558_v8, %v10546_v9  ;;  %v9854_v59 = vand.u32 4294901760, %v17820_v55  ;;  %v17829_v36 = vand.u32 4294901760, %v13509_v51  ;;  %v9751_v14 = vpop.f32.mrb[15].mxu1 }
 0x6e8   : > { %v17831_v19 = vmul.f32 %v10609_v61, %v10601_v47  ;;  %v10607_v57 = vadd.f32 %v10557_v45, %v10545_v7  ;;  %v9844_v16 = vand.u32 4294901760, %v17824_v15  ;;  %v17834_v10 = vand.u32 4294901760, %v9751_v14 }
 0x6e9   : > { %v10612_v62 = vadd.f32 %v10608_v37, %v17806_v39  ;;  %v9855_v0 = vsub.f32 %v17820_v55, %v9854_v59  ;;  %v17843_v54 = vsub.f32 %v13509_v51, %v17829_v36  ;;  %15382 = vrcp.f32 %v17826_v32  ;;  %v18598_v37 = vld [vmem:[#allocation51_spill] sm:$0xff] }
 0x6ea   : > { %v10611_v63 = vadd.f32 %v10607_v57, %v17806_v39  ;;  %v17849_v27 = vsub.f32 %v9751_v14, %v17834_v10  ;;  %v9845_v60 = vsub.f32 %v17824_v15, %v9844_v16  ;;  %15384 = vrcp.f32 %v17831_v19 }
 0x6eb   : > { %v17854_v47 = vmul.f32 %v10612_v62, %v10604_v48  ;;  %v9874_v24 = vand.u32 4294901760, %v17843_v54  ;;  %v9856_v38 = vand.u32 4294901760, %v9855_v0 }
 0x6ec   : > { %v17857_v33 = vmul.f32 %v10611_v63, %v10603_v44  ;;  %v9864_v42 = vand.u32 4294901760, %v17849_v27  ;;  %v9846_v9 = vand.u32 4294901760, %v9845_v60  ;;  %v18600_v44 = vld [vmem:[#allocation29_spill] sm:$0xff] }
 0x6ed   : > { %v9875_v8 = vsub.f32 %v17843_v54, %v9874_v24  ;;  %15386 = vrcp.f32 %v17854_v47 }
 0x6ee   : > { %13542 = vmatprep.mubr.f32.mxu1 %v9846_v9  ;;  %v9865_v7 = vsub.f32 %v17849_v27, %v9864_v42  ;;  %15388 = vrcp.f32 %v17857_v33 }
 0x6ef   : > { %13543 = vmatmul.mubr.f32.vlgmr.msra.gmra.mrb[16].mxu1 %v9856_v38  ;;  %v9876_v45 = vand.u32 4294901760, %v9875_v8 }
 0x6f0   : > { %14781 = vmatpush3.bf16.msra.mxu1 %v18462_v35  ;;  %v9866_v61 = vand.u32 4294901760, %v9865_v7  ;;  %v18585_v35 = vld [vmem:[#allocation69_spill] sm:$0xff] }
 0x6f1   : > { %14783 = vmatprep.subr.bf16.mxu1 %v18466_v13 }
 0x6f2   : > { %13545 = vmatprep.mubr.f32.mxu1 %v9866_v61 }
 0x6f3   : > { %13546 = vmatmul.mubr.f32.gmra.mrb[18].mxu1 %v9876_v45 }
 0x6f4   : > { %14785 = vmatpush3.bf16.msra.mxu1 %v18466_v13  ;;  %13580 = vmatprep.mubr.f32.mxu1 %v17816_v21  ;;  %v18586_v13 = vld [vmem:[#allocation70_spill] sm:$0xff] }
 0x6f5   : > { %14787 = vmatprep.subr.bf16.mxu1 %v18467_v50 }
 0x6f8   : > { %14789 = vmatpush3.bf16.msra.mxu1 %v18467_v50  ;;  %v18587_v50 = vld [vmem:[#allocation61_spill] sm:$0xff] }
 0x6f9   : > { %14791 = vmatprep.subr.bf16.mxu1 %v18468_v41 }
 0x6fc   : > { %14793 = vmatpush3.bf16.msra.mxu1 %v18468_v41  ;;  %v18588_v41 = vld [vmem:[#allocation75_spill] sm:$0xff] }
 0x6fd   : > { %14795 = vmatprep.subr.bf16.mxu1 %v18469_v53 }
 0x700   : > { %14797 = vmatpush3.bf16.msra.mxu1 %v18469_v53  ;;  %v18593_v53 = vld [vmem:[#allocation68_spill] sm:$0xff] }
 0x701   : > { %14799 = vmatprep.subr.bf16.mxu1 %v18470_v2 }
 0x704   : > { %14801 = vmatpush3.bf16.msra.mxu1 %v18470_v2  ;;  %v18594_v2 = vld [vmem:[#allocation67_spill] sm:$0xff] }
 0x705   : > { %14803 = vmatprep.subr.bf16.mxu1 %v18471_v30 }
 0x708   : > { %14805 = vmatpush3.bf16.msra.mxu1 %v18471_v30 }
 0x709   : > { %14807 = vmatprep.subr.bf16.mxu1 %v18522_v31 }
 0x70c   : > { %14809 = vmatpush3.bf16.msra.mxu1 %v18522_v31 }
 0x70d   : > { %14811 = vmatprep.subr.bf16.mxu1 %v18523_v25 }
 0x70f   : > { %13581 = vmatmul.mubr.f32.vlgmr.msra.gmra.mrb[16].mxu1 %v17811_v17 }
 0x710   : > { %13583 = vmatprep.mubr.f32.mxu1 %v17834_v10  ;;  %14813 = vmatpush3.bf16.msra.mxu1 %v18523_v25  ;;  %v18595_v25 = vld [vmem:[#allocation77_spill] sm:$0xff] }
 0x711   : > { %14815 = vmatprep.subr.bf16.mxu1 %v18524_v23 }
 0x713   : > { %13584 = vmatmul.mubr.f32.gmra.mrb[18].mxu1 %v17829_v36 }
 0x714   : > { %14817 = vmatpush3.bf16.msra.mxu1 %v18524_v23  ;;  %13618 = vmatprep.mubr.f32.mxu1 %v17824_v15  ;;  %v18597_v15 = vld [vmem:[#allocation44_spill] sm:$0xff] }
 0x715   : > { %14819 = vmatprep.subr.bf16.mxu1 %v18525_v6 }
 0x718   : > { %14821 = vmatpush3.bf16.msra.mxu1 %v18525_v6 }
 0x719   : > { %14823 = vmatprep.subr.bf16.mxu1 %v18526_v1 }
 0x71c   : > { %14825 = vmatpush3.bf16.msra.mxu1 %v18526_v1 }
 0x71d   : > { %14827 = vmatprep.subr.bf16.mxu1 %v18527_v26 }
 0x720   : > { %14829 = vmatpush3.bf16.msra.mxu1 %v18527_v26 }
 0x721   : > { %14831 = vmatprep.subr.bf16.mxu1 %v18585_v35 }
 0x724   : > { %14833 = vmatpush3.bf16.msra.mxu1 %v18585_v35 }
 0x725   : > { %14835 = vmatprep.subr.bf16.mxu1 %v18586_v13 }
 0x728   : > { %14837 = vmatpush3.bf16.msra.mxu1 %v18586_v13  ;;  %v15383_v13 = vpop.eup %15382 }
 0x729   : > { %14839 = vmatprep.subr.bf16.mxu1 %v18587_v50 }
 0x72c   : > { %14841 = vmatpush3.bf16.msra.mxu1 %v18587_v50 }
 0x72d   : > { %14843 = vmatprep.subr.bf16.mxu1 %v16257_v58 }
 0x72f   : > { %13619 = vmatmul.mubr.f32.vlgmr.msra.gmra.mrb[16].mxu1 %v17820_v55  ;;  %v10633_v55 = vstv %s10937_s30 }
 0x730   : > { %13621 = vmatprep.mubr.f32.mxu1 %v17849_v27  ;;  %14845 = vmatpush3.bf16.msra.mxu1 %v16257_v58  ;;  %v18601_v27 = vld [vmem:[#allocation45_spill] sm:$0xff] }
 0x731   : > { %14847 = vmatprep.subr.bf16.mxu1 %v16268_v5  ;;  %v10580_v60 = vadd.f32 %v17804_v29, %v18601_v27 }
 0x733   : > { %13622 = vmatmul.mubr.f32.gmra.mrb[18].mxu1 %v17843_v54  ;;  %v18599_v54 = vld [vmem:[#allocation65_spill] sm:$0xff] }
 0x734   : > { %14849 = vmatpush3.bf16.msra.mxu1 %v16268_v5  ;;  %13656 = vmatprep.mubr.f32.mxu1 %v9844_v16  ;;  %v10581_v28 = vadd.f32 %v17804_v29, %v18599_v54 }
 0x735   : > { %14851 = vmatprep.subr.bf16.mxu1 %v16277_v12 }
 0x738   : > { %14853 = vmatpush3.bf16.msra.mxu1 %v16277_v12 }
 0x739   : > { %14855 = vmatprep.subr.bf16.mxu1 %v16302_v52 }
 0x73c   : > { %14857 = vmatpush3.bf16.msra.mxu1 %v16302_v52 }
 0x73d   : > { %14859 = vmatprep.subr.bf16.mxu1 %v16327_v43 }
 0x740   : > { %14861 = vmatpush3.bf16.msra.mxu1 %v16327_v43 }
 0x741   : > { %14863 = vmatprep.subr.bf16.mxu1 %v16343_v49 }
 0x744   : > { %14865 = vmatpush3.bf16.msra.mxu1 %v16343_v49 }
 0x745   : > { %14867 = vmatprep.subr.bf16.mxu1 %v16374_v46 }
 0x748   : > { %14869 = vmatpush3.bf16.msra.mxu1 %v16374_v46 }
 0x749   : > { %14871 = vmatprep.subr.bf16.mxu1 %v16583_v40 }
 0x74c   : > { %14873 = vmatpush3.bf16.msra.mxu1 %v16583_v40 }
 0x74d   : > { %14875 = vmatprep.subr.bf16.mxu1 %v18588_v41 }
 0x74f   : > { %13657 = vmatmul.mubr.f32.vlgmr.msra.gmra.mrb[16].mxu1 %v9854_v59 }
 0x750   : > { %13659 = vmatprep.mubr.f32.mxu1 %v9864_v42  ;;  %14877 = vmatpush3.bf16.msra.mxu1 %v18588_v41 }
 0x751   : > { %14879 = vmatprep.subr.bf16.mxu1 %v18534_v3 }
 0x753   : > { %13660 = vmatmul.mubr.f32.gmra.mrb[18].mxu1 %v9874_v24  ;;  %v18602_v24 = vld [vmem:[#allocation73_spill] sm:$0xff] }
 0x754   : > { %14881 = vmatpush3.bf16.msra.mxu1 %v18534_v3  ;;  %13694 = vmatprep.mubr.f32.mxu1 %v17816_v21 }
 0x755   : > { %14883 = vmatprep.subr.bf16.mxu1 %v18536_v56 }
 0x758   : > { %14885 = vmatpush3.bf16.msra.mxu1 %v18536_v56 }
 0x759   : > { %14887 = vmatprep.subr.bf16.mxu1 %v18537_v18 }
 0x75c   : > { %14889 = vmatpush3.bf16.msra.mxu1 %v18537_v18  ;;  %v10625_v18 = vlaneseq }
 0x75d   : > { %14891 = vmatprep.subr.bf16.mxu1 %v18538_v34 }
 0x760   : > { %14893 = vmatpush3.bf16.msra.mxu1 %v18538_v34  ;;  %v10626_v34 = vshrl.u32 %v10625_v18, 7 }
 0x761   : > { %14895 = vmatprep.subr.bf16.mxu1 %v18539_v20 }
 0x762   : > { %v10628_v0 = vadd.s32 16, %v10626_v34  ;;  %v10634_v32 = vadd.s32 %v10633_v55, %v10626_v34  ;;  %v10629_v9 = vadd.s32 24, %v10626_v34 }
 0x764   : > { %14897 = vmatpush3.bf16.msra.mxu1 %v18539_v20  ;;  %v10636_v45 = vadd.s32 %v10633_v55, %v10628_v0  ;;  %vm10638_vm4 = vcmp.le.s32.totalorder %v10634_v32, 89 }
 0x765   : > { %14899 = vmatprep.subr.bf16.mxu1 %v18540_v11 }
 0x766   : > { %vm10640_vm7 = vcmp.le.s32.totalorder %v10636_v45, 89 }
 0x768   : > { %14901 = vmatpush3.bf16.msra.mxu1 %v18540_v11 }
 0x769   : > { %14903 = vmatprep.subr.bf16.mxu1 %v18541_v22 }
 0x76c   : > { %14905 = vmatpush3.bf16.msra.mxu1 %v18541_v22 }
 0x76d   : > { %14907 = vmatprep.subr.bf16.mxu1 %v16257_v58 }
 0x76f   : > { %13695 = vmatmul.mubr.f32.vlgmr.msra.gmra.mrb[16].mxu1 %v17811_v17 }
 0x770   : > { %13697 = vmatprep.mubr.f32.mxu1 %v17834_v10  ;;  %14909 = vmatpush3.bf16.msra.mxu1 %v16257_v58  ;;  %v18589_v58 = vld [vmem:[#allocation60_spill] sm:$0xff] }
 0x771   : > { %14911 = vmatprep.subr.bf16.mxu1 %v16268_v5 }
 0x773   : > { %13698 = vmatmul.mubr.f32.gmra.mrb[18].mxu1 %v17829_v36 }
 0x774   : > { %14913 = vmatpush3.bf16.msra.mxu1 %v16268_v5  ;;  %13732 = vmatprep.mubr.f32.mxu1 %v17816_v21  ;;  %v18590_v5 = vld [vmem:[#allocation59_spill] sm:$0xff] }
 0x775   : > { %14915 = vmatprep.subr.bf16.mxu1 %v16277_v12 }
 0x778   : > { %14917 = vmatpush3.bf16.msra.mxu1 %v16277_v12  ;;  %v635_v12 = vsub.f32 %v18590_v5, %v18589_v58  ;;  %v10637_v58 = vadd.s32 %v10633_v55, %v10629_v9 }
 0x779   : > { %14919 = vmatprep.subr.bf16.mxu1 %v16302_v52 }
 0x77a   : > { %v639_v30 = vmul.f32 %v635_v12, %v635_v12  ;;  %v15385_v12 = vpop.eup %15384  ;;  %vm10641_vm8 = vcmp.le.s32.totalorder %v10637_v58, 89 }
 0x77c   : > { %14921 = vmatpush3.bf16.msra.mxu1 %v16302_v52 }
 0x77d   : > { %14923 = vmatprep.subr.bf16.mxu1 %v16327_v43 }
 0x780   : > { %14925 = vmatpush3.bf16.msra.mxu1 %v16327_v43  ;;  %v18591_v43 = vld [vmem:[#allocation66_spill] sm:$0xff] }
 0x781   : > { %14927 = vmatprep.subr.bf16.mxu1 %v16343_v49 }
 0x784   : > { %14929 = vmatpush3.bf16.msra.mxu1 %v16343_v49  ;;  %v18592_v49 = vld [vmem:[#allocation63_spill] sm:$0xff] }
 0x785   : > { %14931 = vmatprep.subr.bf16.mxu1 %v16374_v46  ;;  %v636_v52 = vsub.f32 %v18592_v49, %v18591_v43  ;;  %v18605_v43 = vld [vmem:[#allocation57_spill] sm:$0xff] }
 0x786   : > { %v10583_v49 = vadd.f32 %v17804_v29, %v18605_v43 }
 0x787   : > { %v640_v31 = vmul.f32 %v636_v52, %v636_v52 }
 0x788   : > { %14933 = vmatpush3.bf16.msra.mxu1 %v16374_v46  ;;  %v637_v46 = vsub.f32 %v18594_v2, %v18593_v53  ;;  %v15387_v2 = vpop.eup %15386 }
 0x789   : > { %14935 = vmatprep.subr.bf16.mxu1 %v16583_v40  ;;  %v643_v1 = vadd.f32 %v640_v31, %v639_v30 }
 0x78a   : > { %v641_v6 = vmul.f32 %v637_v46, %v637_v46  ;;  %v18606_v46 = vld [vmem:[#allocation30_spill] sm:$0xff] }
 0x78b   : > { %v10582_v30 = vadd.f32 %v17804_v29, %v18606_v46 }
 0x78c   : > { %14937 = vmatpush3.bf16.msra.mxu1 %v16583_v40  ;;  %v18596_v40 = vld [vmem:[#allocation76_spill] sm:$0xff]  ;;  %v644_v3 = vadd.f32 %v643_v1, %v641_v6 }
 0x78d   : > { %v638_v23 = vsub.f32 %v18596_v40, %v18595_v25 }
 0x78f   : > { %13733 = vmatmul.mubr.f32.vlgmr.msra.gmra.mrb[16].mxu1 %v17811_v17  ;;  %v642_v26 = vmul.f32 %v638_v23, %v638_v23  ;;  %v10627_v17 = vadd.s32 8, %v10626_v34 }
 0x790   : > { %13735 = vmatprep.mubr.f32.mxu1 %v17834_v10  ;;  %v10631_v10 = vand.u32 127, %v10625_v18 }
 0x791   : > { %v645_v56 = vadd.f32 %v644_v3, %v642_v26  ;;  %v10635_v4 = vadd.s32 %v10633_v55, %v10627_v17  ;;  %v15389_v26 = vpop.eup %15388 }
 0x792   : > { %vm10642_vm3 = vcmp.le.s32.totalorder %v10631_v10, 121 }
 0x793   : > { %13736 = vmatmul.mubr.f32.gmra.mrb[18].mxu1 %v17829_v36  ;;  %646 = vadd.xlane.f32.xlu0 %v645_v56  ;;  %vm10639_vm2 = vcmp.le.s32.totalorder %v10635_v4, 89  ;;  %vm10643_vm6 = vmand %vm10638_vm4, %vm10642_vm3 }
 0x794   : > { %vm17993_vm5 = vmand %vm10639_vm2, %vm10642_vm3 }
 0x795   : > { %vm10645_vm9 = vmand %vm10640_vm7, %vm10642_vm3 }
 0x796   : > { %vm10646_vm10 = vmand %vm10641_vm8, %vm10642_vm3 }
 0x862   : > { %v13734_v20 = vpop.f32.mrb[16].mxu1 }
 0x863   : > { %v10532_v11 = vmul.f32 0.020408163, %v13734_v20  ;;  %v10509_v22 = vpop.f32.mrb[17].mxu1 }
 0x864   : > { %v10531_v21 = vmul.f32 0.020408163, %v10509_v22 }
 0x865   : > { %v10564_v51 = vsub.f32 %v10532_v11, %v18597_v15  ;;  %v647_v11 = vpop.xlane.xlu0 %646 }
 0x866   : > { %v10563_v59 = vsub.f32 %v10531_v21, %v18598_v37  ;;  %v13737_v36 = vpop.f32.mrb[18].mxu1  ;;  %v648_v22 = vrot.slane %v647_v11, 4 }
 0x867   : > { %v10568_v14 = vmul.f32 1.0208334, %v10564_v51  ;;  %v10534_v57 = vmul.f32 0.020408163, %v13737_v36  ;;  %v10521_v16 = vpop.f32.mrb[19].mxu1 }
 0x868   : > { %v10567_v48 = vmul.f32 1.0208334, %v10563_v59  ;;  %v10533_v62 = vmul.f32 0.020408163, %v10521_v16  ;;  %v649_v17 = vadd.f32 %v648_v22, %v647_v11 }
 0x869   : > { %v10585_v19 = vmul.f32 2.0, %v10568_v14  ;;  %v10566_v63 = vsub.f32 %v10534_v57, %v18600_v44 }
 0x86a   : > { %v10584_v47 = vmul.f32 2.0, %v10567_v48  ;;  %v10565_v42 = vsub.f32 %v10533_v62, %v18602_v24  ;;  %v650_v21 = vrot.slane %v649_v17, 2 }
 0x86b   : > { %v10590_v38 = vadd.f32 %v17806_v39, %v10585_v19  ;;  %v10570_v8 = vmul.f32 1.0208334, %v10566_v63 }
 0x86c   : > { %v10589_v7 = vadd.f32 %v17806_v39, %v10584_v47  ;;  %v10569_v61 = vmul.f32 1.0208334, %v10565_v42  ;;  %v651_v55 = vadd.f32 %v650_v21, %v649_v17 }
 0x86d   : > { %v10594_v33 = vmul.f32 %v10590_v38, %v10581_v28  ;;  %v10587_v35 = vmul.f32 2.0, %v10570_v8 }
 0x86e   : > { %v10593_v50 = vmul.f32 %v10589_v7, %v10580_v60  ;;  %v10586_v41 = vmul.f32 2.0, %v10569_v61  ;;  %v652_v15 = vrot.slane %v651_v55, 1 }
 0x86f   : > { %v10592_v52 = vadd.f32 %v17806_v39, %v10587_v35  ;;  %v10622_v53 = vmul.f32 %v15383_v13, %v10594_v33 }
 0x870   : > { %v10591_v31 = vadd.f32 %v17806_v39, %v10586_v41  ;;  %v10621_v25 = vmul.f32 %v15385_v12, %v10593_v50  ;;  %v653_v51 = vadd.f32 %v652_v15, %v651_v55 }
 0x871   : > { %v10596_v40 = vmul.f32 %v10592_v52, %v10583_v49  ;;  %v10648_v23 = vsel %vm17993_vm5, %v10622_v53, 0.0 }
 0x872   : > { %v10595_v6 = vmul.f32 %v10591_v31, %v10582_v30  ;;  %v10647_v1 = vsel %vm10643_vm6, %v10621_v25, 0.0  ;;  %15260 = vpush %v653_v51 }
 0x873   : > { %v10624_v3 = vmul.f32 %v15387_v2, %v10596_v40  ;;  %v10651_v56 = vadd.f32 %v10648_v23, %v10647_v1 }
 0x874   : > { %v10623_v18 = vmul.f32 %v15389_v26, %v10595_v6 }
 0x875   : > { %v10650_v34 = vsel %vm10646_vm10, %v10624_v3, 0.0 }
 0x876   : > { %v10649_v29 = vsel %vm10645_vm9, %v10623_v18, 0.0 }
 0x877   : > { %v10652_v39 = vadd.f32 %v10651_v56, %v10649_v29 }
 0x879   : > { %v10653_v20 = vadd.f32 %v10652_v39, %v10650_v34 }
 0x87b   : > { %10654 = vadd.xlane.f32.xlu0 %v10653_v20 }
 0x8a3   : > { %s15261_s26 = spop %15260 }
 0x8a4   : > { %v10663_v37 = vstv %s15261_s26 }
 0x8a5   : > { %10664 = vst [vmem:[%s583_s7] sm:$0xff] %v10663_v37 }
 0x8a6   : > { %15581 = shalt.err (!%p15578_p1)
}
 0x8a7   : > { %s15582_s30 = scalar_lea.hbm %s18017_s20, 128  ;;  %s15586_s22 = scalar_lea.hbm %s18608_s18, 384 }
 0x8a8   : > { %p15583_p6 = scmp.ne.s32.totalorder %s18017_s20, %s15582_s30  ;;  %p15587_p8 = scmp.lt.u32.totalorder %s18017_s20, %s18608_s18 }
 0x8a9   : > { %p15588_p9 = scmp.lt.u32.totalorder %s15586_s22, %s15582_s30  ;;  %p15590_p4 = scmp.lt.u32.totalorder %s15582_s30, %s18017_s20 }
 0x8aa   : > { %p15584_p5 = pnand %p15583_p6, %p18609_p7 }
 0x8ab   : > { %p15589_p12 = por %p15588_p9, %p15587_p8 }
 0x8ac   : > { %p15585_p13 = pneg %p15584_p5 }
 0x8ad   : > { %p15591_p3 = por %p15590_p4, %p15589_p12 }
 0x8af   : > { %p15592_p0 = pnand %p15591_p3, %p15585_p13 }
 0x8b1   : > { %15595 = shalt.err (!%p15592_p0)
}
 0x8b2   : > { %15280 = dma.vmem_to_hbm [thread:$0]  (%p18609_p7), %s10687_s5, 128, %s18017_s20, %s10668_s28  }
 0x8b3   : > { %s590_s12 = scalar_lea.vmem [#allocation14], %s10934_s23  ;;  %s18610_s28 = sld [smem:[#allocation87_spill]] }
 0x8b4   : > { %s10699_s29 = sshll.u32 %s590_s12, 4  ;;  %s10673_s26 = scalar_lea.sflag [#allocation15], %s16111_s9  ;;  %s18039_s29 = int_to_ptr.vmem [resolvable:$true] %s10699_s29 }
 0x8b5   : > { %s15596_s7 = scalar_lea.vmem %s18039_s29, 128  ;;  %s15721_s23 = smov [#allocation14]  }
 0x8b6   : > { %p15597_p11 = scmp.ne.s32.totalorder %s18039_s29, %s15596_s7  ;;  %s15600_s22 = sshll.u32 %s15721_s23, 4  ;;  %s15601_s22 = int_to_ptr.vmem [resolvable:$false] %s15600_s22 }
 0x8b7   : > { %s15602_s24 = scalar_lea.vmem %s15601_s22, 256  ;;  %p15603_p1 = scmp.lt.s32.totalorder %s18039_s29, %s15601_s22 }
 0x8b8   : > { %p15598_p10 = pnand %p15597_p11, %p18609_p7  ;;  %p15604_p6 = scmp.lt.s32.totalorder %s15602_s24, %s15596_s7 }
 0x8b9   : > { %s18046_s30 = scalar_lea.hbm %s18610_s28, %s10940_s21 }
 0x8ba   : > { %p15599_p2 = pneg %p15598_p10  ;;  %p15605_p5 = por %p15604_p6, %p15603_p1 }
 0x8bc   : > { %p15606_p13 = pnand %p15605_p5, %p15599_p2 }
 0x908   : > { %v10655_v59 = vpop.xlane.xlu0 %10654 }
 0x909   : > { %v10656_v36 = vrot.slane %v10655_v59, 4 }
 0x90b   : > { %v10657_v14 = vadd.f32 %v10656_v36, %v10655_v59 }
 0x90d   : > { %v10658_v57 = vrot.slane %v10657_v14, 2 }
 0x90f   : > { %v10659_v16 = vadd.f32 %v10658_v57, %v10657_v14 }
 0x911   : > { %v10660_v10 = vrot.slane %v10659_v16, 1 }
 0x913   : > { %v10661_v4 = vadd.f32 %v10660_v10, %v10659_v16 }
 0x915   : > { %15262 = vpush %v10661_v4 }
 0x946   : > { %s15263_s17 = spop %15262 }
 0x947   : > { %v10665_v48 = vstv %s15263_s17 }
 0x948   : > { %10666 = vst [vmem:[%s590_s12] sm:$0xff] %v10665_v48 }
 0x949   : > { %15609 = shalt.err (!%p15606_p13)
}
 0x94a   : > { %s15610_s16 = scalar_lea.hbm %s18046_s30, 128  ;;  %s15614_s19 = scalar_lea.hbm %s18610_s28, 384 }
 0x94b   : > { %p15611_p8 = scmp.ne.s32.totalorder %s18046_s30, %s15610_s16  ;;  %p15615_p4 = scmp.lt.u32.totalorder %s18046_s30, %s18610_s28 }
 0x94c   : > { %p15616_p3 = scmp.lt.u32.totalorder %s15614_s19, %s15610_s16  ;;  %p15618_p11 = scmp.lt.u32.totalorder %s15610_s16, %s18046_s30 }
 0x94d   : > { %p15612_p9 = pnand %p15611_p8, %p18609_p7 }
 0x94e   : > { %p15617_p0 = por %p15616_p3, %p15615_p4 }
 0x94f   : > { %p15613_p12 = pneg %p15612_p9 }
 0x950   : > { %p15619_p10 = por %p15618_p11, %p15617_p0 }
 0x952   : > { %p15620_p2 = pnand %p15619_p10, %p15613_p12 }
 0x954   : > { %15623 = shalt.err (!%p15620_p2)
}
 0x955   : > { %15281 = dma.vmem_to_hbm [thread:$0]  (%p18609_p7), %s18039_s29, 128, %s18046_s30, %s10673_s26  }
 0x956 PF: > { %s18611_s5 = sld [smem:[#allocation24_spill]]  ;;  %s18612_s20 = sld [smem:[#allocation25_spill]] }
 0x957   : > { %p15316_p1 = scmp.ge.s32.totalorder %s15710_s15, 2 }
 0x95c   : > { %s10711_s7 = sand.u32 1, %s18611_s5   ;;  %p18613_p6 = scmp.ne.s32.totalorder %s18612_s20, 0 }
 0x95d   : > { %s10712_s23 = scalar_lea.sflag [#allocation4], %s10711_s7 }
 0x95e   : > { %p15305_p5 = pnand %p15316_p1, %p18613_p6 }
 0x960   : > { %15677 = dma.done.wait (!%p15305_p5), %s10712_s23, 128  }
 0x961   : > { %15679 = vsyncadd (!%p15305_p5), %s10712_s23, 4294967168  ;;  %s10721_s22 = scalar_lea.sflag [#allocation15], %s10711_s7 }
 0x962   : > { %15681 = dma.done.wait (!%p15305_p5), %s10721_s22, 128  }
 0x963   : > { %15683 = vsyncadd (!%p15305_p5), %s10721_s22, 4294967168  ;;  %s18614_s6 = sld [smem:[#allocation26_spill]]  ;;  %p33_p7 = scmp.ge.s32.totalorder %s15845_s25, 5  }
 0x964   : > { %s18615_s30 = smov %s15690_s10  ;;  %s18616_s10 = smov %s15694_s11 }
 0x965   : > { %s18617_s11 = smov %s16102_s8  ;;  %s18618_s12 = smov %s15702_s13 }
 0x966   : > { %s18619_s13 = smov %s15706_s14  ;;  %s18621_s15 = smov %s15845_s25 }
 0x967   :  { %35 = sbr.rel (!%p33_p7) target bundleno = 21 (0x15), region = 160 }
 0x969   : > { %s18620_s14 = smov %s18614_s6 }
 0x96e   :  { %10726 = vsyncpa [#allocation3], 1 }
 0x96f   :  { %10728 = vsyncpa [#allocation3 + $0x1], 1 }
 0x970   :  { %10729 = vsyncpa [#allocation8], 1 }
 0x971   :  { %10731 = vsyncpa [#allocation8 + $0x1], 1 }
 0x972   :  { %10732 = vsyncpa [#allocation11], 1 }
 0x973   :  { %10734 = vsyncpa [#allocation11 + $0x1], 1 }
 0x974   :  { %10735 = vsyncpa [#allocation4], 1 }
 0x975   :  { %10737 = vsyncpa [#allocation4 + $0x1], 1 }
 0x976   :  { %10738 = vsyncpa [#allocation15], 1 }
 0x977   :  { %10740 = vsyncpa [#allocation15 + $0x1], 1 }
 0x978   :  { %10741 = vsyncpa [#allocation5], 1 }
 0x979   :  { %10743 = vsyncpa [#allocation5 + $0x1], 1 }

</bundles_post_ra>
